<compile_context>
chip_gen: v5e
topology: v5e:2x2
jax: 0.10.0
libtpu: 0.0.40
codegen_flags: <defaults>
</compile_context>

<pallas_src>
import jax
import jax.numpy as jnp
from jax.experimental import pallas as pl
from jax.experimental.pallas import tpu as pltpu


# ----------------------------------------------------------------------------
# Fused Pallas kernel (factory over static num_layers / T / B / H)
# ----------------------------------------------------------------------------
def make_fused_gru_kernel(num_layers, T, B, H):
    """Kernel args (all VMEM):
       x_ref:                (T*B, D0)        time-major, row block t*B:(t+1)*B == time t
       per layer l:          wih_l (2, D_in, 3H), whh_l (6, H, H), b_l (8, H)
                              whh_l rows: [dir*3 + gate] (gates r, z, n), already transposed
                              b_l   rows: [dir*4 + k], k = 0:(b_ir+b_hr) 1:(b_iz+b_hz) 2:b_in 3:b_hn
       w_fc (2H, O), b_fc (1, O)
       out_ref (B, O)
       scratch: act_ref (2, T*B, H)  -- layer output (dir-major) feeding the next layer
    """

    def kernel(x_ref, *refs):
        w_fc_ref = refs[3 * num_layers]
        b_fc_ref = refs[3 * num_layers + 1]
        out_ref = refs[3 * num_layers + 2]
        act_ref = refs[3 * num_layers + 3]

        def cell(gi_r, gi_z, gi_n, t, h, whh_r, whh_z, whh_n, bh_n):
            lo, hi = t * B, (t + 1) * B
            gh_r = jnp.dot(h, whh_r, preferred_element_type=jnp.float32)
            gh_z = jnp.dot(h, whh_z, preferred_element_type=jnp.float32)
            gh_n = jnp.dot(h, whh_n, preferred_element_type=jnp.float32) + bh_n
            r = jax.nn.sigmoid(gi_r[lo:hi, :] + gh_r)
            z = jax.nn.sigmoid(gi_z[lo:hi, :] + gh_z)
            n = jnp.tanh(gi_n[lo:hi, :] + r * gh_n)
            return n + z * (h - n)          # == (1 - z) * n + z * h

        h_f = None
        h_b = None
        for l in range(num_layers):
            wih_all = refs[3 * l][...]       # (2, D_in, 3H)
            whh_all = refs[3 * l + 1][...]   # (6, H, H)
            b_all = refs[3 * l + 2][...]     # (8, H)
            is_last = (l == num_layers - 1)

            # ---- hoisted input projection for both directions (out of the loop) ----
            gi, whh, bhn = [], [], []
            for d in range(2):
                wih = wih_all[d]             # (D_in, 3H), gate columns [r | z | n]
                if l == 0:
                    g = jnp.dot(x_ref[...], wih, preferred_element_type=jnp.float32)
                else:
                    # previous layer output lives in VMEM scratch, direction-major;
                    # split the weight rows instead of concatenating activations.
                    g = (jnp.dot(act_ref[0], wih[0:H, :],
                                 preferred_element_type=jnp.float32)
                         + jnp.dot(act_ref[1], wih[H:2 * H, :],
                                   preferred_element_type=jnp.float32))
                gi.append((g[:, 0:H] + b_all[4 * d + 0:4 * d + 1, :],
                           g[:, H:2 * H] + b_all[4 * d + 1:4 * d + 2, :],
                           g[:, 2 * H:3 * H] + b_all[4 * d + 2:4 * d + 3, :]))
                whh.append((whh_all[3 * d + 0], whh_all[3 * d + 1], whh_all[3 * d + 2]))
                bhn.append(b_all[4 * d + 3:4 * d + 4, :])

            # ---- recurrence: fully unrolled, fwd/bwd interleaved ----
            h_f = jnp.zeros((B, H), jnp.float32)
            h_b = jnp.zeros((B, H), jnp.float32)
            for t in range(T):
                tb = T - 1 - t
                h_f = cell(*gi[0], t, h_f, *whh[0], bhn[0])
                if (not is_last) or t == 0:
                    # last layer only needs h_bwd at time T-1 (its first step)
                    h_b = cell(*gi[1], tb, h_b, *whh[1], bhn[1])
                if not is_last:
                    act_ref[0, t * B:(t + 1) * B, :] = h_f
                    act_ref[1, tb * B:(tb + 1) * B, :] = h_b

        # ---- fused fc on out[:, -1, :] = concat(h_fwd[T-1], h_bwd@time T-1) ----
        wfc = w_fc_ref[...]                  # (2H, O)
        out = (jnp.dot(h_f, wfc[0:H, :], preferred_element_type=jnp.float32)
               + jnp.dot(h_b, wfc[H:2 * H, :], preferred_element_type=jnp.float32)
               + b_fc_ref[...])
        out_ref[...] = out.astype(out_ref.dtype)

    return kernel


# ----------------------------------------------------------------------------
# Wrapper
# ----------------------------------------------------------------------------
def torch_gru_forward(x, packed, layer_dim, hidden_dim, output_dim):
    """x: (B, T, input_dim), batch-first like the PyTorch module."""
    B, T, D = x.shape
    # Tiny one-time layout prep: time-major 2-D slab (row block t == time t).
    x2 = jnp.transpose(x, (1, 0, 2)).reshape(T * B, D).astype(jnp.float32)

    args = [x2]
    for l in range(layer_dim):
        args.extend(packed[f"l{l}"])
    args.extend(packed["fc"])

    vmem = pl.BlockSpec(memory_space=pltpu.MemorySpace.VMEM)
    return pl.pallas_call(
        make_fused_gru_kernel(layer_dim, T, B, hidden_dim),
        out_shape=jax.ShapeDtypeStruct((B, output_dim), jnp.float32),
        in_specs=[vmem] * len(args),
        out_specs=vmem,
        scratch_shapes=[pltpu.VMEM((2, T * B, hidden_dim), jnp.float32)],
    )(*args)


# ----------------------------------------------------------------------------
# Parameter prep (PyTorch layout -> packed, pre-transposed kernel layout; once)
# ----------------------------------------------------------------------------
def pack_params(params, layer_dim, hidden_dim):
    H = hidden_dim
    packed = {}
    for l in range(layer_dim):
        wihs, whhs, bs = [], [], []
        for d in range(2):
            w_ih, w_hh, b_ih, b_hh = params[f"gru_l{l}_d{d}"]
            wihs.append(jnp.transpose(w_ih).astype(jnp.float32))            # (D_in, 3H)
            for g in range(3):                                              # r, z, n
                whhs.append(jnp.transpose(w_hh[g * H:(g + 1) * H, :]).astype(jnp.float32))
            bs.extend([
                (b_ih[0:H] + b_hh[0:H]).astype(jnp.float32),                # b_r
                (b_ih[H:2 * H] + b_hh[H:2 * H]).astype(jnp.float32),        # b_z
                b_ih[2 * H:3 * H].astype(jnp.float32),                      # b_in
                b_hh[2 * H:3 * H].astype(jnp.float32),                      # b_hn
            ])
        packed[f"l{l}"] = (jnp.stack(wihs, 0),   # (2, D_in, 3H)
                           jnp.stack(whhs, 0),   # (6, H, H)
                           jnp.stack(bs, 0))     # (8, H)
    w_fc, b_fc = params["fc"]
    packed["fc"] = (jnp.transpose(w_fc).astype(jnp.float32),                # (2H, O)
                    b_fc.reshape(1, -1).astype(jnp.float32))                # (1, O)
    return packed


# ----------------------------------------------------------------------------
# Deterministic parameter init (mirrors nn.GRU / nn.Linear shapes)
# ----------------------------------------------------------------------------
def init_params(key, input_dim, hidden_dim, layer_dim, output_dim):
    params = {}
    k_gru = 1.0 / jnp.sqrt(hidden_dim)
    for layer in range(layer_dim):
        d_in = input_dim if layer == 0 else 2 * hidden_dim
        for direction in range(2):
            key, k1, k2, k3, k4 = jax.random.split(key, 5)
            w_ih = jax.random.uniform(k1, (3 * hidden_dim, d_in), jnp.float32, -k_gru, k_gru)
            w_hh = jax.random.uniform(k2, (3 * hidden_dim, hidden_dim), jnp.float32, -k_gru, k_gru)
            b_ih = jax.random.uniform(k3, (3 * hidden_dim,), jnp.float32, -k_gru, k_gru)
            b_hh = jax.random.uniform(k4, (3 * hidden_dim,), jnp.float32, -k_gru, k_gru)
            params[f"gru_l{layer}_d{direction}"] = (w_ih, w_hh, b_ih, b_hh)
    k_fc = 1.0 / jnp.sqrt(2 * hidden_dim)
    key, k1, k2 = jax.random.split(key, 3)
    w_fc = jax.random.uniform(k1, (output_dim, 2 * hidden_dim), jnp.float32, -k_fc, k_fc)
    b_fc = jax.random.uniform(k2, (output_dim,), jnp.float32, -k_fc, k_fc)
    params["fc"] = (w_fc, b_fc)
    return params


# ----------------------------------------------------------------------------
# Pure-JAX reference (PyTorch semantics) for a correctness sanity check
# ----------------------------------------------------------------------------
def gru_reference(x, params, layer_dim, hidden_dim):
    B, T, _ = x.shape
    H = hidden_dim
    inp = x.astype(jnp.float32)                       # (B, T, D)
    for l in range(layer_dim):
        outs = []
        for d in range(2):
            w_ih, w_hh, b_ih, b_hh = params[f"gru_l{l}_d{d}"]
            h = jnp.zeros((B, H), jnp.float32)
            hs = [None] * T
            order = range(T) if d == 0 else range(T - 1, -1, -1)
            for t in order:
                x_t = inp[:, t, :]
                gi = x_t @ w_ih.T + b_ih
                gh = h @ w_hh.T + b_hh
                r = jax.nn.sigmoid(gi[:, :H] + gh[:, :H])
                z = jax.nn.sigmoid(gi[:, H:2 * H] + gh[:, H:2 * H])
                n = jnp.tanh(gi[:, 2 * H:] + r * gh[:, 2 * H:])
                h = (1.0 - z) * n + z * h
                hs[t] = h
            outs.append(jnp.stack(hs, axis=1))        # (B, T, H)
        inp = jnp.concatenate(outs, axis=-1)          # (B, T, 2H)
    last = inp[:, -1, :]
    w_fc, b_fc = params["fc"]
    return last @ w_fc.T + b_fc


# ----------------------------------------------------------------------------
if __name__ == "__main__":
    # TorchGRU(input_dim=8, hidden_dim=32, h2=unused, layer_dim=2, output_dim=4, dropout=0.0)
    B, T = 2, 8
    INPUT_DIM, HIDDEN_DIM, LAYER_DIM, OUTPUT_DIM = 8, 32, 2, 4

    key = jax.random.PRNGKey(0)
    key, kx = jax.random.split(key)
    x = jax.random.normal(kx, (B, T, INPUT_DIM), dtype=jnp.float32)

    params = init_params(key, INPUT_DIM, HIDDEN_DIM, LAYER_DIM, OUTPUT_DIM)
    packed = pack_params(params, LAYER_DIM, HIDDEN_DIM)   # one-time weight packing
    # TODO(synk): inter-layer dropout omitted (eval-mode semantics).

    fwd = jax.jit(torch_gru_forward, static_argnums=(2, 3, 4))
    y = jax.block_until_ready(fwd(x, packed, LAYER_DIM, HIDDEN_DIM, OUTPUT_DIM))

    assert y.shape == (B, OUTPUT_DIM), y.shape
    assert bool(jnp.all(jnp.isfinite(y)))

    y_ref = gru_reference(x, params, LAYER_DIM, HIDDEN_DIM)
    assert bool(jnp.allclose(y, y_ref, atol=5e-2, rtol=5e-2))

    print("KERNEL_OK")
</pallas_src>

<mosaic_0001>
module attributes {stable_mosaic.version = 11 : i64} {
  func.func @kernel(%arg0: memref<16x8xf32, #tpu.memory_space<vmem>>, %arg1: memref<2x8x96xf32, #tpu.memory_space<vmem>>, %arg2: memref<6x32x32xf32, #tpu.memory_space<vmem>>, %arg3: memref<8x32xf32, #tpu.memory_space<vmem>>, %arg4: memref<2x64x96xf32, #tpu.memory_space<vmem>>, %arg5: memref<6x32x32xf32, #tpu.memory_space<vmem>>, %arg6: memref<8x32xf32, #tpu.memory_space<vmem>>, %arg7: memref<64x4xf32, #tpu.memory_space<vmem>>, %arg8: memref<1x4xf32, #tpu.memory_space<vmem>>, %arg9: memref<2x4xf32, #tpu.memory_space<vmem>>, %arg10: memref<2x16x32xf32, #tpu.memory_space<vmem>>) attributes {dimension_semantics = [], scalar_prefetch = 0 : i64, scratch_operands = 1 : i64, tpu.core_type = #tpu.core_type<tc>} {
    %c0 = arith.constant 0 : index
    %c0_0 = arith.constant 0 : index
    %c0_1 = arith.constant 0 : index
    %0 = vector.load %arg1[%c0, %c0_0, %c0_1] : memref<2x8x96xf32, #tpu.memory_space<vmem>>, vector<2x8x96xf32>
    %c0_2 = arith.constant 0 : index
    %c0_3 = arith.constant 0 : index
    %c0_4 = arith.constant 0 : index
    %1 = vector.load %arg2[%c0_2, %c0_3, %c0_4] : memref<6x32x32xf32, #tpu.memory_space<vmem>>, vector<6x32x32xf32>
    %c0_5 = arith.constant 0 : index
    %c0_6 = arith.constant 0 : index
    %2 = vector.load %arg3[%c0_5, %c0_6] : memref<8x32xf32, #tpu.memory_space<vmem>>, vector<8x32xf32>
    %3 = vector.extract_strided_slice %0 {offsets = [0, 0, 0], sizes = [1, 8, 96], strides = [1, 1, 1]} : vector<2x8x96xf32> to vector<1x8x96xf32>
    %4 = vector.shape_cast %3 : vector<1x8x96xf32> to vector<8x96xf32>
    %c0_7 = arith.constant 0 : index
    %c0_8 = arith.constant 0 : index
    %5 = vector.load %arg0[%c0_7, %c0_8] : memref<16x8xf32, #tpu.memory_space<vmem>>, vector<16x8xf32>
    %cst = arith.constant dense<0.000000e+00> : vector<16x96xf32>
    %6 = tpu.matmul %5, %4, %cst {dimension_numbers = #tpu.dot_dimension_numbers<[1], [0], [0], [1], [0, 0, 1, 1], [], []>} : vector<16x8xf32>, vector<8x96xf32>, vector<16x96xf32> -> vector<16x96xf32>
    %7 = vector.extract_strided_slice %6 {offsets = [0, 0], sizes = [16, 32], strides = [1, 1]} : vector<16x96xf32> to vector<16x32xf32>
    %8 = vector.extract_strided_slice %2 {offsets = [0, 0], sizes = [1, 32], strides = [1, 1]} : vector<8x32xf32> to vector<1x32xf32>
    %9 = vector.broadcast %8 : vector<1x32xf32> to vector<16x32xf32>
    %10 = arith.addf %7, %9 : vector<16x32xf32>
    %11 = vector.extract_strided_slice %6 {offsets = [0, 32], sizes = [16, 32], strides = [1, 1]} : vector<16x96xf32> to vector<16x32xf32>
    %12 = vector.extract_strided_slice %2 {offsets = [1, 0], sizes = [1, 32], strides = [1, 1]} : vector<8x32xf32> to vector<1x32xf32>
    %13 = vector.broadcast %12 : vector<1x32xf32> to vector<16x32xf32>
    %14 = arith.addf %11, %13 : vector<16x32xf32>
    %15 = vector.extract_strided_slice %6 {offsets = [0, 64], sizes = [16, 32], strides = [1, 1]} : vector<16x96xf32> to vector<16x32xf32>
    %16 = vector.extract_strided_slice %2 {offsets = [2, 0], sizes = [1, 32], strides = [1, 1]} : vector<8x32xf32> to vector<1x32xf32>
    %17 = vector.broadcast %16 : vector<1x32xf32> to vector<16x32xf32>
    %18 = arith.addf %15, %17 : vector<16x32xf32>
    %19 = vector.extract_strided_slice %1 {offsets = [0, 0, 0], sizes = [1, 32, 32], strides = [1, 1, 1]} : vector<6x32x32xf32> to vector<1x32x32xf32>
    %20 = vector.shape_cast %19 : vector<1x32x32xf32> to vector<32x32xf32>
    %21 = vector.extract_strided_slice %1 {offsets = [1, 0, 0], sizes = [1, 32, 32], strides = [1, 1, 1]} : vector<6x32x32xf32> to vector<1x32x32xf32>
    %22 = vector.shape_cast %21 : vector<1x32x32xf32> to vector<32x32xf32>
    %23 = vector.extract_strided_slice %1 {offsets = [2, 0, 0], sizes = [1, 32, 32], strides = [1, 1, 1]} : vector<6x32x32xf32> to vector<1x32x32xf32>
    %24 = vector.shape_cast %23 : vector<1x32x32xf32> to vector<32x32xf32>
    %25 = vector.extract_strided_slice %2 {offsets = [3, 0], sizes = [1, 32], strides = [1, 1]} : vector<8x32xf32> to vector<1x32xf32>
    %26 = vector.extract_strided_slice %0 {offsets = [1, 0, 0], sizes = [1, 8, 96], strides = [1, 1, 1]} : vector<2x8x96xf32> to vector<1x8x96xf32>
    %27 = vector.shape_cast %26 : vector<1x8x96xf32> to vector<8x96xf32>
    %c0_9 = arith.constant 0 : index
    %c0_10 = arith.constant 0 : index
    %28 = vector.load %arg0[%c0_9, %c0_10] : memref<16x8xf32, #tpu.memory_space<vmem>>, vector<16x8xf32>
    %cst_11 = arith.constant dense<0.000000e+00> : vector<16x96xf32>
    %29 = tpu.matmul %28, %27, %cst_11 {dimension_numbers = #tpu.dot_dimension_numbers<[1], [0], [0], [1], [0, 0, 1, 1], [], []>} : vector<16x8xf32>, vector<8x96xf32>, vector<16x96xf32> -> vector<16x96xf32>
    %30 = vector.extract_strided_slice %29 {offsets = [0, 0], sizes = [16, 32], strides = [1, 1]} : vector<16x96xf32> to vector<16x32xf32>
    %31 = vector.extract_strided_slice %2 {offsets = [4, 0], sizes = [1, 32], strides = [1, 1]} : vector<8x32xf32> to vector<1x32xf32>
    %32 = vector.broadcast %31 : vector<1x32xf32> to vector<16x32xf32>
    %33 = arith.addf %30, %32 : vector<16x32xf32>
    %34 = vector.extract_strided_slice %29 {offsets = [0, 32], sizes = [16, 32], strides = [1, 1]} : vector<16x96xf32> to vector<16x32xf32>
    %35 = vector.extract_strided_slice %2 {offsets = [5, 0], sizes = [1, 32], strides = [1, 1]} : vector<8x32xf32> to vector<1x32xf32>
    %36 = vector.broadcast %35 : vector<1x32xf32> to vector<16x32xf32>
    %37 = arith.addf %34, %36 : vector<16x32xf32>
    %38 = vector.extract_strided_slice %29 {offsets = [0, 64], sizes = [16, 32], strides = [1, 1]} : vector<16x96xf32> to vector<16x32xf32>
    %39 = vector.extract_strided_slice %2 {offsets = [6, 0], sizes = [1, 32], strides = [1, 1]} : vector<8x32xf32> to vector<1x32xf32>
    %40 = vector.broadcast %39 : vector<1x32xf32> to vector<16x32xf32>
    %41 = arith.addf %38, %40 : vector<16x32xf32>
    %42 = vector.extract_strided_slice %1 {offsets = [3, 0, 0], sizes = [1, 32, 32], strides = [1, 1, 1]} : vector<6x32x32xf32> to vector<1x32x32xf32>
    %43 = vector.shape_cast %42 : vector<1x32x32xf32> to vector<32x32xf32>
    %44 = vector.extract_strided_slice %1 {offsets = [4, 0, 0], sizes = [1, 32, 32], strides = [1, 1, 1]} : vector<6x32x32xf32> to vector<1x32x32xf32>
    %45 = vector.shape_cast %44 : vector<1x32x32xf32> to vector<32x32xf32>
    %46 = vector.extract_strided_slice %1 {offsets = [5, 0, 0], sizes = [1, 32, 32], strides = [1, 1, 1]} : vector<6x32x32xf32> to vector<1x32x32xf32>
    %47 = vector.shape_cast %46 : vector<1x32x32xf32> to vector<32x32xf32>
    %48 = vector.extract_strided_slice %2 {offsets = [7, 0], sizes = [1, 32], strides = [1, 1]} : vector<8x32xf32> to vector<1x32xf32>
    %cst_12 = arith.constant 0.000000e+00 : f32
    %49 = vector.broadcast %cst_12 : f32 to vector<2x32xf32>
    %cst_13 = arith.constant 0.000000e+00 : f32
    %50 = vector.broadcast %cst_13 : f32 to vector<2x32xf32>
    %cst_14 = arith.constant dense<0.000000e+00> : vector<2x32xf32>
    %51 = tpu.matmul %49, %20, %cst_14 {dimension_numbers = #tpu.dot_dimension_numbers<[1], [0], [0], [1], [0, 0, 1, 1], [], []>} : vector<2x32xf32>, vector<32x32xf32>, vector<2x32xf32> -> vector<2x32xf32>
    %cst_15 = arith.constant dense<0.000000e+00> : vector<2x32xf32>
    %52 = tpu.matmul %49, %22, %cst_15 {dimension_numbers = #tpu.dot_dimension_numbers<[1], [0], [0], [1], [0, 0, 1, 1], [], []>} : vector<2x32xf32>, vector<32x32xf32>, vector<2x32xf32> -> vector<2x32xf32>
    %cst_16 = arith.constant dense<0.000000e+00> : vector<2x32xf32>
    %53 = tpu.matmul %49, %24, %cst_16 {dimension_numbers = #tpu.dot_dimension_numbers<[1], [0], [0], [1], [0, 0, 1, 1], [], []>} : vector<2x32xf32>, vector<32x32xf32>, vector<2x32xf32> -> vector<2x32xf32>
    %54 = vector.broadcast %25 : vector<1x32xf32> to vector<2x32xf32>
    %55 = arith.addf %53, %54 : vector<2x32xf32>
    %56 = vector.extract_strided_slice %10 {offsets = [0, 0], sizes = [2, 32], strides = [1, 1]} : vector<16x32xf32> to vector<2x32xf32>
    %57 = arith.addf %56, %51 : vector<2x32xf32>
    %58 = arith.negf %57 : vector<2x32xf32>
    %59 = math.exp %58 : vector<2x32xf32>
    %cst_17 = arith.constant 1.000000e+00 : f32
    %60 = vector.broadcast %cst_17 : f32 to vector<2x32xf32>
    %61 = arith.addf %60, %59 : vector<2x32xf32>
    %62 = arith.divf %60, %61 : vector<2x32xf32>
    %63 = vector.extract_strided_slice %14 {offsets = [0, 0], sizes = [2, 32], strides = [1, 1]} : vector<16x32xf32> to vector<2x32xf32>
    %64 = arith.addf %63, %52 : vector<2x32xf32>
    %65 = arith.negf %64 : vector<2x32xf32>
    %66 = math.exp %65 : vector<2x32xf32>
    %cst_18 = arith.constant 1.000000e+00 : f32
    %67 = vector.broadcast %cst_18 : f32 to vector<2x32xf32>
    %68 = arith.addf %67, %66 : vector<2x32xf32>
    %69 = arith.divf %67, %68 : vector<2x32xf32>
    %70 = vector.extract_strided_slice %18 {offsets = [0, 0], sizes = [2, 32], strides = [1, 1]} : vector<16x32xf32> to vector<2x32xf32>
    %71 = arith.mulf %62, %55 : vector<2x32xf32>
    %72 = arith.addf %70, %71 : vector<2x32xf32>
    %73 = math.tanh %72 : vector<2x32xf32>
    %74 = arith.subf %49, %73 : vector<2x32xf32>
    %75 = arith.mulf %69, %74 : vector<2x32xf32>
    %76 = arith.addf %73, %75 : vector<2x32xf32>
    %cst_19 = arith.constant dense<0.000000e+00> : vector<2x32xf32>
    %77 = tpu.matmul %50, %43, %cst_19 {dimension_numbers = #tpu.dot_dimension_numbers<[1], [0], [0], [1], [0, 0, 1, 1], [], []>} : vector<2x32xf32>, vector<32x32xf32>, vector<2x32xf32> -> vector<2x32xf32>
    %cst_20 = arith.constant dense<0.000000e+00> : vector<2x32xf32>
    %78 = tpu.matmul %50, %45, %cst_20 {dimension_numbers = #tpu.dot_dimension_numbers<[1], [0], [0], [1], [0, 0, 1, 1], [], []>} : vector<2x32xf32>, vector<32x32xf32>, vector<2x32xf32> -> vector<2x32xf32>
    %cst_21 = arith.constant dense<0.000000e+00> : vector<2x32xf32>
    %79 = tpu.matmul %50, %47, %cst_21 {dimension_numbers = #tpu.dot_dimension_numbers<[1], [0], [0], [1], [0, 0, 1, 1], [], []>} : vector<2x32xf32>, vector<32x32xf32>, vector<2x32xf32> -> vector<2x32xf32>
    %80 = vector.broadcast %48 : vector<1x32xf32> to vector<2x32xf32>
    %81 = arith.addf %79, %80 : vector<2x32xf32>
    %82 = vector.extract_strided_slice %33 {offsets = [14, 0], sizes = [2, 32], strides = [1, 1]} : vector<16x32xf32> to vector<2x32xf32>
    %83 = arith.addf %82, %77 : vector<2x32xf32>
    %84 = arith.negf %83 : vector<2x32xf32>
    %85 = math.exp %84 : vector<2x32xf32>
    %cst_22 = arith.constant 1.000000e+00 : f32
    %86 = vector.broadcast %cst_22 : f32 to vector<2x32xf32>
    %87 = arith.addf %86, %85 : vector<2x32xf32>
    %88 = arith.divf %86, %87 : vector<2x32xf32>
    %89 = vector.extract_strided_slice %37 {offsets = [14, 0], sizes = [2, 32], strides = [1, 1]} : vector<16x32xf32> to vector<2x32xf32>
    %90 = arith.addf %89, %78 : vector<2x32xf32>
    %91 = arith.negf %90 : vector<2x32xf32>
    %92 = math.exp %91 : vector<2x32xf32>
    %cst_23 = arith.constant 1.000000e+00 : f32
    %93 = vector.broadcast %cst_23 : f32 to vector<2x32xf32>
    %94 = arith.addf %93, %92 : vector<2x32xf32>
    %95 = arith.divf %93, %94 : vector<2x32xf32>
    %96 = vector.extract_strided_slice %41 {offsets = [14, 0], sizes = [2, 32], strides = [1, 1]} : vector<16x32xf32> to vector<2x32xf32>
    %97 = arith.mulf %88, %81 : vector<2x32xf32>
    %98 = arith.addf %96, %97 : vector<2x32xf32>
    %99 = math.tanh %98 : vector<2x32xf32>
    %100 = arith.subf %50, %99 : vector<2x32xf32>
    %101 = arith.mulf %95, %100 : vector<2x32xf32>
    %102 = arith.addf %99, %101 : vector<2x32xf32>
    %c0_24 = arith.constant 0 : index
    %c0_25 = arith.constant 0 : index
    %c0_26 = arith.constant 0 : index
    %103 = vector.load %arg10[%c0_24, %c0_25, %c0_26] : memref<2x16x32xf32, #tpu.memory_space<vmem>>, vector<1x2x32xf32>
    %104 = vector.shape_cast %103 : vector<1x2x32xf32> to vector<2x32xf32>
    %105 = vector.shape_cast %76 : vector<2x32xf32> to vector<1x2x32xf32>
    tpu.vector_store %arg10[%c0_24, %c0_25, %c0_26], %105 {strides = array<i32>} : memref<2x16x32xf32, #tpu.memory_space<vmem>>, vector<1x2x32xf32>,
    %c1 = arith.constant 1 : index
    %c14 = arith.constant 14 : index
    %c0_27 = arith.constant 0 : index
    %106 = vector.load %arg10[%c1, %c14, %c0_27] : memref<2x16x32xf32, #tpu.memory_space<vmem>>, vector<1x2x32xf32>
    %107 = vector.shape_cast %106 : vector<1x2x32xf32> to vector<2x32xf32>
    %108 = vector.shape_cast %102 : vector<2x32xf32> to vector<1x2x32xf32>
    tpu.vector_store %arg10[%c1, %c14, %c0_27], %108 {strides = array<i32>} : memref<2x16x32xf32, #tpu.memory_space<vmem>>, vector<1x2x32xf32>,
    %cst_28 = arith.constant dense<0.000000e+00> : vector<2x32xf32>
    %109 = tpu.matmul %76, %20, %cst_28 {dimension_numbers = #tpu.dot_dimension_numbers<[1], [0], [0], [1], [0, 0, 1, 1], [], []>} : vector<2x32xf32>, vector<32x32xf32>, vector<2x32xf32> -> vector<2x32xf32>
    %cst_29 = arith.constant dense<0.000000e+00> : vector<2x32xf32>
    %110 = tpu.matmul %76, %22, %cst_29 {dimension_numbers = #tpu.dot_dimension_numbers<[1], [0], [0], [1], [0, 0, 1, 1], [], []>} : vector<2x32xf32>, vector<32x32xf32>, vector<2x32xf32> -> vector<2x32xf32>
    %cst_30 = arith.constant dense<0.000000e+00> : vector<2x32xf32>
    %111 = tpu.matmul %76, %24, %cst_30 {dimension_numbers = #tpu.dot_dimension_numbers<[1], [0], [0], [1], [0, 0, 1, 1], [], []>} : vector<2x32xf32>, vector<32x32xf32>, vector<2x32xf32> -> vector<2x32xf32>
    %112 = vector.broadcast %25 : vector<1x32xf32> to vector<2x32xf32>
    %113 = arith.addf %111, %112 : vector<2x32xf32>
    %114 = vector.extract_strided_slice %10 {offsets = [2, 0], sizes = [2, 32], strides = [1, 1]} : vector<16x32xf32> to vector<2x32xf32>
    %115 = arith.addf %114, %109 : vector<2x32xf32>
    %116 = arith.negf %115 : vector<2x32xf32>
    %117 = math.exp %116 : vector<2x32xf32>
    %cst_31 = arith.constant 1.000000e+00 : f32
    %118 = vector.broadcast %cst_31 : f32 to vector<2x32xf32>
    %119 = arith.addf %118, %117 : vector<2x32xf32>
    %120 = arith.divf %118, %119 : vector<2x32xf32>
    %121 = vector.extract_strided_slice %14 {offsets = [2, 0], sizes = [2, 32], strides = [1, 1]} : vector<16x32xf32> to vector<2x32xf32>
    %122 = arith.addf %121, %110 : vector<2x32xf32>
    %123 = arith.negf %122 : vector<2x32xf32>
    %124 = math.exp %123 : vector<2x32xf32>
    %cst_32 = arith.constant 1.000000e+00 : f32
    %125 = vector.broadcast %cst_32 : f32 to vector<2x32xf32>
    %126 = arith.addf %125, %124 : vector<2x32xf32>
    %127 = arith.divf %125, %126 : vector<2x32xf32>
    %128 = vector.extract_strided_slice %18 {offsets = [2, 0], sizes = [2, 32], strides = [1, 1]} : vector<16x32xf32> to vector<2x32xf32>
    %129 = arith.mulf %120, %113 : vector<2x32xf32>
    %130 = arith.addf %128, %129 : vector<2x32xf32>
    %131 = math.tanh %130 : vector<2x32xf32>
    %132 = arith.subf %76, %131 : vector<2x32xf32>
    %133 = arith.mulf %127, %132 : vector<2x32xf32>
    %134 = arith.addf %131, %133 : vector<2x32xf32>
    %cst_33 = arith.constant dense<0.000000e+00> : vector<2x32xf32>
    %135 = tpu.matmul %102, %43, %cst_33 {dimension_numbers = #tpu.dot_dimension_numbers<[1], [0], [0], [1], [0, 0, 1, 1], [], []>} : vector<2x32xf32>, vector<32x32xf32>, vector<2x32xf32> -> vector<2x32xf32>
    %cst_34 = arith.constant dense<0.000000e+00> : vector<2x32xf32>
    %136 = tpu.matmul %102, %45, %cst_34 {dimension_numbers = #tpu.dot_dimension_numbers<[1], [0], [0], [1], [0, 0, 1, 1], [], []>} : vector<2x32xf32>, vector<32x32xf32>, vector<2x32xf32> -> vector<2x32xf32>
    %cst_35 = arith.constant dense<0.000000e+00> : vector<2x32xf32>
    %137 = tpu.matmul %102, %47, %cst_35 {dimension_numbers = #tpu.dot_dimension_numbers<[1], [0], [0], [1], [0, 0, 1, 1], [], []>} : vector<2x32xf32>, vector<32x32xf32>, vector<2x32xf32> -> vector<2x32xf32>
    %138 = vector.broadcast %48 : vector<1x32xf32> to vector<2x32xf32>
    %139 = arith.addf %137, %138 : vector<2x32xf32>
    %140 = vector.extract_strided_slice %33 {offsets = [12, 0], sizes = [2, 32], strides = [1, 1]} : vector<16x32xf32> to vector<2x32xf32>
    %141 = arith.addf %140, %135 : vector<2x32xf32>
    %142 = arith.negf %141 : vector<2x32xf32>
    %143 = math.exp %142 : vector<2x32xf32>
    %cst_36 = arith.constant 1.000000e+00 : f32
    %144 = vector.broadcast %cst_36 : f32 to vector<2x32xf32>
    %145 = arith.addf %144, %143 : vector<2x32xf32>
    %146 = arith.divf %144, %145 : vector<2x32xf32>
    %147 = vector.extract_strided_slice %37 {offsets = [12, 0], sizes = [2, 32], strides = [1, 1]} : vector<16x32xf32> to vector<2x32xf32>
    %148 = arith.addf %147, %136 : vector<2x32xf32>
    %149 = arith.negf %148 : vector<2x32xf32>
    %150 = math.exp %149 : vector<2x32xf32>
    %cst_37 = arith.constant 1.000000e+00 : f32
    %151 = vector.broadcast %cst_37 : f32 to vector<2x32xf32>
    %152 = arith.addf %151, %150 : vector<2x32xf32>
    %153 = arith.divf %151, %152 : vector<2x32xf32>
    %154 = vector.extract_strided_slice %41 {offsets = [12, 0], sizes = [2, 32], strides = [1, 1]} : vector<16x32xf32> to vector<2x32xf32>
    %155 = arith.mulf %146, %139 : vector<2x32xf32>
    %156 = arith.addf %154, %155 : vector<2x32xf32>
    %157 = math.tanh %156 : vector<2x32xf32>
    %158 = arith.subf %102, %157 : vector<2x32xf32>
    %159 = arith.mulf %153, %158 : vector<2x32xf32>
    %160 = arith.addf %157, %159 : vector<2x32xf32>
    %c0_38 = arith.constant 0 : index
    %c2 = arith.constant 2 : index
    %c0_39 = arith.constant 0 : index
    %161 = vector.load %arg10[%c0_38, %c2, %c0_39] : memref<2x16x32xf32, #tpu.memory_space<vmem>>, vector<1x2x32xf32>
    %162 = vector.shape_cast %161 : vector<1x2x32xf32> to vector<2x32xf32>
    %163 = vector.shape_cast %134 : vector<2x32xf32> to vector<1x2x32xf32>
    tpu.vector_store %arg10[%c0_38, %c2, %c0_39], %163 {strides = array<i32>} : memref<2x16x32xf32, #tpu.memory_space<vmem>>, vector<1x2x32xf32>,
    %c1_40 = arith.constant 1 : index
    %c12 = arith.constant 12 : index
    %c0_41 = arith.constant 0 : index
    %164 = vector.load %arg10[%c1_40, %c12, %c0_41] : memref<2x16x32xf32, #tpu.memory_space<vmem>>, vector<1x2x32xf32>
    %165 = vector.shape_cast %164 : vector<1x2x32xf32> to vector<2x32xf32>
    %166 = vector.shape_cast %160 : vector<2x32xf32> to vector<1x2x32xf32>
    tpu.vector_store %arg10[%c1_40, %c12, %c0_41], %166 {strides = array<i32>} : memref<2x16x32xf32, #tpu.memory_space<vmem>>, vector<1x2x32xf32>,
    %cst_42 = arith.constant dense<0.000000e+00> : vector<2x32xf32>
    %167 = tpu.matmul %134, %20, %cst_42 {dimension_numbers = #tpu.dot_dimension_numbers<[1], [0], [0], [1], [0, 0, 1, 1], [], []>} : vector<2x32xf32>, vector<32x32xf32>, vector<2x32xf32> -> vector<2x32xf32>
    %cst_43 = arith.constant dense<0.000000e+00> : vector<2x32xf32>
    %168 = tpu.matmul %134, %22, %cst_43 {dimension_numbers = #tpu.dot_dimension_numbers<[1], [0], [0], [1], [0, 0, 1, 1], [], []>} : vector<2x32xf32>, vector<32x32xf32>, vector<2x32xf32> -> vector<2x32xf32>
    %cst_44 = arith.constant dense<0.000000e+00> : vector<2x32xf32>
    %169 = tpu.matmul %134, %24, %cst_44 {dimension_numbers = #tpu.dot_dimension_numbers<[1], [0], [0], [1], [0, 0, 1, 1], [], []>} : vector<2x32xf32>, vector<32x32xf32>, vector<2x32xf32> -> vector<2x32xf32>
    %170 = vector.broadcast %25 : vector<1x32xf32> to vector<2x32xf32>
    %171 = arith.addf %169, %170 : vector<2x32xf32>
    %172 = vector.extract_strided_slice %10 {offsets = [4, 0], sizes = [2, 32], strides = [1, 1]} : vector<16x32xf32> to vector<2x32xf32>
    %173 = arith.addf %172, %167 : vector<2x32xf32>
    %174 = arith.negf %173 : vector<2x32xf32>
    %175 = math.exp %174 : vector<2x32xf32>
    %cst_45 = arith.constant 1.000000e+00 : f32
    %176 = vector.broadcast %cst_45 : f32 to vector<2x32xf32>
    %177 = arith.addf %176, %175 : vector<2x32xf32>
    %178 = arith.divf %176, %177 : vector<2x32xf32>
    %179 = vector.extract_strided_slice %14 {offsets = [4, 0], sizes = [2, 32], strides = [1, 1]} : vector<16x32xf32> to vector<2x32xf32>
    %180 = arith.addf %179, %168 : vector<2x32xf32>
    %181 = arith.negf %180 : vector<2x32xf32>
    %182 = math.exp %181 : vector<2x32xf32>
    %cst_46 = arith.constant 1.000000e+00 : f32
    %183 = vector.broadcast %cst_46 : f32 to vector<2x32xf32>
    %184 = arith.addf %183, %182 : vector<2x32xf32>
    %185 = arith.divf %183, %184 : vector<2x32xf32>
    %186 = vector.extract_strided_slice %18 {offsets = [4, 0], sizes = [2, 32], strides = [1, 1]} : vector<16x32xf32> to vector<2x32xf32>
    %187 = arith.mulf %178, %171 : vector<2x32xf32>
    %188 = arith.addf %186, %187 : vector<2x32xf32>
    %189 = math.tanh %188 : vector<2x32xf32>
    %190 = arith.subf %134, %189 : vector<2x32xf32>
    %191 = arith.mulf %185, %190 : vector<2x32xf32>
    %192 = arith.addf %189, %191 : vector<2x32xf32>
    %cst_47 = arith.constant dense<0.000000e+00> : vector<2x32xf32>
    %193 = tpu.matmul %160, %43, %cst_47 {dimension_numbers = #tpu.dot_dimension_numbers<[1], [0], [0], [1], [0, 0, 1, 1], [], []>} : vector<2x32xf32>, vector<32x32xf32>, vector<2x32xf32> -> vector<2x32xf32>
    %cst_48 = arith.constant dense<0.000000e+00> : vector<2x32xf32>
    %194 = tpu.matmul %160, %45, %cst_48 {dimension_numbers = #tpu.dot_dimension_numbers<[1], [0], [0], [1], [0, 0, 1, 1], [], []>} : vector<2x32xf32>, vector<32x32xf32>, vector<2x32xf32> -> vector<2x32xf32>
    %cst_49 = arith.constant dense<0.000000e+00> : vector<2x32xf32>
    %195 = tpu.matmul %160, %47, %cst_49 {dimension_numbers = #tpu.dot_dimension_numbers<[1], [0], [0], [1], [0, 0, 1, 1], [], []>} : vector<2x32xf32>, vector<32x32xf32>, vector<2x32xf32> -> vector<2x32xf32>
    %196 = vector.broadcast %48 : vector<1x32xf32> to vector<2x32xf32>
    %197 = arith.addf %195, %196 : vector<2x32xf32>
    %198 = vector.extract_strided_slice %33 {offsets = [10, 0], sizes = [2, 32], strides = [1, 1]} : vector<16x32xf32> to vector<2x32xf32>
    %199 = arith.addf %198, %193 : vector<2x32xf32>
    %200 = arith.negf %199 : vector<2x32xf32>
    %201 = math.exp %200 : vector<2x32xf32>
    %cst_50 = arith.constant 1.000000e+00 : f32
    %202 = vector.broadcast %cst_50 : f32 to vector<2x32xf32>
    %203 = arith.addf %202, %201 : vector<2x32xf32>
    %204 = arith.divf %202, %203 : vector<2x32xf32>
    %205 = vector.extract_strided_slice %37 {offsets = [10, 0], sizes = [2, 32], strides = [1, 1]} : vector<16x32xf32> to vector<2x32xf32>
    %206 = arith.addf %205, %194 : vector<2x32xf32>
    %207 = arith.negf %206 : vector<2x32xf32>
    %208 = math.exp %207 : vector<2x32xf32>
    %cst_51 = arith.constant 1.000000e+00 : f32
    %209 = vector.broadcast %cst_51 : f32 to vector<2x32xf32>
    %210 = arith.addf %209, %208 : vector<2x32xf32>
    %211 = arith.divf %209, %210 : vector<2x32xf32>
    %212 = vector.extract_strided_slice %41 {offsets = [10, 0], sizes = [2, 32], strides = [1, 1]} : vector<16x32xf32> to vector<2x32xf32>
    %213 = arith.mulf %204, %197 : vector<2x32xf32>
    %214 = arith.addf %212, %213 : vector<2x32xf32>
    %215 = math.tanh %214 : vector<2x32xf32>
    %216 = arith.subf %160, %215 : vector<2x32xf32>
    %217 = arith.mulf %211, %216 : vector<2x32xf32>
    %218 = arith.addf %215, %217 : vector<2x32xf32>
    %c0_52 = arith.constant 0 : index
    %c4 = arith.constant 4 : index
    %c0_53 = arith.constant 0 : index
    %219 = vector.load %arg10[%c0_52, %c4, %c0_53] : memref<2x16x32xf32, #tpu.memory_space<vmem>>, vector<1x2x32xf32>
    %220 = vector.shape_cast %219 : vector<1x2x32xf32> to vector<2x32xf32>
    %221 = vector.shape_cast %192 : vector<2x32xf32> to vector<1x2x32xf32>
    tpu.vector_store %arg10[%c0_52, %c4, %c0_53], %221 {strides = array<i32>} : memref<2x16x32xf32, #tpu.memory_space<vmem>>, vector<1x2x32xf32>,
    %c1_54 = arith.constant 1 : index
    %c10 = arith.constant 10 : index
    %c0_55 = arith.constant 0 : index
    %222 = vector.load %arg10[%c1_54, %c10, %c0_55] : memref<2x16x32xf32, #tpu.memory_space<vmem>>, vector<1x2x32xf32>
    %223 = vector.shape_cast %222 : vector<1x2x32xf32> to vector<2x32xf32>
    %224 = vector.shape_cast %218 : vector<2x32xf32> to vector<1x2x32xf32>
    tpu.vector_store %arg10[%c1_54, %c10, %c0_55], %224 {strides = array<i32>} : memref<2x16x32xf32, #tpu.memory_space<vmem>>, vector<1x2x32xf32>,
    %cst_56 = arith.constant dense<0.000000e+00> : vector<2x32xf32>
    %225 = tpu.matmul %192, %20, %cst_56 {dimension_numbers = #tpu.dot_dimension_numbers<[1], [0], [0], [1], [0, 0, 1, 1], [], []>} : vector<2x32xf32>, vector<32x32xf32>, vector<2x32xf32> -> vector<2x32xf32>
    %cst_57 = arith.constant dense<0.000000e+00> : vector<2x32xf32>
    %226 = tpu.matmul %192, %22, %cst_57 {dimension_numbers = #tpu.dot_dimension_numbers<[1], [0], [0], [1], [0, 0, 1, 1], [], []>} : vector<2x32xf32>, vector<32x32xf32>, vector<2x32xf32> -> vector<2x32xf32>
    %cst_58 = arith.constant dense<0.000000e+00> : vector<2x32xf32>
    %227 = tpu.matmul %192, %24, %cst_58 {dimension_numbers = #tpu.dot_dimension_numbers<[1], [0], [0], [1], [0, 0, 1, 1], [], []>} : vector<2x32xf32>, vector<32x32xf32>, vector<2x32xf32> -> vector<2x32xf32>
    %228 = vector.broadcast %25 : vector<1x32xf32> to vector<2x32xf32>
    %229 = arith.addf %227, %228 : vector<2x32xf32>
    %230 = vector.extract_strided_slice %10 {offsets = [6, 0], sizes = [2, 32], strides = [1, 1]} : vector<16x32xf32> to vector<2x32xf32>
    %231 = arith.addf %230, %225 : vector<2x32xf32>
    %232 = arith.negf %231 : vector<2x32xf32>
    %233 = math.exp %232 : vector<2x32xf32>
    %cst_59 = arith.constant 1.000000e+00 : f32
    %234 = vector.broadcast %cst_59 : f32 to vector<2x32xf32>
    %235 = arith.addf %234, %233 : vector<2x32xf32>
    %236 = arith.divf %234, %235 : vector<2x32xf32>
    %237 = vector.extract_strided_slice %14 {offsets = [6, 0], sizes = [2, 32], strides = [1, 1]} : vector<16x32xf32> to vector<2x32xf32>
    %238 = arith.addf %237, %226 : vector<2x32xf32>
    %239 = arith.negf %238 : vector<2x32xf32>
    %240 = math.exp %239 : vector<2x32xf32>
    %cst_60 = arith.constant 1.000000e+00 : f32
    %241 = vector.broadcast %cst_60 : f32 to vector<2x32xf32>
    %242 = arith.addf %241, %240 : vector<2x32xf32>
    %243 = arith.divf %241, %242 : vector<2x32xf32>
    %244 = vector.extract_strided_slice %18 {offsets = [6, 0], sizes = [2, 32], strides = [1, 1]} : vector<16x32xf32> to vector<2x32xf32>
    %245 = arith.mulf %236, %229 : vector<2x32xf32>
    %246 = arith.addf %244, %245 : vector<2x32xf32>
    %247 = math.tanh %246 : vector<2x32xf32>
    %248 = arith.subf %192, %247 : vector<2x32xf32>
    %249 = arith.mulf %243, %248 : vector<2x32xf32>
    %250 = arith.addf %247, %249 : vector<2x32xf32>
    %cst_61 = arith.constant dense<0.000000e+00> : vector<2x32xf32>
    %251 = tpu.matmul %218, %43, %cst_61 {dimension_numbers = #tpu.dot_dimension_numbers<[1], [0], [0], [1], [0, 0, 1, 1], [], []>} : vector<2x32xf32>, vector<32x32xf32>, vector<2x32xf32> -> vector<2x32xf32>
    %cst_62 = arith.constant dense<0.000000e+00> : vector<2x32xf32>
    %252 = tpu.matmul %218, %45, %cst_62 {dimension_numbers = #tpu.dot_dimension_numbers<[1], [0], [0], [1], [0, 0, 1, 1], [], []>} : vector<2x32xf32>, vector<32x32xf32>, vector<2x32xf32> -> vector<2x32xf32>
    %cst_63 = arith.constant dense<0.000000e+00> : vector<2x32xf32>
    %253 = tpu.matmul %218, %47, %cst_63 {dimension_numbers = #tpu.dot_dimension_numbers<[1], [0], [0], [1], [0, 0, 1, 1], [], []>} : vector<2x32xf32>, vector<32x32xf32>, vector<2x32xf32> -> vector<2x32xf32>
    %254 = vector.broadcast %48 : vector<1x32xf32> to vector<2x32xf32>
    %255 = arith.addf %253, %254 : vector<2x32xf32>
    %256 = vector.extract_strided_slice %33 {offsets = [8, 0], sizes = [2, 32], strides = [1, 1]} : vector<16x32xf32> to vector<2x32xf32>
    %257 = arith.addf %256, %251 : vector<2x32xf32>
    %258 = arith.negf %257 : vector<2x32xf32>
    %259 = math.exp %258 : vector<2x32xf32>
    %cst_64 = arith.constant 1.000000e+00 : f32
    %260 = vector.broadcast %cst_64 : f32 to vector<2x32xf32>
    %261 = arith.addf %260, %259 : vector<2x32xf32>
    %262 = arith.divf %260, %261 : vector<2x32xf32>
    %263 = vector.extract_strided_slice %37 {offsets = [8, 0], sizes = [2, 32], strides = [1, 1]} : vector<16x32xf32> to vector<2x32xf32>
    %264 = arith.addf %263, %252 : vector<2x32xf32>
    %265 = arith.negf %264 : vector<2x32xf32>
    %266 = math.exp %265 : vector<2x32xf32>
    %cst_65 = arith.constant 1.000000e+00 : f32
    %267 = vector.broadcast %cst_65 : f32 to vector<2x32xf32>
    %268 = arith.addf %267, %266 : vector<2x32xf32>
    %269 = arith.divf %267, %268 : vector<2x32xf32>
    %270 = vector.extract_strided_slice %41 {offsets = [8, 0], sizes = [2, 32], strides = [1, 1]} : vector<16x32xf32> to vector<2x32xf32>
    %271 = arith.mulf %262, %255 : vector<2x32xf32>
    %272 = arith.addf %270, %271 : vector<2x32xf32>
    %273 = math.tanh %272 : vector<2x32xf32>
    %274 = arith.subf %218, %273 : vector<2x32xf32>
    %275 = arith.mulf %269, %274 : vector<2x32xf32>
    %276 = arith.addf %273, %275 : vector<2x32xf32>
    %c0_66 = arith.constant 0 : index
    %c6 = arith.constant 6 : index
    %c0_67 = arith.constant 0 : index
    %277 = vector.load %arg10[%c0_66, %c6, %c0_67] : memref<2x16x32xf32, #tpu.memory_space<vmem>>, vector<1x2x32xf32>
    %278 = vector.shape_cast %277 : vector<1x2x32xf32> to vector<2x32xf32>
    %279 = vector.shape_cast %250 : vector<2x32xf32> to vector<1x2x32xf32>
    tpu.vector_store %arg10[%c0_66, %c6, %c0_67], %279 {strides = array<i32>} : memref<2x16x32xf32, #tpu.memory_space<vmem>>, vector<1x2x32xf32>,
    %c1_68 = arith.constant 1 : index
    %c8 = arith.constant 8 : index
    %c0_69 = arith.constant 0 : index
    %280 = vector.load %arg10[%c1_68, %c8, %c0_69] : memref<2x16x32xf32, #tpu.memory_space<vmem>>, vector<1x2x32xf32>
    %281 = vector.shape_cast %280 : vector<1x2x32xf32> to vector<2x32xf32>
    %282 = vector.shape_cast %276 : vector<2x32xf32> to vector<1x2x32xf32>
    tpu.vector_store %arg10[%c1_68, %c8, %c0_69], %282 {strides = array<i32>} : memref<2x16x32xf32, #tpu.memory_space<vmem>>, vector<1x2x32xf32>,
    %cst_70 = arith.constant dense<0.000000e+00> : vector<2x32xf32>
    %283 = tpu.matmul %250, %20, %cst_70 {dimension_numbers = #tpu.dot_dimension_numbers<[1], [0], [0], [1], [0, 0, 1, 1], [], []>} : vector<2x32xf32>, vector<32x32xf32>, vector<2x32xf32> -> vector<2x32xf32>
    %cst_71 = arith.constant dense<0.000000e+00> : vector<2x32xf32>
    %284 = tpu.matmul %250, %22, %cst_71 {dimension_numbers = #tpu.dot_dimension_numbers<[1], [0], [0], [1], [0, 0, 1, 1], [], []>} : vector<2x32xf32>, vector<32x32xf32>, vector<2x32xf32> -> vector<2x32xf32>
    %cst_72 = arith.constant dense<0.000000e+00> : vector<2x32xf32>
    %285 = tpu.matmul %250, %24, %cst_72 {dimension_numbers = #tpu.dot_dimension_numbers<[1], [0], [0], [1], [0, 0, 1, 1], [], []>} : vector<2x32xf32>, vector<32x32xf32>, vector<2x32xf32> -> vector<2x32xf32>
    %286 = vector.broadcast %25 : vector<1x32xf32> to vector<2x32xf32>
    %287 = arith.addf %285, %286 : vector<2x32xf32>
    %288 = vector.extract_strided_slice %10 {offsets = [8, 0], sizes = [2, 32], strides = [1, 1]} : vector<16x32xf32> to vector<2x32xf32>
    %289 = arith.addf %288, %283 : vector<2x32xf32>
    %290 = arith.negf %289 : vector<2x32xf32>
    %291 = math.exp %290 : vector<2x32xf32>
    %cst_73 = arith.constant 1.000000e+00 : f32
    %292 = vector.broadcast %cst_73 : f32 to vector<2x32xf32>
    %293 = arith.addf %292, %291 : vector<2x32xf32>
    %294 = arith.divf %292, %293 : vector<2x32xf32>
    %295 = vector.extract_strided_slice %14 {offsets = [8, 0], sizes = [2, 32], strides = [1, 1]} : vector<16x32xf32> to vector<2x32xf32>
    %296 = arith.addf %295, %284 : vector<2x32xf32>
    %297 = arith.negf %296 : vector<2x32xf32>
    %298 = math.exp %297 : vector<2x32xf32>
    %cst_74 = arith.constant 1.000000e+00 : f32
    %299 = vector.broadcast %cst_74 : f32 to vector<2x32xf32>
    %300 = arith.addf %299, %298 : vector<2x32xf32>
    %301 = arith.divf %299, %300 : vector<2x32xf32>
    %302 = vector.extract_strided_slice %18 {offsets = [8, 0], sizes = [2, 32], strides = [1, 1]} : vector<16x32xf32> to vector<2x32xf32>
    %303 = arith.mulf %294, %287 : vector<2x32xf32>
    %304 = arith.addf %302, %303 : vector<2x32xf32>
    %305 = math.tanh %304 : vector<2x32xf32>
    %306 = arith.subf %250, %305 : vector<2x32xf32>
    %307 = arith.mulf %301, %306 : vector<2x32xf32>
    %308 = arith.addf %305, %307 : vector<2x32xf32>
    %cst_75 = arith.constant dense<0.000000e+00> : vector<2x32xf32>
    %309 = tpu.matmul %276, %43, %cst_75 {dimension_numbers = #tpu.dot_dimension_numbers<[1], [0], [0], [1], [0, 0, 1, 1], [], []>} : vector<2x32xf32>, vector<32x32xf32>, vector<2x32xf32> -> vector<2x32xf32>
    %cst_76 = arith.constant dense<0.000000e+00> : vector<2x32xf32>
    %310 = tpu.matmul %276, %45, %cst_76 {dimension_numbers = #tpu.dot_dimension_numbers<[1], [0], [0], [1], [0, 0, 1, 1], [], []>} : vector<2x32xf32>, vector<32x32xf32>, vector<2x32xf32> -> vector<2x32xf32>
    %cst_77 = arith.constant dense<0.000000e+00> : vector<2x32xf32>
    %311 = tpu.matmul %276, %47, %cst_77 {dimension_numbers = #tpu.dot_dimension_numbers<[1], [0], [0], [1], [0, 0, 1, 1], [], []>} : vector<2x32xf32>, vector<32x32xf32>, vector<2x32xf32> -> vector<2x32xf32>
    %312 = vector.broadcast %48 : vector<1x32xf32> to vector<2x32xf32>
    %313 = arith.addf %311, %312 : vector<2x32xf32>
    %314 = vector.extract_strided_slice %33 {offsets = [6, 0], sizes = [2, 32], strides = [1, 1]} : vector<16x32xf32> to vector<2x32xf32>
    %315 = arith.addf %314, %309 : vector<2x32xf32>
    %316 = arith.negf %315 : vector<2x32xf32>
    %317 = math.exp %316 : vector<2x32xf32>
    %cst_78 = arith.constant 1.000000e+00 : f32
    %318 = vector.broadcast %cst_78 : f32 to vector<2x32xf32>
    %319 = arith.addf %318, %317 : vector<2x32xf32>
    %320 = arith.divf %318, %319 : vector<2x32xf32>
    %321 = vector.extract_strided_slice %37 {offsets = [6, 0], sizes = [2, 32], strides = [1, 1]} : vector<16x32xf32> to vector<2x32xf32>
    %322 = arith.addf %321, %310 : vector<2x32xf32>
    %323 = arith.negf %322 : vector<2x32xf32>
    %324 = math.exp %323 : vector<2x32xf32>
    %cst_79 = arith.constant 1.000000e+00 : f32
    %325 = vector.broadcast %cst_79 : f32 to vector<2x32xf32>
    %326 = arith.addf %325, %324 : vector<2x32xf32>
    %327 = arith.divf %325, %326 : vector<2x32xf32>
    %328 = vector.extract_strided_slice %41 {offsets = [6, 0], sizes = [2, 32], strides = [1, 1]} : vector<16x32xf32> to vector<2x32xf32>
    %329 = arith.mulf %320, %313 : vector<2x32xf32>
    %330 = arith.addf %328, %329 : vector<2x32xf32>
    %331 = math.tanh %330 : vector<2x32xf32>
    %332 = arith.subf %276, %331 : vector<2x32xf32>
    %333 = arith.mulf %327, %332 : vector<2x32xf32>
    %334 = arith.addf %331, %333 : vector<2x32xf32>
    %c0_80 = arith.constant 0 : index
    %c8_81 = arith.constant 8 : index
    %c0_82 = arith.constant 0 : index
    %335 = vector.load %arg10[%c0_80, %c8_81, %c0_82] : memref<2x16x32xf32, #tpu.memory_space<vmem>>, vector<1x2x32xf32>
    %336 = vector.shape_cast %335 : vector<1x2x32xf32> to vector<2x32xf32>
    %337 = vector.shape_cast %308 : vector<2x32xf32> to vector<1x2x32xf32>
    tpu.vector_store %arg10[%c0_80, %c8_81, %c0_82], %337 {strides = array<i32>} : memref<2x16x32xf32, #tpu.memory_space<vmem>>, vector<1x2x32xf32>,
    %c1_83 = arith.constant 1 : index
    %c6_84 = arith.constant 6 : index
    %c0_85 = arith.constant 0 : index
    %338 = vector.load %arg10[%c1_83, %c6_84, %c0_85] : memref<2x16x32xf32, #tpu.memory_space<vmem>>, vector<1x2x32xf32>
    %339 = vector.shape_cast %338 : vector<1x2x32xf32> to vector<2x32xf32>
    %340 = vector.shape_cast %334 : vector<2x32xf32> to vector<1x2x32xf32>
    tpu.vector_store %arg10[%c1_83, %c6_84, %c0_85], %340 {strides = array<i32>} : memref<2x16x32xf32, #tpu.memory_space<vmem>>, vector<1x2x32xf32>,
    %cst_86 = arith.constant dense<0.000000e+00> : vector<2x32xf32>
    %341 = tpu.matmul %308, %20, %cst_86 {dimension_numbers = #tpu.dot_dimension_numbers<[1], [0], [0], [1], [0, 0, 1, 1], [], []>} : vector<2x32xf32>, vector<32x32xf32>, vector<2x32xf32> -> vector<2x32xf32>
    %cst_87 = arith.constant dense<0.000000e+00> : vector<2x32xf32>
    %342 = tpu.matmul %308, %22, %cst_87 {dimension_numbers = #tpu.dot_dimension_numbers<[1], [0], [0], [1], [0, 0, 1, 1], [], []>} : vector<2x32xf32>, vector<32x32xf32>, vector<2x32xf32> -> vector<2x32xf32>
    %cst_88 = arith.constant dense<0.000000e+00> : vector<2x32xf32>
    %343 = tpu.matmul %308, %24, %cst_88 {dimension_numbers = #tpu.dot_dimension_numbers<[1], [0], [0], [1], [0, 0, 1, 1], [], []>} : vector<2x32xf32>, vector<32x32xf32>, vector<2x32xf32> -> vector<2x32xf32>
    %344 = vector.broadcast %25 : vector<1x32xf32> to vector<2x32xf32>
    %345 = arith.addf %343, %344 : vector<2x32xf32>
    %346 = vector.extract_strided_slice %10 {offsets = [10, 0], sizes = [2, 32], strides = [1, 1]} : vector<16x32xf32> to vector<2x32xf32>
    %347 = arith.addf %346, %341 : vector<2x32xf32>
    %348 = arith.negf %347 : vector<2x32xf32>
    %349 = math.exp %348 : vector<2x32xf32>
    %cst_89 = arith.constant 1.000000e+00 : f32
    %350 = vector.broadcast %cst_89 : f32 to vector<2x32xf32>
    %351 = arith.addf %350, %349 : vector<2x32xf32>
    %352 = arith.divf %350, %351 : vector<2x32xf32>
    %353 = vector.extract_strided_slice %14 {offsets = [10, 0], sizes = [2, 32], strides = [1, 1]} : vector<16x32xf32> to vector<2x32xf32>
    %354 = arith.addf %353, %342 : vector<2x32xf32>
    %355 = arith.negf %354 : vector<2x32xf32>
    %356 = math.exp %355 : vector<2x32xf32>
    %cst_90 = arith.constant 1.000000e+00 : f32
    %357 = vector.broadcast %cst_90 : f32 to vector<2x32xf32>
    %358 = arith.addf %357, %356 : vector<2x32xf32>
    %359 = arith.divf %357, %358 : vector<2x32xf32>
    %360 = vector.extract_strided_slice %18 {offsets = [10, 0], sizes = [2, 32], strides = [1, 1]} : vector<16x32xf32> to vector<2x32xf32>
    %361 = arith.mulf %352, %345 : vector<2x32xf32>
    %362 = arith.addf %360, %361 : vector<2x32xf32>
    %363 = math.tanh %362 : vector<2x32xf32>
    %364 = arith.subf %308, %363 : vector<2x32xf32>
    %365 = arith.mulf %359, %364 : vector<2x32xf32>
    %366 = arith.addf %363, %365 : vector<2x32xf32>
    %cst_91 = arith.constant dense<0.000000e+00> : vector<2x32xf32>
    %367 = tpu.matmul %334, %43, %cst_91 {dimension_numbers = #tpu.dot_dimension_numbers<[1], [0], [0], [1], [0, 0, 1, 1], [], []>} : vector<2x32xf32>, vector<32x32xf32>, vector<2x32xf32> -> vector<2x32xf32>
    %cst_92 = arith.constant dense<0.000000e+00> : vector<2x32xf32>
    %368 = tpu.matmul %334, %45, %cst_92 {dimension_numbers = #tpu.dot_dimension_numbers<[1], [0], [0], [1], [0, 0, 1, 1], [], []>} : vector<2x32xf32>, vector<32x32xf32>, vector<2x32xf32> -> vector<2x32xf32>
    %cst_93 = arith.constant dense<0.000000e+00> : vector<2x32xf32>
    %369 = tpu.matmul %334, %47, %cst_93 {dimension_numbers = #tpu.dot_dimension_numbers<[1], [0], [0], [1], [0, 0, 1, 1], [], []>} : vector<2x32xf32>, vector<32x32xf32>, vector<2x32xf32> -> vector<2x32xf32>
    %370 = vector.broadcast %48 : vector<1x32xf32> to vector<2x32xf32>
    %371 = arith.addf %369, %370 : vector<2x32xf32>
    %372 = vector.extract_strided_slice %33 {offsets = [4, 0], sizes = [2, 32], strides = [1, 1]} : vector<16x32xf32> to vector<2x32xf32>
    %373 = arith.addf %372, %367 : vector<2x32xf32>
    %374 = arith.negf %373 : vector<2x32xf32>
    %375 = math.exp %374 : vector<2x32xf32>
    %cst_94 = arith.constant 1.000000e+00 : f32
    %376 = vector.broadcast %cst_94 : f32 to vector<2x32xf32>
    %377 = arith.addf %376, %375 : vector<2x32xf32>
    %378 = arith.divf %376, %377 : vector<2x32xf32>
    %379 = vector.extract_strided_slice %37 {offsets = [4, 0], sizes = [2, 32], strides = [1, 1]} : vector<16x32xf32> to vector<2x32xf32>
    %380 = arith.addf %379, %368 : vector<2x32xf32>
    %381 = arith.negf %380 : vector<2x32xf32>
    %382 = math.exp %381 : vector<2x32xf32>
    %cst_95 = arith.constant 1.000000e+00 : f32
    %383 = vector.broadcast %cst_95 : f32 to vector<2x32xf32>
    %384 = arith.addf %383, %382 : vector<2x32xf32>
    %385 = arith.divf %383, %384 : vector<2x32xf32>
    %386 = vector.extract_strided_slice %41 {offsets = [4, 0], sizes = [2, 32], strides = [1, 1]} : vector<16x32xf32> to vector<2x32xf32>
    %387 = arith.mulf %378, %371 : vector<2x32xf32>
    %388 = arith.addf %386, %387 : vector<2x32xf32>
    %389 = math.tanh %388 : vector<2x32xf32>
    %390 = arith.subf %334, %389 : vector<2x32xf32>
    %391 = arith.mulf %385, %390 : vector<2x32xf32>
    %392 = arith.addf %389, %391 : vector<2x32xf32>
    %c0_96 = arith.constant 0 : index
    %c10_97 = arith.constant 10 : index
    %c0_98 = arith.constant 0 : index
    %393 = vector.load %arg10[%c0_96, %c10_97, %c0_98] : memref<2x16x32xf32, #tpu.memory_space<vmem>>, vector<1x2x32xf32>
    %394 = vector.shape_cast %393 : vector<1x2x32xf32> to vector<2x32xf32>
    %395 = vector.shape_cast %366 : vector<2x32xf32> to vector<1x2x32xf32>
    tpu.vector_store %arg10[%c0_96, %c10_97, %c0_98], %395 {strides = array<i32>} : memref<2x16x32xf32, #tpu.memory_space<vmem>>, vector<1x2x32xf32>,
    %c1_99 = arith.constant 1 : index
    %c4_100 = arith.constant 4 : index
    %c0_101 = arith.constant 0 : index
    %396 = vector.load %arg10[%c1_99, %c4_100, %c0_101] : memref<2x16x32xf32, #tpu.memory_space<vmem>>, vector<1x2x32xf32>
    %397 = vector.shape_cast %396 : vector<1x2x32xf32> to vector<2x32xf32>
    %398 = vector.shape_cast %392 : vector<2x32xf32> to vector<1x2x32xf32>
    tpu.vector_store %arg10[%c1_99, %c4_100, %c0_101], %398 {strides = array<i32>} : memref<2x16x32xf32, #tpu.memory_space<vmem>>, vector<1x2x32xf32>,
    %cst_102 = arith.constant dense<0.000000e+00> : vector<2x32xf32>
    %399 = tpu.matmul %366, %20, %cst_102 {dimension_numbers = #tpu.dot_dimension_numbers<[1], [0], [0], [1], [0, 0, 1, 1], [], []>} : vector<2x32xf32>, vector<32x32xf32>, vector<2x32xf32> -> vector<2x32xf32>
    %cst_103 = arith.constant dense<0.000000e+00> : vector<2x32xf32>
    %400 = tpu.matmul %366, %22, %cst_103 {dimension_numbers = #tpu.dot_dimension_numbers<[1], [0], [0], [1], [0, 0, 1, 1], [], []>} : vector<2x32xf32>, vector<32x32xf32>, vector<2x32xf32> -> vector<2x32xf32>
    %cst_104 = arith.constant dense<0.000000e+00> : vector<2x32xf32>
    %401 = tpu.matmul %366, %24, %cst_104 {dimension_numbers = #tpu.dot_dimension_numbers<[1], [0], [0], [1], [0, 0, 1, 1], [], []>} : vector<2x32xf32>, vector<32x32xf32>, vector<2x32xf32> -> vector<2x32xf32>
    %402 = vector.broadcast %25 : vector<1x32xf32> to vector<2x32xf32>
    %403 = arith.addf %401, %402 : vector<2x32xf32>
    %404 = vector.extract_strided_slice %10 {offsets = [12, 0], sizes = [2, 32], strides = [1, 1]} : vector<16x32xf32> to vector<2x32xf32>
    %405 = arith.addf %404, %399 : vector<2x32xf32>
    %406 = arith.negf %405 : vector<2x32xf32>
    %407 = math.exp %406 : vector<2x32xf32>
    %cst_105 = arith.constant 1.000000e+00 : f32
    %408 = vector.broadcast %cst_105 : f32 to vector<2x32xf32>
    %409 = arith.addf %408, %407 : vector<2x32xf32>
    %410 = arith.divf %408, %409 : vector<2x32xf32>
    %411 = vector.extract_strided_slice %14 {offsets = [12, 0], sizes = [2, 32], strides = [1, 1]} : vector<16x32xf32> to vector<2x32xf32>
    %412 = arith.addf %411, %400 : vector<2x32xf32>
    %413 = arith.negf %412 : vector<2x32xf32>
    %414 = math.exp %413 : vector<2x32xf32>
    %cst_106 = arith.constant 1.000000e+00 : f32
    %415 = vector.broadcast %cst_106 : f32 to vector<2x32xf32>
    %416 = arith.addf %415, %414 : vector<2x32xf32>
    %417 = arith.divf %415, %416 : vector<2x32xf32>
    %418 = vector.extract_strided_slice %18 {offsets = [12, 0], sizes = [2, 32], strides = [1, 1]} : vector<16x32xf32> to vector<2x32xf32>
    %419 = arith.mulf %410, %403 : vector<2x32xf32>
    %420 = arith.addf %418, %419 : vector<2x32xf32>
    %421 = math.tanh %420 : vector<2x32xf32>
    %422 = arith.subf %366, %421 : vector<2x32xf32>
    %423 = arith.mulf %417, %422 : vector<2x32xf32>
    %424 = arith.addf %421, %423 : vector<2x32xf32>
    %cst_107 = arith.constant dense<0.000000e+00> : vector<2x32xf32>
    %425 = tpu.matmul %392, %43, %cst_107 {dimension_numbers = #tpu.dot_dimension_numbers<[1], [0], [0], [1], [0, 0, 1, 1], [], []>} : vector<2x32xf32>, vector<32x32xf32>, vector<2x32xf32> -> vector<2x32xf32>
    %cst_108 = arith.constant dense<0.000000e+00> : vector<2x32xf32>
    %426 = tpu.matmul %392, %45, %cst_108 {dimension_numbers = #tpu.dot_dimension_numbers<[1], [0], [0], [1], [0, 0, 1, 1], [], []>} : vector<2x32xf32>, vector<32x32xf32>, vector<2x32xf32> -> vector<2x32xf32>
    %cst_109 = arith.constant dense<0.000000e+00> : vector<2x32xf32>
    %427 = tpu.matmul %392, %47, %cst_109 {dimension_numbers = #tpu.dot_dimension_numbers<[1], [0], [0], [1], [0, 0, 1, 1], [], []>} : vector<2x32xf32>, vector<32x32xf32>, vector<2x32xf32> -> vector<2x32xf32>
    %428 = vector.broadcast %48 : vector<1x32xf32> to vector<2x32xf32>
    %429 = arith.addf %427, %428 : vector<2x32xf32>
    %430 = vector.extract_strided_slice %33 {offsets = [2, 0], sizes = [2, 32], strides = [1, 1]} : vector<16x32xf32> to vector<2x32xf32>
    %431 = arith.addf %430, %425 : vector<2x32xf32>
    %432 = arith.negf %431 : vector<2x32xf32>
    %433 = math.exp %432 : vector<2x32xf32>
    %cst_110 = arith.constant 1.000000e+00 : f32
    %434 = vector.broadcast %cst_110 : f32 to vector<2x32xf32>
    %435 = arith.addf %434, %433 : vector<2x32xf32>
    %436 = arith.divf %434, %435 : vector<2x32xf32>
    %437 = vector.extract_strided_slice %37 {offsets = [2, 0], sizes = [2, 32], strides = [1, 1]} : vector<16x32xf32> to vector<2x32xf32>
    %438 = arith.addf %437, %426 : vector<2x32xf32>
    %439 = arith.negf %438 : vector<2x32xf32>
    %440 = math.exp %439 : vector<2x32xf32>
    %cst_111 = arith.constant 1.000000e+00 : f32
    %441 = vector.broadcast %cst_111 : f32 to vector<2x32xf32>
    %442 = arith.addf %441, %440 : vector<2x32xf32>
    %443 = arith.divf %441, %442 : vector<2x32xf32>
    %444 = vector.extract_strided_slice %41 {offsets = [2, 0], sizes = [2, 32], strides = [1, 1]} : vector<16x32xf32> to vector<2x32xf32>
    %445 = arith.mulf %436, %429 : vector<2x32xf32>
    %446 = arith.addf %444, %445 : vector<2x32xf32>
    %447 = math.tanh %446 : vector<2x32xf32>
    %448 = arith.subf %392, %447 : vector<2x32xf32>
    %449 = arith.mulf %443, %448 : vector<2x32xf32>
    %450 = arith.addf %447, %449 : vector<2x32xf32>
    %c0_112 = arith.constant 0 : index
    %c12_113 = arith.constant 12 : index
    %c0_114 = arith.constant 0 : index
    %451 = vector.load %arg10[%c0_112, %c12_113, %c0_114] : memref<2x16x32xf32, #tpu.memory_space<vmem>>, vector<1x2x32xf32>
    %452 = vector.shape_cast %451 : vector<1x2x32xf32> to vector<2x32xf32>
    %453 = vector.shape_cast %424 : vector<2x32xf32> to vector<1x2x32xf32>
    tpu.vector_store %arg10[%c0_112, %c12_113, %c0_114], %453 {strides = array<i32>} : memref<2x16x32xf32, #tpu.memory_space<vmem>>, vector<1x2x32xf32>,
    %c1_115 = arith.constant 1 : index
    %c2_116 = arith.constant 2 : index
    %c0_117 = arith.constant 0 : index
    %454 = vector.load %arg10[%c1_115, %c2_116, %c0_117] : memref<2x16x32xf32, #tpu.memory_space<vmem>>, vector<1x2x32xf32>
    %455 = vector.shape_cast %454 : vector<1x2x32xf32> to vector<2x32xf32>
    %456 = vector.shape_cast %450 : vector<2x32xf32> to vector<1x2x32xf32>
    tpu.vector_store %arg10[%c1_115, %c2_116, %c0_117], %456 {strides = array<i32>} : memref<2x16x32xf32, #tpu.memory_space<vmem>>, vector<1x2x32xf32>,
    %cst_118 = arith.constant dense<0.000000e+00> : vector<2x32xf32>
    %457 = tpu.matmul %424, %20, %cst_118 {dimension_numbers = #tpu.dot_dimension_numbers<[1], [0], [0], [1], [0, 0, 1, 1], [], []>} : vector<2x32xf32>, vector<32x32xf32>, vector<2x32xf32> -> vector<2x32xf32>
    %cst_119 = arith.constant dense<0.000000e+00> : vector<2x32xf32>
    %458 = tpu.matmul %424, %22, %cst_119 {dimension_numbers = #tpu.dot_dimension_numbers<[1], [0], [0], [1], [0, 0, 1, 1], [], []>} : vector<2x32xf32>, vector<32x32xf32>, vector<2x32xf32> -> vector<2x32xf32>
    %cst_120 = arith.constant dense<0.000000e+00> : vector<2x32xf32>
    %459 = tpu.matmul %424, %24, %cst_120 {dimension_numbers = #tpu.dot_dimension_numbers<[1], [0], [0], [1], [0, 0, 1, 1], [], []>} : vector<2x32xf32>, vector<32x32xf32>, vector<2x32xf32> -> vector<2x32xf32>
    %460 = vector.broadcast %25 : vector<1x32xf32> to vector<2x32xf32>
    %461 = arith.addf %459, %460 : vector<2x32xf32>
    %462 = vector.extract_strided_slice %10 {offsets = [14, 0], sizes = [2, 32], strides = [1, 1]} : vector<16x32xf32> to vector<2x32xf32>
    %463 = arith.addf %462, %457 : vector<2x32xf32>
    %464 = arith.negf %463 : vector<2x32xf32>
    %465 = math.exp %464 : vector<2x32xf32>
    %cst_121 = arith.constant 1.000000e+00 : f32
    %466 = vector.broadcast %cst_121 : f32 to vector<2x32xf32>
    %467 = arith.addf %466, %465 : vector<2x32xf32>
    %468 = arith.divf %466, %467 : vector<2x32xf32>
    %469 = vector.extract_strided_slice %14 {offsets = [14, 0], sizes = [2, 32], strides = [1, 1]} : vector<16x32xf32> to vector<2x32xf32>
    %470 = arith.addf %469, %458 : vector<2x32xf32>
    %471 = arith.negf %470 : vector<2x32xf32>
    %472 = math.exp %471 : vector<2x32xf32>
    %cst_122 = arith.constant 1.000000e+00 : f32
    %473 = vector.broadcast %cst_122 : f32 to vector<2x32xf32>
    %474 = arith.addf %473, %472 : vector<2x32xf32>
    %475 = arith.divf %473, %474 : vector<2x32xf32>
    %476 = vector.extract_strided_slice %18 {offsets = [14, 0], sizes = [2, 32], strides = [1, 1]} : vector<16x32xf32> to vector<2x32xf32>
    %477 = arith.mulf %468, %461 : vector<2x32xf32>
    %478 = arith.addf %476, %477 : vector<2x32xf32>
    %479 = math.tanh %478 : vector<2x32xf32>
    %480 = arith.subf %424, %479 : vector<2x32xf32>
    %481 = arith.mulf %475, %480 : vector<2x32xf32>
    %482 = arith.addf %479, %481 : vector<2x32xf32>
    %cst_123 = arith.constant dense<0.000000e+00> : vector<2x32xf32>
    %483 = tpu.matmul %450, %43, %cst_123 {dimension_numbers = #tpu.dot_dimension_numbers<[1], [0], [0], [1], [0, 0, 1, 1], [], []>} : vector<2x32xf32>, vector<32x32xf32>, vector<2x32xf32> -> vector<2x32xf32>
    %cst_124 = arith.constant dense<0.000000e+00> : vector<2x32xf32>
    %484 = tpu.matmul %450, %45, %cst_124 {dimension_numbers = #tpu.dot_dimension_numbers<[1], [0], [0], [1], [0, 0, 1, 1], [], []>} : vector<2x32xf32>, vector<32x32xf32>, vector<2x32xf32> -> vector<2x32xf32>
    %cst_125 = arith.constant dense<0.000000e+00> : vector<2x32xf32>
    %485 = tpu.matmul %450, %47, %cst_125 {dimension_numbers = #tpu.dot_dimension_numbers<[1], [0], [0], [1], [0, 0, 1, 1], [], []>} : vector<2x32xf32>, vector<32x32xf32>, vector<2x32xf32> -> vector<2x32xf32>
    %486 = vector.broadcast %48 : vector<1x32xf32> to vector<2x32xf32>
    %487 = arith.addf %485, %486 : vector<2x32xf32>
    %488 = vector.extract_strided_slice %33 {offsets = [0, 0], sizes = [2, 32], strides = [1, 1]} : vector<16x32xf32> to vector<2x32xf32>
    %489 = arith.addf %488, %483 : vector<2x32xf32>
    %490 = arith.negf %489 : vector<2x32xf32>
    %491 = math.exp %490 : vector<2x32xf32>
    %cst_126 = arith.constant 1.000000e+00 : f32
    %492 = vector.broadcast %cst_126 : f32 to vector<2x32xf32>
    %493 = arith.addf %492, %491 : vector<2x32xf32>
    %494 = arith.divf %492, %493 : vector<2x32xf32>
    %495 = vector.extract_strided_slice %37 {offsets = [0, 0], sizes = [2, 32], strides = [1, 1]} : vector<16x32xf32> to vector<2x32xf32>
    %496 = arith.addf %495, %484 : vector<2x32xf32>
    %497 = arith.negf %496 : vector<2x32xf32>
    %498 = math.exp %497 : vector<2x32xf32>
    %cst_127 = arith.constant 1.000000e+00 : f32
    %499 = vector.broadcast %cst_127 : f32 to vector<2x32xf32>
    %500 = arith.addf %499, %498 : vector<2x32xf32>
    %501 = arith.divf %499, %500 : vector<2x32xf32>
    %502 = vector.extract_strided_slice %41 {offsets = [0, 0], sizes = [2, 32], strides = [1, 1]} : vector<16x32xf32> to vector<2x32xf32>
    %503 = arith.mulf %494, %487 : vector<2x32xf32>
    %504 = arith.addf %502, %503 : vector<2x32xf32>
    %505 = math.tanh %504 : vector<2x32xf32>
    %506 = arith.subf %450, %505 : vector<2x32xf32>
    %507 = arith.mulf %501, %506 : vector<2x32xf32>
    %508 = arith.addf %505, %507 : vector<2x32xf32>
    %c0_128 = arith.constant 0 : index
    %c14_129 = arith.constant 14 : index
    %c0_130 = arith.constant 0 : index
    %509 = vector.load %arg10[%c0_128, %c14_129, %c0_130] : memref<2x16x32xf32, #tpu.memory_space<vmem>>, vector<1x2x32xf32>
    %510 = vector.shape_cast %509 : vector<1x2x32xf32> to vector<2x32xf32>
    %511 = vector.shape_cast %482 : vector<2x32xf32> to vector<1x2x32xf32>
    tpu.vector_store %arg10[%c0_128, %c14_129, %c0_130], %511 {strides = array<i32>} : memref<2x16x32xf32, #tpu.memory_space<vmem>>, vector<1x2x32xf32>,
    %c1_131 = arith.constant 1 : index
    %c0_132 = arith.constant 0 : index
    %c0_133 = arith.constant 0 : index
    %512 = vector.load %arg10[%c1_131, %c0_132, %c0_133] : memref<2x16x32xf32, #tpu.memory_space<vmem>>, vector<1x2x32xf32>
    %513 = vector.shape_cast %512 : vector<1x2x32xf32> to vector<2x32xf32>
    %514 = vector.shape_cast %508 : vector<2x32xf32> to vector<1x2x32xf32>
    tpu.vector_store %arg10[%c1_131, %c0_132, %c0_133], %514 {strides = array<i32>} : memref<2x16x32xf32, #tpu.memory_space<vmem>>, vector<1x2x32xf32>,
    %c0_134 = arith.constant 0 : index
    %c0_135 = arith.constant 0 : index
    %c0_136 = arith.constant 0 : index
    %515 = vector.load %arg4[%c0_134, %c0_135, %c0_136] : memref<2x64x96xf32, #tpu.memory_space<vmem>>, vector<2x64x96xf32>
    %c0_137 = arith.constant 0 : index
    %c0_138 = arith.constant 0 : index
    %c0_139 = arith.constant 0 : index
    %516 = vector.load %arg5[%c0_137, %c0_138, %c0_139] : memref<6x32x32xf32, #tpu.memory_space<vmem>>, vector<6x32x32xf32>
    %c0_140 = arith.constant 0 : index
    %c0_141 = arith.constant 0 : index
    %517 = vector.load %arg6[%c0_140, %c0_141] : memref<8x32xf32, #tpu.memory_space<vmem>>, vector<8x32xf32>
    %518 = vector.extract_strided_slice %515 {offsets = [0, 0, 0], sizes = [1, 64, 96], strides = [1, 1, 1]} : vector<2x64x96xf32> to vector<1x64x96xf32>
    %519 = vector.shape_cast %518 : vector<1x64x96xf32> to vector<64x96xf32>
    %c0_142 = arith.constant 0 : index
    %c0_143 = arith.constant 0 : index
    %c0_144 = arith.constant 0 : index
    %520 = vector.load %arg10[%c0_142, %c0_143, %c0_144] : memref<2x16x32xf32, #tpu.memory_space<vmem>>, vector<1x16x32xf32>
    %521 = vector.shape_cast %520 : vector<1x16x32xf32> to vector<16x32xf32>
    %522 = vector.extract_strided_slice %519 {offsets = [0, 0], sizes = [32, 96], strides = [1, 1]} : vector<64x96xf32> to vector<32x96xf32>
    %cst_145 = arith.constant dense<0.000000e+00> : vector<16x96xf32>
    %523 = tpu.matmul %521, %522, %cst_145 {dimension_numbers = #tpu.dot_dimension_numbers<[1], [0], [0], [1], [0, 0, 1, 1], [], []>} : vector<16x32xf32>, vector<32x96xf32>, vector<16x96xf32> -> vector<16x96xf32>
    %c1_146 = arith.constant 1 : index
    %c0_147 = arith.constant 0 : index
    %c0_148 = arith.constant 0 : index
    %524 = vector.load %arg10[%c1_146, %c0_147, %c0_148] : memref<2x16x32xf32, #tpu.memory_space<vmem>>, vector<1x16x32xf32>
    %525 = vector.shape_cast %524 : vector<1x16x32xf32> to vector<16x32xf32>
    %526 = vector.extract_strided_slice %519 {offsets = [32, 0], sizes = [32, 96], strides = [1, 1]} : vector<64x96xf32> to vector<32x96xf32>
    %cst_149 = arith.constant dense<0.000000e+00> : vector<16x96xf32>
    %527 = tpu.matmul %525, %526, %cst_149 {dimension_numbers = #tpu.dot_dimension_numbers<[1], [0], [0], [1], [0, 0, 1, 1], [], []>} : vector<16x32xf32>, vector<32x96xf32>, vector<16x96xf32> -> vector<16x96xf32>
    %528 = arith.addf %523, %527 : vector<16x96xf32>
    %529 = vector.extract_strided_slice %528 {offsets = [0, 0], sizes = [16, 32], strides = [1, 1]} : vector<16x96xf32> to vector<16x32xf32>
    %530 = vector.extract_strided_slice %517 {offsets = [0, 0], sizes = [1, 32], strides = [1, 1]} : vector<8x32xf32> to vector<1x32xf32>
    %531 = vector.broadcast %530 : vector<1x32xf32> to vector<16x32xf32>
    %532 = arith.addf %529, %531 : vector<16x32xf32>
    %533 = vector.extract_strided_slice %528 {offsets = [0, 32], sizes = [16, 32], strides = [1, 1]} : vector<16x96xf32> to vector<16x32xf32>
    %534 = vector.extract_strided_slice %517 {offsets = [1, 0], sizes = [1, 32], strides = [1, 1]} : vector<8x32xf32> to vector<1x32xf32>
    %535 = vector.broadcast %534 : vector<1x32xf32> to vector<16x32xf32>
    %536 = arith.addf %533, %535 : vector<16x32xf32>
    %537 = vector.extract_strided_slice %528 {offsets = [0, 64], sizes = [16, 32], strides = [1, 1]} : vector<16x96xf32> to vector<16x32xf32>
    %538 = vector.extract_strided_slice %517 {offsets = [2, 0], sizes = [1, 32], strides = [1, 1]} : vector<8x32xf32> to vector<1x32xf32>
    %539 = vector.broadcast %538 : vector<1x32xf32> to vector<16x32xf32>
    %540 = arith.addf %537, %539 : vector<16x32xf32>
    %541 = vector.extract_strided_slice %516 {offsets = [0, 0, 0], sizes = [1, 32, 32], strides = [1, 1, 1]} : vector<6x32x32xf32> to vector<1x32x32xf32>
    %542 = vector.shape_cast %541 : vector<1x32x32xf32> to vector<32x32xf32>
    %543 = vector.extract_strided_slice %516 {offsets = [1, 0, 0], sizes = [1, 32, 32], strides = [1, 1, 1]} : vector<6x32x32xf32> to vector<1x32x32xf32>
    %544 = vector.shape_cast %543 : vector<1x32x32xf32> to vector<32x32xf32>
    %545 = vector.extract_strided_slice %516 {offsets = [2, 0, 0], sizes = [1, 32, 32], strides = [1, 1, 1]} : vector<6x32x32xf32> to vector<1x32x32xf32>
    %546 = vector.shape_cast %545 : vector<1x32x32xf32> to vector<32x32xf32>
    %547 = vector.extract_strided_slice %517 {offsets = [3, 0], sizes = [1, 32], strides = [1, 1]} : vector<8x32xf32> to vector<1x32xf32>
    %548 = vector.extract_strided_slice %515 {offsets = [1, 0, 0], sizes = [1, 64, 96], strides = [1, 1, 1]} : vector<2x64x96xf32> to vector<1x64x96xf32>
    %549 = vector.shape_cast %548 : vector<1x64x96xf32> to vector<64x96xf32>
    %c0_150 = arith.constant 0 : index
    %c0_151 = arith.constant 0 : index
    %c0_152 = arith.constant 0 : index
    %550 = vector.load %arg10[%c0_150, %c0_151, %c0_152] : memref<2x16x32xf32, #tpu.memory_space<vmem>>, vector<1x16x32xf32>
    %551 = vector.shape_cast %550 : vector<1x16x32xf32> to vector<16x32xf32>
    %552 = vector.extract_strided_slice %549 {offsets = [0, 0], sizes = [32, 96], strides = [1, 1]} : vector<64x96xf32> to vector<32x96xf32>
    %cst_153 = arith.constant dense<0.000000e+00> : vector<16x96xf32>
    %553 = tpu.matmul %551, %552, %cst_153 {dimension_numbers = #tpu.dot_dimension_numbers<[1], [0], [0], [1], [0, 0, 1, 1], [], []>} : vector<16x32xf32>, vector<32x96xf32>, vector<16x96xf32> -> vector<16x96xf32>
    %c1_154 = arith.constant 1 : index
    %c0_155 = arith.constant 0 : index
    %c0_156 = arith.constant 0 : index
    %554 = vector.load %arg10[%c1_154, %c0_155, %c0_156] : memref<2x16x32xf32, #tpu.memory_space<vmem>>, vector<1x16x32xf32>
    %555 = vector.shape_cast %554 : vector<1x16x32xf32> to vector<16x32xf32>
    %556 = vector.extract_strided_slice %549 {offsets = [32, 0], sizes = [32, 96], strides = [1, 1]} : vector<64x96xf32> to vector<32x96xf32>
    %cst_157 = arith.constant dense<0.000000e+00> : vector<16x96xf32>
    %557 = tpu.matmul %555, %556, %cst_157 {dimension_numbers = #tpu.dot_dimension_numbers<[1], [0], [0], [1], [0, 0, 1, 1], [], []>} : vector<16x32xf32>, vector<32x96xf32>, vector<16x96xf32> -> vector<16x96xf32>
    %558 = arith.addf %553, %557 : vector<16x96xf32>
    %559 = vector.extract_strided_slice %558 {offsets = [0, 0], sizes = [16, 32], strides = [1, 1]} : vector<16x96xf32> to vector<16x32xf32>
    %560 = vector.extract_strided_slice %517 {offsets = [4, 0], sizes = [1, 32], strides = [1, 1]} : vector<8x32xf32> to vector<1x32xf32>
    %561 = vector.broadcast %560 : vector<1x32xf32> to vector<16x32xf32>
    %562 = arith.addf %559, %561 : vector<16x32xf32>
    %563 = vector.extract_strided_slice %558 {offsets = [0, 32], sizes = [16, 32], strides = [1, 1]} : vector<16x96xf32> to vector<16x32xf32>
    %564 = vector.extract_strided_slice %517 {offsets = [5, 0], sizes = [1, 32], strides = [1, 1]} : vector<8x32xf32> to vector<1x32xf32>
    %565 = vector.broadcast %564 : vector<1x32xf32> to vector<16x32xf32>
    %566 = arith.addf %563, %565 : vector<16x32xf32>
    %567 = vector.extract_strided_slice %558 {offsets = [0, 64], sizes = [16, 32], strides = [1, 1]} : vector<16x96xf32> to vector<16x32xf32>
    %568 = vector.extract_strided_slice %517 {offsets = [6, 0], sizes = [1, 32], strides = [1, 1]} : vector<8x32xf32> to vector<1x32xf32>
    %569 = vector.broadcast %568 : vector<1x32xf32> to vector<16x32xf32>
    %570 = arith.addf %567, %569 : vector<16x32xf32>
    %571 = vector.extract_strided_slice %516 {offsets = [3, 0, 0], sizes = [1, 32, 32], strides = [1, 1, 1]} : vector<6x32x32xf32> to vector<1x32x32xf32>
    %572 = vector.shape_cast %571 : vector<1x32x32xf32> to vector<32x32xf32>
    %573 = vector.extract_strided_slice %516 {offsets = [4, 0, 0], sizes = [1, 32, 32], strides = [1, 1, 1]} : vector<6x32x32xf32> to vector<1x32x32xf32>
    %574 = vector.shape_cast %573 : vector<1x32x32xf32> to vector<32x32xf32>
    %575 = vector.extract_strided_slice %516 {offsets = [5, 0, 0], sizes = [1, 32, 32], strides = [1, 1, 1]} : vector<6x32x32xf32> to vector<1x32x32xf32>
    %576 = vector.shape_cast %575 : vector<1x32x32xf32> to vector<32x32xf32>
    %577 = vector.extract_strided_slice %517 {offsets = [7, 0], sizes = [1, 32], strides = [1, 1]} : vector<8x32xf32> to vector<1x32xf32>
    %cst_158 = arith.constant 0.000000e+00 : f32
    %578 = vector.broadcast %cst_158 : f32 to vector<2x32xf32>
    %cst_159 = arith.constant 0.000000e+00 : f32
    %579 = vector.broadcast %cst_159 : f32 to vector<2x32xf32>
    %cst_160 = arith.constant dense<0.000000e+00> : vector<2x32xf32>
    %580 = tpu.matmul %578, %542, %cst_160 {dimension_numbers = #tpu.dot_dimension_numbers<[1], [0], [0], [1], [0, 0, 1, 1], [], []>} : vector<2x32xf32>, vector<32x32xf32>, vector<2x32xf32> -> vector<2x32xf32>
    %cst_161 = arith.constant dense<0.000000e+00> : vector<2x32xf32>
    %581 = tpu.matmul %578, %544, %cst_161 {dimension_numbers = #tpu.dot_dimension_numbers<[1], [0], [0], [1], [0, 0, 1, 1], [], []>} : vector<2x32xf32>, vector<32x32xf32>, vector<2x32xf32> -> vector<2x32xf32>
    %cst_162 = arith.constant dense<0.000000e+00> : vector<2x32xf32>
    %582 = tpu.matmul %578, %546, %cst_162 {dimension_numbers = #tpu.dot_dimension_numbers<[1], [0], [0], [1], [0, 0, 1, 1], [], []>} : vector<2x32xf32>, vector<32x32xf32>, vector<2x32xf32> -> vector<2x32xf32>
    %583 = vector.broadcast %547 : vector<1x32xf32> to vector<2x32xf32>
    %584 = arith.addf %582, %583 : vector<2x32xf32>
    %585 = vector.extract_strided_slice %532 {offsets = [0, 0], sizes = [2, 32], strides = [1, 1]} : vector<16x32xf32> to vector<2x32xf32>
    %586 = arith.addf %585, %580 : vector<2x32xf32>
    %587 = arith.negf %586 : vector<2x32xf32>
    %588 = math.exp %587 : vector<2x32xf32>
    %cst_163 = arith.constant 1.000000e+00 : f32
    %589 = vector.broadcast %cst_163 : f32 to vector<2x32xf32>
    %590 = arith.addf %589, %588 : vector<2x32xf32>
    %591 = arith.divf %589, %590 : vector<2x32xf32>
    %592 = vector.extract_strided_slice %536 {offsets = [0, 0], sizes = [2, 32], strides = [1, 1]} : vector<16x32xf32> to vector<2x32xf32>
    %593 = arith.addf %592, %581 : vector<2x32xf32>
    %594 = arith.negf %593 : vector<2x32xf32>
    %595 = math.exp %594 : vector<2x32xf32>
    %cst_164 = arith.constant 1.000000e+00 : f32
    %596 = vector.broadcast %cst_164 : f32 to vector<2x32xf32>
    %597 = arith.addf %596, %595 : vector<2x32xf32>
    %598 = arith.divf %596, %597 : vector<2x32xf32>
    %599 = vector.extract_strided_slice %540 {offsets = [0, 0], sizes = [2, 32], strides = [1, 1]} : vector<16x32xf32> to vector<2x32xf32>
    %600 = arith.mulf %591, %584 : vector<2x32xf32>
    %601 = arith.addf %599, %600 : vector<2x32xf32>
    %602 = math.tanh %601 : vector<2x32xf32>
    %603 = arith.subf %578, %602 : vector<2x32xf32>
    %604 = arith.mulf %598, %603 : vector<2x32xf32>
    %605 = arith.addf %602, %604 : vector<2x32xf32>
    %cst_165 = arith.constant dense<0.000000e+00> : vector<2x32xf32>
    %606 = tpu.matmul %579, %572, %cst_165 {dimension_numbers = #tpu.dot_dimension_numbers<[1], [0], [0], [1], [0, 0, 1, 1], [], []>} : vector<2x32xf32>, vector<32x32xf32>, vector<2x32xf32> -> vector<2x32xf32>
    %cst_166 = arith.constant dense<0.000000e+00> : vector<2x32xf32>
    %607 = tpu.matmul %579, %574, %cst_166 {dimension_numbers = #tpu.dot_dimension_numbers<[1], [0], [0], [1], [0, 0, 1, 1], [], []>} : vector<2x32xf32>, vector<32x32xf32>, vector<2x32xf32> -> vector<2x32xf32>
    %cst_167 = arith.constant dense<0.000000e+00> : vector<2x32xf32>
    %608 = tpu.matmul %579, %576, %cst_167 {dimension_numbers = #tpu.dot_dimension_numbers<[1], [0], [0], [1], [0, 0, 1, 1], [], []>} : vector<2x32xf32>, vector<32x32xf32>, vector<2x32xf32> -> vector<2x32xf32>
    %609 = vector.broadcast %577 : vector<1x32xf32> to vector<2x32xf32>
    %610 = arith.addf %608, %609 : vector<2x32xf32>
    %611 = vector.extract_strided_slice %562 {offsets = [14, 0], sizes = [2, 32], strides = [1, 1]} : vector<16x32xf32> to vector<2x32xf32>
    %612 = arith.addf %611, %606 : vector<2x32xf32>
    %613 = arith.negf %612 : vector<2x32xf32>
    %614 = math.exp %613 : vector<2x32xf32>
    %cst_168 = arith.constant 1.000000e+00 : f32
    %615 = vector.broadcast %cst_168 : f32 to vector<2x32xf32>
    %616 = arith.addf %615, %614 : vector<2x32xf32>
    %617 = arith.divf %615, %616 : vector<2x32xf32>
    %618 = vector.extract_strided_slice %566 {offsets = [14, 0], sizes = [2, 32], strides = [1, 1]} : vector<16x32xf32> to vector<2x32xf32>
    %619 = arith.addf %618, %607 : vector<2x32xf32>
    %620 = arith.negf %619 : vector<2x32xf32>
    %621 = math.exp %620 : vector<2x32xf32>
    %cst_169 = arith.constant 1.000000e+00 : f32
    %622 = vector.broadcast %cst_169 : f32 to vector<2x32xf32>
    %623 = arith.addf %622, %621 : vector<2x32xf32>
    %624 = arith.divf %622, %623 : vector<2x32xf32>
    %625 = vector.extract_strided_slice %570 {offsets = [14, 0], sizes = [2, 32], strides = [1, 1]} : vector<16x32xf32> to vector<2x32xf32>
    %626 = arith.mulf %617, %610 : vector<2x32xf32>
    %627 = arith.addf %625, %626 : vector<2x32xf32>
    %628 = math.tanh %627 : vector<2x32xf32>
    %629 = arith.subf %579, %628 : vector<2x32xf32>
    %630 = arith.mulf %624, %629 : vector<2x32xf32>
    %631 = arith.addf %628, %630 : vector<2x32xf32>
    %cst_170 = arith.constant dense<0.000000e+00> : vector<2x32xf32>
    %632 = tpu.matmul %605, %542, %cst_170 {dimension_numbers = #tpu.dot_dimension_numbers<[1], [0], [0], [1], [0, 0, 1, 1], [], []>} : vector<2x32xf32>, vector<32x32xf32>, vector<2x32xf32> -> vector<2x32xf32>
    %cst_171 = arith.constant dense<0.000000e+00> : vector<2x32xf32>
    %633 = tpu.matmul %605, %544, %cst_171 {dimension_numbers = #tpu.dot_dimension_numbers<[1], [0], [0], [1], [0, 0, 1, 1], [], []>} : vector<2x32xf32>, vector<32x32xf32>, vector<2x32xf32> -> vector<2x32xf32>
    %cst_172 = arith.constant dense<0.000000e+00> : vector<2x32xf32>
    %634 = tpu.matmul %605, %546, %cst_172 {dimension_numbers = #tpu.dot_dimension_numbers<[1], [0], [0], [1], [0, 0, 1, 1], [], []>} : vector<2x32xf32>, vector<32x32xf32>, vector<2x32xf32> -> vector<2x32xf32>
    %635 = vector.broadcast %547 : vector<1x32xf32> to vector<2x32xf32>
    %636 = arith.addf %634, %635 : vector<2x32xf32>
    %637 = vector.extract_strided_slice %532 {offsets = [2, 0], sizes = [2, 32], strides = [1, 1]} : vector<16x32xf32> to vector<2x32xf32>
    %638 = arith.addf %637, %632 : vector<2x32xf32>
    %639 = arith.negf %638 : vector<2x32xf32>
    %640 = math.exp %639 : vector<2x32xf32>
    %cst_173 = arith.constant 1.000000e+00 : f32
    %641 = vector.broadcast %cst_173 : f32 to vector<2x32xf32>
    %642 = arith.addf %641, %640 : vector<2x32xf32>
    %643 = arith.divf %641, %642 : vector<2x32xf32>
    %644 = vector.extract_strided_slice %536 {offsets = [2, 0], sizes = [2, 32], strides = [1, 1]} : vector<16x32xf32> to vector<2x32xf32>
    %645 = arith.addf %644, %633 : vector<2x32xf32>
    %646 = arith.negf %645 : vector<2x32xf32>
    %647 = math.exp %646 : vector<2x32xf32>
    %cst_174 = arith.constant 1.000000e+00 : f32
    %648 = vector.broadcast %cst_174 : f32 to vector<2x32xf32>
    %649 = arith.addf %648, %647 : vector<2x32xf32>
    %650 = arith.divf %648, %649 : vector<2x32xf32>
    %651 = vector.extract_strided_slice %540 {offsets = [2, 0], sizes = [2, 32], strides = [1, 1]} : vector<16x32xf32> to vector<2x32xf32>
    %652 = arith.mulf %643, %636 : vector<2x32xf32>
    %653 = arith.addf %651, %652 : vector<2x32xf32>
    %654 = math.tanh %653 : vector<2x32xf32>
    %655 = arith.subf %605, %654 : vector<2x32xf32>
    %656 = arith.mulf %650, %655 : vector<2x32xf32>
    %657 = arith.addf %654, %656 : vector<2x32xf32>
    %cst_175 = arith.constant dense<0.000000e+00> : vector<2x32xf32>
    %658 = tpu.matmul %657, %542, %cst_175 {dimension_numbers = #tpu.dot_dimension_numbers<[1], [0], [0], [1], [0, 0, 1, 1], [], []>} : vector<2x32xf32>, vector<32x32xf32>, vector<2x32xf32> -> vector<2x32xf32>
    %cst_176 = arith.constant dense<0.000000e+00> : vector<2x32xf32>
    %659 = tpu.matmul %657, %544, %cst_176 {dimension_numbers = #tpu.dot_dimension_numbers<[1], [0], [0], [1], [0, 0, 1, 1], [], []>} : vector<2x32xf32>, vector<32x32xf32>, vector<2x32xf32> -> vector<2x32xf32>
    %cst_177 = arith.constant dense<0.000000e+00> : vector<2x32xf32>
    %660 = tpu.matmul %657, %546, %cst_177 {dimension_numbers = #tpu.dot_dimension_numbers<[1], [0], [0], [1], [0, 0, 1, 1], [], []>} : vector<2x32xf32>, vector<32x32xf32>, vector<2x32xf32> -> vector<2x32xf32>
    %661 = vector.broadcast %547 : vector<1x32xf32> to vector<2x32xf32>
    %662 = arith.addf %660, %661 : vector<2x32xf32>
    %663 = vector.extract_strided_slice %532 {offsets = [4, 0], sizes = [2, 32], strides = [1, 1]} : vector<16x32xf32> to vector<2x32xf32>
    %664 = arith.addf %663, %658 : vector<2x32xf32>
    %665 = arith.negf %664 : vector<2x32xf32>
    %666 = math.exp %665 : vector<2x32xf32>
    %cst_178 = arith.constant 1.000000e+00 : f32
    %667 = vector.broadcast %cst_178 : f32 to vector<2x32xf32>
    %668 = arith.addf %667, %666 : vector<2x32xf32>
    %669 = arith.divf %667, %668 : vector<2x32xf32>
    %670 = vector.extract_strided_slice %536 {offsets = [4, 0], sizes = [2, 32], strides = [1, 1]} : vector<16x32xf32> to vector<2x32xf32>
    %671 = arith.addf %670, %659 : vector<2x32xf32>
    %672 = arith.negf %671 : vector<2x32xf32>
    %673 = math.exp %672 : vector<2x32xf32>
    %cst_179 = arith.constant 1.000000e+00 : f32
    %674 = vector.broadcast %cst_179 : f32 to vector<2x32xf32>
    %675 = arith.addf %674, %673 : vector<2x32xf32>
    %676 = arith.divf %674, %675 : vector<2x32xf32>
    %677 = vector.extract_strided_slice %540 {offsets = [4, 0], sizes = [2, 32], strides = [1, 1]} : vector<16x32xf32> to vector<2x32xf32>
    %678 = arith.mulf %669, %662 : vector<2x32xf32>
    %679 = arith.addf %677, %678 : vector<2x32xf32>
    %680 = math.tanh %679 : vector<2x32xf32>
    %681 = arith.subf %657, %680 : vector<2x32xf32>
    %682 = arith.mulf %676, %681 : vector<2x32xf32>
    %683 = arith.addf %680, %682 : vector<2x32xf32>
    %cst_180 = arith.constant dense<0.000000e+00> : vector<2x32xf32>
    %684 = tpu.matmul %683, %542, %cst_180 {dimension_numbers = #tpu.dot_dimension_numbers<[1], [0], [0], [1], [0, 0, 1, 1], [], []>} : vector<2x32xf32>, vector<32x32xf32>, vector<2x32xf32> -> vector<2x32xf32>
    %cst_181 = arith.constant dense<0.000000e+00> : vector<2x32xf32>
    %685 = tpu.matmul %683, %544, %cst_181 {dimension_numbers = #tpu.dot_dimension_numbers<[1], [0], [0], [1], [0, 0, 1, 1], [], []>} : vector<2x32xf32>, vector<32x32xf32>, vector<2x32xf32> -> vector<2x32xf32>
    %cst_182 = arith.constant dense<0.000000e+00> : vector<2x32xf32>
    %686 = tpu.matmul %683, %546, %cst_182 {dimension_numbers = #tpu.dot_dimension_numbers<[1], [0], [0], [1], [0, 0, 1, 1], [], []>} : vector<2x32xf32>, vector<32x32xf32>, vector<2x32xf32> -> vector<2x32xf32>
    %687 = vector.broadcast %547 : vector<1x32xf32> to vector<2x32xf32>
    %688 = arith.addf %686, %687 : vector<2x32xf32>
    %689 = vector.extract_strided_slice %532 {offsets = [6, 0], sizes = [2, 32], strides = [1, 1]} : vector<16x32xf32> to vector<2x32xf32>
    %690 = arith.addf %689, %684 : vector<2x32xf32>
    %691 = arith.negf %690 : vector<2x32xf32>
    %692 = math.exp %691 : vector<2x32xf32>
    %cst_183 = arith.constant 1.000000e+00 : f32
    %693 = vector.broadcast %cst_183 : f32 to vector<2x32xf32>
    %694 = arith.addf %693, %692 : vector<2x32xf32>
    %695 = arith.divf %693, %694 : vector<2x32xf32>
    %696 = vector.extract_strided_slice %536 {offsets = [6, 0], sizes = [2, 32], strides = [1, 1]} : vector<16x32xf32> to vector<2x32xf32>
    %697 = arith.addf %696, %685 : vector<2x32xf32>
    %698 = arith.negf %697 : vector<2x32xf32>
    %699 = math.exp %698 : vector<2x32xf32>
    %cst_184 = arith.constant 1.000000e+00 : f32
    %700 = vector.broadcast %cst_184 : f32 to vector<2x32xf32>
    %701 = arith.addf %700, %699 : vector<2x32xf32>
    %702 = arith.divf %700, %701 : vector<2x32xf32>
    %703 = vector.extract_strided_slice %540 {offsets = [6, 0], sizes = [2, 32], strides = [1, 1]} : vector<16x32xf32> to vector<2x32xf32>
    %704 = arith.mulf %695, %688 : vector<2x32xf32>
    %705 = arith.addf %703, %704 : vector<2x32xf32>
    %706 = math.tanh %705 : vector<2x32xf32>
    %707 = arith.subf %683, %706 : vector<2x32xf32>
    %708 = arith.mulf %702, %707 : vector<2x32xf32>
    %709 = arith.addf %706, %708 : vector<2x32xf32>
    %cst_185 = arith.constant dense<0.000000e+00> : vector<2x32xf32>
    %710 = tpu.matmul %709, %542, %cst_185 {dimension_numbers = #tpu.dot_dimension_numbers<[1], [0], [0], [1], [0, 0, 1, 1], [], []>} : vector<2x32xf32>, vector<32x32xf32>, vector<2x32xf32> -> vector<2x32xf32>
    %cst_186 = arith.constant dense<0.000000e+00> : vector<2x32xf32>
    %711 = tpu.matmul %709, %544, %cst_186 {dimension_numbers = #tpu.dot_dimension_numbers<[1], [0], [0], [1], [0, 0, 1, 1], [], []>} : vector<2x32xf32>, vector<32x32xf32>, vector<2x32xf32> -> vector<2x32xf32>
    %cst_187 = arith.constant dense<0.000000e+00> : vector<2x32xf32>
    %712 = tpu.matmul %709, %546, %cst_187 {dimension_numbers = #tpu.dot_dimension_numbers<[1], [0], [0], [1], [0, 0, 1, 1], [], []>} : vector<2x32xf32>, vector<32x32xf32>, vector<2x32xf32> -> vector<2x32xf32>
    %713 = vector.broadcast %547 : vector<1x32xf32> to vector<2x32xf32>
    %714 = arith.addf %712, %713 : vector<2x32xf32>
    %715 = vector.extract_strided_slice %532 {offsets = [8, 0], sizes = [2, 32], strides = [1, 1]} : vector<16x32xf32> to vector<2x32xf32>
    %716 = arith.addf %715, %710 : vector<2x32xf32>
    %717 = arith.negf %716 : vector<2x32xf32>
    %718 = math.exp %717 : vector<2x32xf32>
    %cst_188 = arith.constant 1.000000e+00 : f32
    %719 = vector.broadcast %cst_188 : f32 to vector<2x32xf32>
    %720 = arith.addf %719, %718 : vector<2x32xf32>
    %721 = arith.divf %719, %720 : vector<2x32xf32>
    %722 = vector.extract_strided_slice %536 {offsets = [8, 0], sizes = [2, 32], strides = [1, 1]} : vector<16x32xf32> to vector<2x32xf32>
    %723 = arith.addf %722, %711 : vector<2x32xf32>
    %724 = arith.negf %723 : vector<2x32xf32>
    %725 = math.exp %724 : vector<2x32xf32>
    %cst_189 = arith.constant 1.000000e+00 : f32
    %726 = vector.broadcast %cst_189 : f32 to vector<2x32xf32>
    %727 = arith.addf %726, %725 : vector<2x32xf32>
    %728 = arith.divf %726, %727 : vector<2x32xf32>
    %729 = vector.extract_strided_slice %540 {offsets = [8, 0], sizes = [2, 32], strides = [1, 1]} : vector<16x32xf32> to vector<2x32xf32>
    %730 = arith.mulf %721, %714 : vector<2x32xf32>
    %731 = arith.addf %729, %730 : vector<2x32xf32>
    %732 = math.tanh %731 : vector<2x32xf32>
    %733 = arith.subf %709, %732 : vector<2x32xf32>
    %734 = arith.mulf %728, %733 : vector<2x32xf32>
    %735 = arith.addf %732, %734 : vector<2x32xf32>
    %cst_190 = arith.constant dense<0.000000e+00> : vector<2x32xf32>
    %736 = tpu.matmul %735, %542, %cst_190 {dimension_numbers = #tpu.dot_dimension_numbers<[1], [0], [0], [1], [0, 0, 1, 1], [], []>} : vector<2x32xf32>, vector<32x32xf32>, vector<2x32xf32> -> vector<2x32xf32>
    %cst_191 = arith.constant dense<0.000000e+00> : vector<2x32xf32>
    %737 = tpu.matmul %735, %544, %cst_191 {dimension_numbers = #tpu.dot_dimension_numbers<[1], [0], [0], [1], [0, 0, 1, 1], [], []>} : vector<2x32xf32>, vector<32x32xf32>, vector<2x32xf32> -> vector<2x32xf32>
    %cst_192 = arith.constant dense<0.000000e+00> : vector<2x32xf32>
    %738 = tpu.matmul %735, %546, %cst_192 {dimension_numbers = #tpu.dot_dimension_numbers<[1], [0], [0], [1], [0, 0, 1, 1], [], []>} : vector<2x32xf32>, vector<32x32xf32>, vector<2x32xf32> -> vector<2x32xf32>
    %739 = vector.broadcast %547 : vector<1x32xf32> to vector<2x32xf32>
    %740 = arith.addf %738, %739 : vector<2x32xf32>
    %741 = vector.extract_strided_slice %532 {offsets = [10, 0], sizes = [2, 32], strides = [1, 1]} : vector<16x32xf32> to vector<2x32xf32>
    %742 = arith.addf %741, %736 : vector<2x32xf32>
    %743 = arith.negf %742 : vector<2x32xf32>
    %744 = math.exp %743 : vector<2x32xf32>
    %cst_193 = arith.constant 1.000000e+00 : f32
    %745 = vector.broadcast %cst_193 : f32 to vector<2x32xf32>
    %746 = arith.addf %745, %744 : vector<2x32xf32>
    %747 = arith.divf %745, %746 : vector<2x32xf32>
    %748 = vector.extract_strided_slice %536 {offsets = [10, 0], sizes = [2, 32], strides = [1, 1]} : vector<16x32xf32> to vector<2x32xf32>
    %749 = arith.addf %748, %737 : vector<2x32xf32>
    %750 = arith.negf %749 : vector<2x32xf32>
    %751 = math.exp %750 : vector<2x32xf32>
    %cst_194 = arith.constant 1.000000e+00 : f32
    %752 = vector.broadcast %cst_194 : f32 to vector<2x32xf32>
    %753 = arith.addf %752, %751 : vector<2x32xf32>
    %754 = arith.divf %752, %753 : vector<2x32xf32>
    %755 = vector.extract_strided_slice %540 {offsets = [10, 0], sizes = [2, 32], strides = [1, 1]} : vector<16x32xf32> to vector<2x32xf32>
    %756 = arith.mulf %747, %740 : vector<2x32xf32>
    %757 = arith.addf %755, %756 : vector<2x32xf32>
    %758 = math.tanh %757 : vector<2x32xf32>
    %759 = arith.subf %735, %758 : vector<2x32xf32>
    %760 = arith.mulf %754, %759 : vector<2x32xf32>
    %761 = arith.addf %758, %760 : vector<2x32xf32>
    %cst_195 = arith.constant dense<0.000000e+00> : vector<2x32xf32>
    %762 = tpu.matmul %761, %542, %cst_195 {dimension_numbers = #tpu.dot_dimension_numbers<[1], [0], [0], [1], [0, 0, 1, 1], [], []>} : vector<2x32xf32>, vector<32x32xf32>, vector<2x32xf32> -> vector<2x32xf32>
    %cst_196 = arith.constant dense<0.000000e+00> : vector<2x32xf32>
    %763 = tpu.matmul %761, %544, %cst_196 {dimension_numbers = #tpu.dot_dimension_numbers<[1], [0], [0], [1], [0, 0, 1, 1], [], []>} : vector<2x32xf32>, vector<32x32xf32>, vector<2x32xf32> -> vector<2x32xf32>
    %cst_197 = arith.constant dense<0.000000e+00> : vector<2x32xf32>
    %764 = tpu.matmul %761, %546, %cst_197 {dimension_numbers = #tpu.dot_dimension_numbers<[1], [0], [0], [1], [0, 0, 1, 1], [], []>} : vector<2x32xf32>, vector<32x32xf32>, vector<2x32xf32> -> vector<2x32xf32>
    %765 = vector.broadcast %547 : vector<1x32xf32> to vector<2x32xf32>
    %766 = arith.addf %764, %765 : vector<2x32xf32>
    %767 = vector.extract_strided_slice %532 {offsets = [12, 0], sizes = [2, 32], strides = [1, 1]} : vector<16x32xf32> to vector<2x32xf32>
    %768 = arith.addf %767, %762 : vector<2x32xf32>
    %769 = arith.negf %768 : vector<2x32xf32>
    %770 = math.exp %769 : vector<2x32xf32>
    %cst_198 = arith.constant 1.000000e+00 : f32
    %771 = vector.broadcast %cst_198 : f32 to vector<2x32xf32>
    %772 = arith.addf %771, %770 : vector<2x32xf32>
    %773 = arith.divf %771, %772 : vector<2x32xf32>
    %774 = vector.extract_strided_slice %536 {offsets = [12, 0], sizes = [2, 32], strides = [1, 1]} : vector<16x32xf32> to vector<2x32xf32>
    %775 = arith.addf %774, %763 : vector<2x32xf32>
    %776 = arith.negf %775 : vector<2x32xf32>
    %777 = math.exp %776 : vector<2x32xf32>
    %cst_199 = arith.constant 1.000000e+00 : f32
    %778 = vector.broadcast %cst_199 : f32 to vector<2x32xf32>
    %779 = arith.addf %778, %777 : vector<2x32xf32>
    %780 = arith.divf %778, %779 : vector<2x32xf32>
    %781 = vector.extract_strided_slice %540 {offsets = [12, 0], sizes = [2, 32], strides = [1, 1]} : vector<16x32xf32> to vector<2x32xf32>
    %782 = arith.mulf %773, %766 : vector<2x32xf32>
    %783 = arith.addf %781, %782 : vector<2x32xf32>
    %784 = math.tanh %783 : vector<2x32xf32>
    %785 = arith.subf %761, %784 : vector<2x32xf32>
    %786 = arith.mulf %780, %785 : vector<2x32xf32>
    %787 = arith.addf %784, %786 : vector<2x32xf32>
    %cst_200 = arith.constant dense<0.000000e+00> : vector<2x32xf32>
    %788 = tpu.matmul %787, %542, %cst_200 {dimension_numbers = #tpu.dot_dimension_numbers<[1], [0], [0], [1], [0, 0, 1, 1], [], []>} : vector<2x32xf32>, vector<32x32xf32>, vector<2x32xf32> -> vector<2x32xf32>
    %cst_201 = arith.constant dense<0.000000e+00> : vector<2x32xf32>
    %789 = tpu.matmul %787, %544, %cst_201 {dimension_numbers = #tpu.dot_dimension_numbers<[1], [0], [0], [1], [0, 0, 1, 1], [], []>} : vector<2x32xf32>, vector<32x32xf32>, vector<2x32xf32> -> vector<2x32xf32>
    %cst_202 = arith.constant dense<0.000000e+00> : vector<2x32xf32>
    %790 = tpu.matmul %787, %546, %cst_202 {dimension_numbers = #tpu.dot_dimension_numbers<[1], [0], [0], [1], [0, 0, 1, 1], [], []>} : vector<2x32xf32>, vector<32x32xf32>, vector<2x32xf32> -> vector<2x32xf32>
    %791 = vector.broadcast %547 : vector<1x32xf32> to vector<2x32xf32>
    %792 = arith.addf %790, %791 : vector<2x32xf32>
    %793 = vector.extract_strided_slice %532 {offsets = [14, 0], sizes = [2, 32], strides = [1, 1]} : vector<16x32xf32> to vector<2x32xf32>
    %794 = arith.addf %793, %788 : vector<2x32xf32>
    %795 = arith.negf %794 : vector<2x32xf32>
    %796 = math.exp %795 : vector<2x32xf32>
    %cst_203 = arith.constant 1.000000e+00 : f32
    %797 = vector.broadcast %cst_203 : f32 to vector<2x32xf32>
    %798 = arith.addf %797, %796 : vector<2x32xf32>
    %799 = arith.divf %797, %798 : vector<2x32xf32>
    %800 = vector.extract_strided_slice %536 {offsets = [14, 0], sizes = [2, 32], strides = [1, 1]} : vector<16x32xf32> to vector<2x32xf32>
    %801 = arith.addf %800, %789 : vector<2x32xf32>
    %802 = arith.negf %801 : vector<2x32xf32>
    %803 = math.exp %802 : vector<2x32xf32>
    %cst_204 = arith.constant 1.000000e+00 : f32
    %804 = vector.broadcast %cst_204 : f32 to vector<2x32xf32>
    %805 = arith.addf %804, %803 : vector<2x32xf32>
    %806 = arith.divf %804, %805 : vector<2x32xf32>
    %807 = vector.extract_strided_slice %540 {offsets = [14, 0], sizes = [2, 32], strides = [1, 1]} : vector<16x32xf32> to vector<2x32xf32>
    %808 = arith.mulf %799, %792 : vector<2x32xf32>
    %809 = arith.addf %807, %808 : vector<2x32xf32>
    %810 = math.tanh %809 : vector<2x32xf32>
    %811 = arith.subf %787, %810 : vector<2x32xf32>
    %812 = arith.mulf %806, %811 : vector<2x32xf32>
    %813 = arith.addf %810, %812 : vector<2x32xf32>
    %c0_205 = arith.constant 0 : index
    %c0_206 = arith.constant 0 : index
    %814 = vector.load %arg7[%c0_205, %c0_206] : memref<64x4xf32, #tpu.memory_space<vmem>>, vector<64x4xf32>
    %815 = vector.extract_strided_slice %814 {offsets = [0, 0], sizes = [32, 4], strides = [1, 1]} : vector<64x4xf32> to vector<32x4xf32>
    %cst_207 = arith.constant dense<0.000000e+00> : vector<2x4xf32>
    %816 = tpu.matmul %813, %815, %cst_207 {dimension_numbers = #tpu.dot_dimension_numbers<[1], [0], [0], [1], [0, 0, 1, 1], [], []>} : vector<2x32xf32>, vector<32x4xf32>, vector<2x4xf32> -> vector<2x4xf32>
    %817 = vector.extract_strided_slice %814 {offsets = [32, 0], sizes = [32, 4], strides = [1, 1]} : vector<64x4xf32> to vector<32x4xf32>
    %cst_208 = arith.constant dense<0.000000e+00> : vector<2x4xf32>
    %818 = tpu.matmul %631, %817, %cst_208 {dimension_numbers = #tpu.dot_dimension_numbers<[1], [0], [0], [1], [0, 0, 1, 1], [], []>} : vector<2x32xf32>, vector<32x4xf32>, vector<2x4xf32> -> vector<2x4xf32>
    %819 = arith.addf %816, %818 : vector<2x4xf32>
    %c0_209 = arith.constant 0 : index
    %c0_210 = arith.constant 0 : index
    %820 = vector.load %arg8[%c0_209, %c0_210] : memref<1x4xf32, #tpu.memory_space<vmem>>, vector<1x4xf32>
    %821 = vector.broadcast %820 : vector<1x4xf32> to vector<2x4xf32>
    %822 = arith.addf %819, %821 : vector<2x4xf32>
    %c0_211 = arith.constant 0 : index
    %c0_212 = arith.constant 0 : index
    %823 = vector.load %arg9[%c0_211, %c0_212] : memref<2x4xf32, #tpu.memory_space<vmem>>, vector<2x4xf32>
    tpu.vector_store %arg9[%c0_211, %c0_212], %822 {strides = array<i32>} : memref<2x4xf32, #tpu.memory_space<vmem>>, vector<2x4xf32>,
    return
  }
}

</mosaic_0001>

<bundles_post_ra>
// kernel: torch_gru_forward.1
= control target key start
LH: loop header
LB: loop body
LE: loop exit
PB: predicated region body
PF: predicated region fallthrough
CT: control target
= control target key end

     0   :  { %14 = vsyncpa [#allocation4], 0  ;;  %s5536_s0 = inlined_call_operand.vmem [shape: f32[16,8], index: 0, kind: input, shape index: {}]   ;;  %s5537_s1 = inlined_call_operand.vmem [shape: f32[2,8,96], index: 1, kind: input, shape index: {}]   ;;  %s5538_s2 = inlined_call_operand.hbm [shape: f32[6,32,32], index: 2, kind: input, shape index: {}]   ;;  %s5539_s3 = inlined_call_operand.vmem [shape: f32[8,32], index: 3, kind: input, shape index: {}]   ;;  %s5540_s4 = inlined_call_operand.hbm [shape: f32[2,64,96], index: 4, kind: input, shape index: {}]   ;;  %s5541_s5 = inlined_call_operand.hbm [shape: f32[6,32,32], index: 5, kind: input, shape index: {}]   ;;  %s5542_s6 = inlined_call_operand.vmem [shape: f32[8,32], index: 6, kind: input, shape index: {}]   ;;  %s5543_s7 = inlined_call_operand.vmem [shape: f32[64,4], index: 7, kind: input, shape index: {}]   ;;  %s5544_s8 = inlined_call_operand.vmem [shape: f32[1,4], index: 8, kind: input, shape index: {}]   ;;  %s5545_s9 = inlined_call_operand.hbm [shape: f32[2,4], index: 9, kind: output, shape index: {}]  }
   0x1   :  { %15 = vsyncpa [#allocation7], 0 }
   0x2   :  { %16 = vsyncpa [#allocation5], 0  ;;  %s40_s11 = sshll.u32 %s5540_s4, 4  ;;  %s4437_s12 = smov [#allocation6]   ;;  %s41_s11 = int_to_ptr.hbm [resolvable:$true] %s40_s11 }
   0x3   :  { %s42_s13 = sshll.u32 %s4437_s12, 4  ;;  %s25_s16 = sshll.u32 %s5538_s2, 4  ;;  %s43_s13 = int_to_ptr.vmem [resolvable:$true] %s42_s13  ;;  %s26_s16 = int_to_ptr.hbm [resolvable:$true] %s25_s16 }
   0x4   :  { %s4438_s17 = smov 128   ;;  %s4439_s18 = smov 8  }
   0x5   :  { %48 = dma.hbm_to_vmem [thread:$0]  %s41_s11, 2048, %s43_s13, [#allocation7], %s4438_s17, %s4438_s17, %s4439_s18  }
   0x6   :  { %s4440_s19 = smov [#allocation3]   ;;  %s53_s23 = sshll.u32 %s5541_s5, 4  ;;  %s54_s23 = int_to_ptr.hbm [resolvable:$true] %s53_s23 }
   0x7   :  { %s27_s20 = sshll.u32 %s4440_s19, 4  ;;  %s4441_s4 = smov [#allocation8]   ;;  %s28_s20 = int_to_ptr.vmem [resolvable:$true] %s27_s20 }
   0x8   :  { %33 = dma.hbm_to_vmem [thread:$0]  %s26_s16, 3072, %s28_s20, [#allocation4], %s4438_s17, %s4438_s17, %s4439_s18  }
   0x9   :  { %s55_s24 = sshll.u32 %s4441_s4, 4  ;;  %s56_s24 = int_to_ptr.vmem [resolvable:$true] %s55_s24 }
   0xa   :  { %61 = dma.hbm_to_vmem [thread:$0]  %s54_s23, 3072, %s56_s24, [#allocation7], %s4438_s17, %s4438_s17, %s4439_s18  }
   0xb   :  { %4431 = dma.done.wait [#allocation4], 3072  }
   0xc   :  { %4432 = vsyncadd [#allocation4], 4294964224 }
   0xd   :  { %4433 = dma.done.wait [#allocation7], 5120  }
   0xe   :  { %4434 = vsyncadd [#allocation7], 4294962176  ;;  %vm109_vm0 = vcmask 64512   ;;  %v80_v0 = vld [vmem:[%s5537_s1] sm:$0xff]  ;;  %v4509_v1 = vld [vmem:[#allocation3 + $0x18] sm:$0xff]  ;;  %v5546_v17 = vmov 0.0  }
   0xf   :  { %v4511_v2 = vld [vmem:[#allocation3 + $0x38] sm:$0xff]  ;;  %131 = vmatpush.msra.mxu0 %v80_v0  ;;  %212 = vmatpush.msra.mxu2 %v4509_v1  ;;  %v107_v3 = vld [vmem:[%s5536_s0] sm:$0xff]  ;;  %v4517_v4 = vld [vmem:[#allocation3 + $0x10] sm:$0xff]  ;;  %s4446_s30 = smov [#allocation9]  }
  0x10   :  { %v4519_v5 = vld [vmem:[#allocation3 + $0x30] sm:$0xff]  ;;  %232 = vmatpush.msra.mxu3 %v4511_v2  ;;  %3920 = vmatmul.msk.f32.vlgmr.msra.gmra.mxu0 %vm109_vm0, %v107_v3  ;;  %v4523_v6 = vld [vmem:[#allocation3 + $0x8] sm:$0xff]  ;;  %v4529_v8 = vld [vmem:[#allocation3] sm:$0xff]  ;;  %s3907_s10 = sshll.u32 %s4446_s30, 4  ;;  %s3908_s10 = int_to_ptr.vmem [resolvable:$true] %s3907_s10 }
  0x11   :  { %213 = vmatpush.msra.mxu2 %v4517_v4  ;;  %v4526_v7 = vld [vmem:[#allocation3 + $0x28] sm:$0xff]  ;;  %v4531_v9 = vld [vmem:[#allocation3 + $0x98] sm:$0xff]  ;;  %v4534_v10 = vld [vmem:[#allocation3 + $0x20] sm:$0xff] }
  0x12   :  { %233 = vmatpush.msra.mxu3 %v4519_v5  ;;  %355 = vmatpush.msrb.mxu0 %v4531_v9  ;;  %v81_v11 = vld [vmem:[%s5537_s1 + $0x8] sm:$0xff]  ;;  %v4540_v12 = vld [vmem:[#allocation3 + $0x90] sm:$0xff]  ;;  %v4546_v13 = vld [vmem:[%s5539_s3] sm:$0xff]  ;;  %s4444_s1 = smov 32   ;;  %s4445_s3 = smov 96  }
  0x13   :  { %214 = vmatpush.msra.mxu2 %v4523_v6  ;;  %171 = vmatpush.msra.mxu1 %v81_v11  ;;  %v4549_v14 = vld [vmem:[#allocation3 + $0x78] sm:$0xff]  ;;  %v108_v15 = vld [vmem:[%s5536_s0 + $0x8] sm:$0xff]  ;;  %v189_v16 = vperm.slane %v4546_v13, 6  ;;  %v149_v19 = vperm.slane %v4546_v13, 2  ;;  %v4562_v20 = vld [vmem:[#allocation3 + $0x70] sm:$0xff]  ;;  %s4443_s0 = smov 64  }
  0x14   :  { %234 = vmatpush.msra.mxu3 %v4526_v7  ;;  %356 = vmatpush.msrb.mxu0 %v4540_v12  ;;  %v4558_v18 = vld [vmem:[#allocation3 + $0x88] sm:$0xff]  ;;  %v4567_v21 = vld [vmem:[#allocation3 + $0x80] sm:$0xff]  ;;  %v4569_v22 = vld [vmem:[#allocation3 + $0x58] sm:$0xff]  ;;  %v182_v25 = vperm.slane %v4546_v13, 5  ;;  %v179_v34 = vperm.slane %v4546_v13, 4  ;;  %v5548_v35 = vperm.slane %v4546_v13, 0 }
  0x15   :  { %215 = vmatpush.msra.mxu2 %v4529_v8  ;;  %3922 = vmatmul.msk.f32.vlgmr.msra.gmra.mxu1 %vm109_vm0, %v107_v3  ;;  %v4571_v23 = vld [vmem:[#allocation3 + $0x68] sm:$0xff]  ;;  %v4575_v24 = vld [vmem:[#allocation3 + $0xb8] sm:$0xff]  ;;  %v4580_v26 = vld [vmem:[#allocation3 + $0x50] sm:$0xff]  ;;  %v4668_v58 = vperm.slane %v4546_v13, 3 }
  0x16   :  { %235 = vmatpush.msra.mxu3 %v4534_v10  ;;  %216 = vmatmul.f32.vlgmr.msra.gmra.mxu2 %v5546_v17  ;;  %v4582_v27 = vld [vmem:[#allocation3 + $0x60] sm:$0xff]  ;;  %v4586_v28 = vld [vmem:[#allocation3 + $0xb0] sm:$0xff]  ;;  %v4591_v29 = vld [vmem:[#allocation3 + $0x48] sm:$0xff] }
  0x17   :  { %236 = vmatmul.f32.vlgmr.msra.gmra.mxu3 %v5546_v17  ;;  %357 = vmatpush.msrb.mxu0 %v4558_v18  ;;  %v4596_v30 = vld [vmem:[#allocation3 + $0xa8] sm:$0xff]  ;;  %v4600_v31 = vld [vmem:[#allocation3 + $0x40] sm:$0xff] }
  0x18   :  { %335 = vmatpush.msrb.mxu3 %v4549_v14  ;;  %3921 = vmatmul.msk.f32.gmra.mxu0 %vm109_vm0, %v108_v15  ;;  %v4604_v32 = vld [vmem:[#allocation3 + $0xa0] sm:$0xff] }
  0x19   :  { %191 = vrot.lane.b32.xlu0 %v189_v16, %s4443_s0  ;;  %151 = vrot.lane.b32.xlu1 %v149_v19, %s4443_s0  ;;  %v4672_v19 = vperm.slane %v4546_v13, 7 }
  0x1a   :  { %336 = vmatpush.msrb.mxu3 %v4562_v20  ;;  %358 = vmatpush.msrb.mxu0 %v4567_v21 }
  0x1b   :  { %253 = vmatpush.msrb.mxu2 %v4569_v22  ;;  %376 = vmatpush.msrb.mxu1 %v4575_v24 }
  0x1c   :  { %337 = vmatpush.msrb.mxu3 %v4571_v23  ;;  %184 = vrot.lane.b32.xlu2 %v182_v25, %s4444_s1 }
  0x1d   :  { %254 = vmatpush.msrb.mxu2 %v4580_v26  ;;  %377 = vmatpush.msrb.mxu1 %v4586_v28 }
  0x1e   :  { %338 = vmatpush.msrb.mxu3 %v4582_v27  ;;  %3923 = vmatmul.msk.f32.gmra.mxu1 %vm109_vm0, %v108_v15 }
  0x1f   :  { %339 = vmatmul.f32.vlgmr.msrb.gmra.mxu3 %v5546_v17  ;;  %255 = vmatpush.msrb.mxu2 %v4591_v29 }
  0x20   :  { %359 = vmatmul.f32.vlgmr.msrb.gmra.mxu0 %v5546_v17  ;;  %378 = vmatpush.msrb.mxu1 %v4596_v30 }
  0x21   :  { %500 = vmatpush.msra.mxu3 %v4511_v2  ;;  %256 = vmatpush.msrb.mxu2 %v4600_v31 }
  0x22   :  { %520 = vmatpush.msra.mxu0 %v4569_v22  ;;  %257 = vmatmul.f32.vlgmr.msrb.gmra.mxu2 %v5546_v17 }
  0x23   :  { %379 = vmatpush.msrb.mxu1 %v4604_v32  ;;  %480 = vmatpush.msra.mxu2 %v4509_v1 }
  0x24   :  { %501 = vmatpush.msra.mxu3 %v4519_v5  ;;  %521 = vmatpush.msra.mxu0 %v4580_v26 }
  0x25   :  { %618 = vmatpush.msra.mxu1 %v4549_v14  ;;  %481 = vmatpush.msra.mxu2 %v4517_v4 }
  0x26   :  { %502 = vmatpush.msra.mxu3 %v4526_v7  ;;  %380 = vmatmul.f32.vlgmr.msrb.gmra.mxu1 %v5546_v17 }
  0x27   :  { %522 = vmatpush.msra.mxu0 %v4591_v29  ;;  %482 = vmatpush.msra.mxu2 %v4523_v6 }
  0x28   :  { %503 = vmatpush.msra.mxu3 %v4534_v10  ;;  %619 = vmatpush.msra.mxu1 %v4562_v20 }
  0x29   :  { %523 = vmatpush.msra.mxu0 %v4600_v31  ;;  %483 = vmatpush.msra.mxu2 %v4529_v8 }
  0x2a   :  { %658 = vmatpush.msrb.mxu3 %v4575_v24  ;;  %620 = vmatpush.msra.mxu1 %v4571_v23 }
  0x2b   :  { %638 = vmatpush.msrb.mxu2 %v4531_v9  ;;  %768 = vmatpush.msrb.mxu0 %v4509_v1 }
  0x2c   :  { %659 = vmatpush.msrb.mxu3 %v4586_v28  ;;  %621 = vmatpush.msra.mxu1 %v4582_v27 }
  0x2d   :  { %639 = vmatpush.msrb.mxu2 %v4540_v12  ;;  %769 = vmatpush.msrb.mxu0 %v4517_v4 }
  0x2e   :  { %660 = vmatpush.msrb.mxu3 %v4596_v30  ;;  %788 = vmatpush.msrb.mxu1 %v4511_v2 }
  0x2f   :  { %640 = vmatpush.msrb.mxu2 %v4558_v18  ;;  %770 = vmatpush.msrb.mxu0 %v4523_v6 }
  0x30   :  { %661 = vmatpush.msrb.mxu3 %v4604_v32  ;;  %789 = vmatpush.msrb.mxu1 %v4519_v5 }
  0x31   :  { %641 = vmatpush.msrb.mxu2 %v4567_v21  ;;  %771 = vmatpush.msrb.mxu0 %v4529_v8 }
  0x32   :  { %790 = vmatpush.msrb.mxu1 %v4526_v7 }
  0x34   :  { %791 = vmatpush.msrb.mxu1 %v4534_v10 }
  0x8d   :  { %v4643_v33 = vpop.f32.mrf.mxu0 }
  0x8e   :  { %v4657_v39 = vadd.f32 %v5548_v35, %v4643_v33 }
  0x92   :  { %v4647_v36 = vpop.f32.mrf.mxu1 }
  0x93   :  { %v4652_v38 = vadd.f32 %v179_v34, %v4647_v36 }
  0x95   :  { %v4649_v37 = vpop.f32.mrf.mxu0 }
  0x99   :  { %v217_v40 = vpop.f32.mrf.mxu2 }
  0x9a   :  { %v261_v41 = vadd.f32 %v217_v40, %v4657_v39  ;;  %v237_v42 = vpop.f32.mrf.mxu3 }
  0x9b   :  { %v4660_v46 = vpop.f32.mrf.mxu1 }
  0x9c   :  { %v3924_v43 = vmul.f32 -1.442695, %v261_v41  ;;  %v4664_v47 = vadd.f32 %v179_v34, %v4660_v46 }
  0x9d   :  { %v360_v44 = vpop.f32.mrf.mxu0 }
  0x9e   :  { %4058 = vpow2.f32 %v3924_v43  ;;  %v408_v45 = vrot.slane %v360_v44, 2 }
  0xa0   :  { %409 = vrot.lane.b32.xlu2 %v408_v45, %s4444_s1 }
  0xa2   :  { %v340_v48 = vpop.f32.mrf.mxu3 }
  0xa3   :  { %v385_v49 = vrot.slane %v340_v48, 2  ;;  %v381_v40 = vpop.f32.mrf.mxu1 }
  0xa4   :  { %v4059_v50 = vpop.eup %4058  ;;  %v382_v43 = vadd.f32 %v381_v40, %v4672_v19 }
  0xa5   :  { %v265_v51 = vadd.f32 1.0, %v4059_v50  ;;  %v387_v52 = vadd.f32 %v385_v49, %v4664_v47  ;;  %v258_v60 = vpop.f32.mrf.mxu2 }
  0xa6   :  { %v259_v0 = vadd.f32 %v258_v60, %v4668_v58 }
  0xa7   :  { %4060 = vrcp.f32 %v265_v51  ;;  %v3926_v53 = vmul.f32 -1.442695, %v387_v52  ;;  %v277_v61 = vand.u32 2147483648, %v265_v51  ;;  %v275_v63 = vand.u32 2147483647, %v265_v51 }
  0xa8   :  { %vm271_vm2 = vweird.f32 %v265_v51 }
  0xa9   :  { %4062 = vpow2.f32 %v3926_v53  ;;  %v278_v11 = vor.u32 1.1754944e-38, %v277_v61  ;;  %vm276_vm4 = vcmp.eq.f32.partialorder %v275_v63, 8.507059e+37 }
  0xad   :  { %v4061_v54 = vpop.eup %4060 }
  0xae   :  { %v267_v55 = vmul.f32 %v4061_v54, %v265_v51  ;;  %vm272_vm1 = vweird.f32 %v4061_v54  ;;  %v433_v51 = vrot.slane %v382_v43, 2 }
  0xaf   :  { %v4063_v56 = vpop.eup %4062  ;;  %vm273_vm3 = vmor %vm271_vm2, %vm272_vm1  ;;  %vm457_vm1 = vcmask 254976   ;;  %vm196_vm2 = vcmask 261120  }
  0xb0   :  { %v391_v57 = vadd.f32 1.0, %v4063_v56  ;;  %v268_v59 = vsub.f32 1.0, %v267_v55  ;;  %v142_v56 = vperm.slane %v4546_v13, 1 }
  0xb2   :  { %4064 = vrcp.f32 %v391_v57  ;;  %v269_v62 = vmul.f32 %v4061_v54, %v268_v59  ;;  %v403_v45 = vand.u32 2147483648, %v391_v57  ;;  %v401_v49 = vand.u32 2147483647, %v391_v57  ;;  %v4680_v59 = vpop.permute.xlu1 %151 }
  0xb3   :  { %vm397_vm6 = vweird.f32 %v391_v57 }
  0xb4   :  { %v270_v3 = vadd.f32 %v4061_v54, %v269_v62  ;;  %v404_v52 = vor.u32 1.1754944e-38, %v403_v45  ;;  %vm402_vm8 = vcmp.eq.f32.partialorder %v401_v49, 8.507059e+37  ;;  %v4687_v62 = vpop.permute.xlu0 %191 }
  0xb5   :  { %v4693_v63 = vadd.f32 %v4687_v62, %v4660_v46 }
  0xb6   :  { %v274_v15 = vsel %vm273_vm3, %v4061_v54, %v270_v3 }
  0xb7   :  { %v279_v16 = vsel %vm276_vm4, %v278_v11, %v274_v15 }
  0xb8   :  { %v4065_v25 = vpop.eup %4064  ;;  %v305_v34 = vmul.f32 %v279_v16, %v259_v0 }
  0xb9   :  { %v393_v41 = vmul.f32 %v4065_v25, %v391_v57  ;;  %vm398_vm5 = vweird.f32 %v4065_v25  ;;  %v4684_v57 = vadd.f32 %v4680_v59, %v4643_v33 }
  0xba   :  { %307 = vrot.lane.b32.xlu1 %v305_v34, %s4443_s0  ;;  %vm399_vm7 = vmor %vm397_vm6, %vm398_vm5 }
  0xbb   :  { %v394_v44 = vsub.f32 1.0, %v393_v41 }
  0xbd   :  { %v395_v48 = vmul.f32 %v4065_v25, %v394_v44 }
  0xbf   :  { %v396_v50 = vadd.f32 %v4065_v25, %v395_v48 }
  0xc1   :  { %v400_v53 = vsel %vm399_vm7, %v4065_v25, %v396_v50  ;;  %v4699_v25 = vpop.permute.xlu2 %184 }
  0xc2   :  { %v405_v54 = vsel %vm402_vm8, %v404_v52, %v400_v53  ;;  %282 = vrot.lane.b32.xlu1 %v237_v42, %s4444_s1  ;;  %v4703_v40 = vadd.f32 %v4699_v25, %v4660_v46 }
  0xc3   :  { %v435_v55 = vmul.f32 %v433_v51, %v405_v54 }
  0xc5   :  { %437 = vrot.lane.b32.xlu0 %v435_v55, %s4443_s0 }
  0xcd   :  { %144 = vrot.lane.b32.xlu0 %v142_v56, %s4444_s1 }
  0xfa   :  { %v410_v34 = vpop.permute.xlu2 %409 }
  0xfb   :  { %v412_v41 = vadd.f32 %v410_v34, %v4703_v40 }
  0xfd   :  { %v3927_v43 = vmul.f32 -1.442695, %v412_v41 }
 0x12c   :  { %v308_v60 = vpop.permute.xlu1 %307 }
 0x12d   :  { %v310_v61 = vadd.f32 %v308_v60, %v4684_v57 }
 0x12f   :  { %4066 = vtanh.f32 %v310_v61 }
 0x134   :  { %v283_v48 = vpop.permute.xlu1 %282 }
 0x135   :  { %v4689_v42 = vpop.eup %4066 }
 0x136   :  { %v312_v0 = vsub.f32 0.0, %v4689_v42 }
 0x137   :  { %v438_v3 = vpop.permute.xlu0 %437 }
 0x138   :  { %v440_v11 = vadd.f32 %v438_v3, %v4693_v63  ;;  %314 = vrot.lane.b32.xlu0 %v312_v0, %s4445_s3 }
 0x13a   :  { %4068 = vtanh.f32 %v440_v11 }
 0x13b   :  { %4070 = vpow2.f32 %v3927_v43 }
 0x13f   :  { %v4706_v44 = vpop.permute.xlu0 %144 }
 0x140   :  { %v4069_v15 = vpop.eup %4068  ;;  %5550 = vst [vmem:[#allocation13_spill] sm:$0xff] %v4706_v44  ;;  %v4710_v45 = vadd.f32 %v4706_v44, %v4643_v33 }
 0x141   :  { %v442_v16 = vsub.f32 0.0, %v4069_v15  ;;  %v4071_v49 = vpop.eup %4070 }
 0x142   :  { %v285_v50 = vadd.f32 %v283_v48, %v4710_v45  ;;  %v416_v51 = vadd.f32 1.0, %v4071_v49 }
 0x143   :  { %444 = vrot.lane.b32.xlu2 %v442_v16, %s4445_s3 }
 0x144   :  { %v3925_v52 = vmul.f32 -1.442695, %v285_v50  ;;  %4072 = vrcp.f32 %v416_v51  ;;  %v428_v33 = vand.u32 2147483648, %v416_v51  ;;  %vm422_vm10 = vweird.f32 %v416_v51 }
 0x145   :  { %v426_v11 = vand.u32 2147483647, %v416_v51 }
 0x146   :  { %4074 = vpow2.f32 %v3925_v52  ;;  %v429_v34 = vor.u32 1.1754944e-38, %v428_v33 }
 0x147   :  { %vm427_vm12 = vcmp.eq.f32.partialorder %v426_v11, 8.507059e+37 }
 0x14a   :  { %v4073_v46 = vpop.eup %4072 }
 0x14b   :  { %v418_v55 = vmul.f32 %v4073_v46, %v416_v51  ;;  %vm423_vm9 = vweird.f32 %v4073_v46 }
 0x14c   :  { %v4075_v53 = vpop.eup %4074  ;;  %vm424_vm11 = vmor %vm422_vm10, %vm423_vm9 }
 0x14d   :  { %v289_v54 = vadd.f32 1.0, %v4075_v53  ;;  %v419_v56 = vsub.f32 1.0, %v418_v55 }
 0x14f   :  { %4076 = vrcp.f32 %v289_v54  ;;  %v420_v60 = vmul.f32 %v4073_v46, %v419_v56  ;;  %v301_v53 = vand.u32 2147483648, %v289_v54  ;;  %vm295_vm14 = vweird.f32 %v289_v54 }
 0x150   :  { %v299_v55 = vand.u32 2147483647, %v289_v54 }
 0x151   :  { %v421_v0 = vadd.f32 %v4073_v46, %v420_v60  ;;  %v302_v60 = vor.u32 1.1754944e-38, %v301_v53 }
 0x152   :  { %vm300_vm0 = vcmp.eq.f32.partialorder %v299_v55, 8.507059e+37 }
 0x153   :  { %v425_v16 = vsel %vm424_vm11, %v4073_v46, %v421_v0 }
 0x154   :  { %v430_v43 = vsel %vm427_vm12, %v429_v34, %v425_v16 }
 0x155   :  { %v4077_v61 = vpop.eup %4076 }
 0x156   :  { %v291_v3 = vmul.f32 %v4077_v61, %v289_v54  ;;  %vm296_vm13 = vweird.f32 %v4077_v61 }
 0x157   :  { %vm297_vm15 = vmor %vm295_vm14, %vm296_vm13 }
 0x158   :  { %v292_v41 = vsub.f32 1.0, %v291_v3 }
 0x15a   :  { %v293_v50 = vmul.f32 %v4077_v61, %v292_v41 }
 0x15c   :  { %v294_v52 = vadd.f32 %v4077_v61, %v293_v50 }
 0x15e   :  { %v298_v56 = vsel %vm297_vm15, %v4077_v61, %v294_v52 }
 0x15f   :  { %v303_v46 = vsel %vm300_vm0, %v302_v60, %v298_v56 }
 0x19d   :  { %v445_v48 = vpop.permute.xlu2 %444 }
 0x19e   :  { %v447_v49 = vmul.f32 %v445_v48, %v430_v43 }
 0x1a0   :  { %449 = vrot.lane.b32.xlu1 %v447_v49, %s4444_s1 }
 0x1aa   :  { %v315_v51 = vpop.permute.xlu0 %314 }
 0x1ab   :  { %v317_v0 = vmul.f32 %v315_v51, %v303_v46 }
 0x1ad   :  { %319 = vrot.lane.b32.xlu2 %v317_v0, %s4444_s1 }
 0x207   :  { %v320_v33 = vpop.permute.xlu2 %319 }
 0x208   :  { %v4716_v3 = vadd.f32 %v4689_v42, %v320_v33 }
 0x20a   :  { %454 = vrot.lane.b32.xlu1 %v4716_v3, %s4443_s0 }
 0x212   :  { %v450_v11 = vpop.permute.xlu1 %449 }
 0x213   :  { %v4720_v16 = vadd.f32 %v4069_v15, %v450_v11 }
 0x215   :  { %v601_v54 = vrot.slane %v4720_v16, 6 }
 0x217   :  { %602 = vrot.lane.b32.xlu0 %v601_v54, %s4443_s0 }
 0x27c   :  { %v455_v61 = vpop.permute.xlu1 %454 }
 0x27d   :  { %458 = vst.msk [vmem:[#allocation2] sm:$0x3] %vm457_vm1, %v455_v61  ;;  %3928 = vmatmul.msk.f32.vlgmr.msra.gmra.mxu2 %vm196_vm2, %v455_v61  ;;  %3929 = vmatmul.msk.f32.vlgmr.msra.gmra.mxu3 %vm196_vm2, %v455_v61 }
 0x27e   :  { %3930 = vmatmul.msk.f32.vlgmr.msra.gmra.mxu0 %vm196_vm2, %v455_v61  ;;  %906 = vmatpush.msra.mxu3 %v4549_v14 }
 0x27f   :  { %808 = vmatpush.msra.mxu2 %v4569_v22  ;;  %926 = vmatpush.msra.mxu0 %v4531_v9 }
 0x280   :  { %907 = vmatpush.msra.mxu3 %v4562_v20 }
 0x281   :  { %809 = vmatpush.msra.mxu2 %v4580_v26  ;;  %927 = vmatpush.msra.mxu0 %v4540_v12 }
 0x282   :  { %908 = vmatpush.msra.mxu3 %v4571_v23 }
 0x283   :  { %810 = vmatpush.msra.mxu2 %v4591_v29  ;;  %928 = vmatpush.msra.mxu0 %v4558_v18 }
 0x284   :  { %909 = vmatpush.msra.mxu3 %v4582_v27 }
 0x285   :  { %811 = vmatpush.msra.mxu2 %v4600_v31  ;;  %929 = vmatpush.msra.mxu0 %v4567_v21 }
 0x289   :  { %v603_v42 = vpop.permute.xlu0 %602 }
 0x28a   :  { %3933 = vmatmul.msk.f32.vlgmr.msra.gmra.mxu1 %vm196_vm2, %v603_v42  ;;  %3934 = vmatmul.msk.f32.vlgmr.msrb.gmra.mxu2 %vm196_vm2, %v603_v42 }
 0x28b   :  { %3935 = vmatmul.msk.f32.vlgmr.msrb.gmra.mxu3 %vm196_vm2, %v603_v42  ;;  %946 = vmatpush.msra.mxu1 %v4575_v24 }
 0x28c   :  { %1054 = vmatpush.msrb.mxu2 %v4509_v1  ;;  %1074 = vmatpush.msrb.mxu3 %v4511_v2 }
 0x28d   :  { %947 = vmatpush.msra.mxu1 %v4586_v28 }
 0x28e   :  { %1055 = vmatpush.msrb.mxu2 %v4517_v4  ;;  %1075 = vmatpush.msrb.mxu3 %v4519_v5 }
 0x28f   :  { %948 = vmatpush.msra.mxu1 %v4596_v30 }
 0x290   :  { %1056 = vmatpush.msrb.mxu2 %v4523_v6  ;;  %1076 = vmatpush.msrb.mxu3 %v4526_v7 }
 0x291   :  { %949 = vmatpush.msra.mxu1 %v4604_v32 }
 0x292   :  { %1057 = vmatpush.msrb.mxu2 %v4529_v8  ;;  %1077 = vmatpush.msrb.mxu3 %v4534_v10 }
 0x2fb   :  { %v525_v54 = vpop.f32.mrf.mxu0 }
 0x300   :  { %v485_v15 = vpop.f32.mrf.mxu2  ;;  %v505_v33 = vpop.f32.mrf.mxu3 }
 0x301   :  { %v529_v34 = vrot.slane %v485_v15, 6  ;;  %v526_v15 = vadd.f32 %v525_v54, %v4668_v58 }
 0x303   :  { %v531_v41 = vadd.f32 %v529_v34, %v4657_v39 }
 0x305   :  { %v3931_v43 = vmul.f32 -1.442695, %v531_v41 }
 0x307   :  { %4078 = vpow2.f32 %v3931_v43  ;;  %v623_v48 = vpop.f32.mrf.mxu1 }
 0x308   :  { %v667_v49 = vrot.slane %v623_v48, 4 }
 0x30a   :  { %v669_v50 = vadd.f32 %v667_v49, %v4664_v47 }
 0x30c   :  { %v3936_v52 = vmul.f32 -1.442695, %v669_v50 }
 0x30d   :  { %v4079_v53 = vpop.eup %4078  ;;  %v643_v55 = vpop.f32.mrf.mxu2 }
 0x30e   :  { %v535_v56 = vadd.f32 1.0, %v4079_v53  ;;  %4080 = vpow2.f32 %v3936_v52  ;;  %v690_v60 = vrot.slane %v643_v55, 4  ;;  %v663_v48 = vpop.f32.mrf.mxu3  ;;  %v577_v53 = vrot.slane %v526_v15, 6 }
 0x310   :  { %4082 = vrcp.f32 %v535_v56  ;;  %691 = vrot.lane.b32.xlu1 %v690_v60, %s4444_s1  ;;  %v547_v42 = vand.u32 2147483648, %v535_v56  ;;  %v545_v41 = vand.u32 2147483647, %v535_v56  ;;  %vm541_vm4 = vweird.f32 %v535_v56 }
 0x312   :  { %v548_v52 = vor.u32 1.1754944e-38, %v547_v42  ;;  %vm546_vm6 = vcmp.eq.f32.partialorder %v545_v41, 8.507059e+37  ;;  %v552_v41 = vrot.slane %v505_v33, 6 }
 0x314   :  { %v4081_v51 = vpop.eup %4080 }
 0x315   :  { %v673_v46 = vadd.f32 1.0, %v4081_v51  ;;  %v664_v51 = vadd.f32 %v663_v48, %v4672_v19 }
 0x316   :  { %v4083_v0 = vpop.eup %4082 }
 0x317   :  { %4084 = vrcp.f32 %v673_v46  ;;  %v537_v11 = vmul.f32 %v4083_v0, %v535_v56  ;;  %vm542_vm3 = vweird.f32 %v4083_v0  ;;  %v683_v54 = vand.u32 2147483647, %v673_v46 }
 0x318   :  { %vm543_vm5 = vmor %vm541_vm4, %vm542_vm3  ;;  %vm679_vm8 = vweird.f32 %v673_v46  ;;  %v715_v42 = vrot.slane %v664_v51, 4 }
 0x319   :  { %v538_v61 = vsub.f32 1.0, %v537_v11  ;;  %v685_v11 = vand.u32 2147483648, %v673_v46  ;;  %vm684_vm10 = vcmp.eq.f32.partialorder %v683_v54, 8.507059e+37 }
 0x31b   :  { %v539_v34 = vmul.f32 %v4083_v0, %v538_v61  ;;  %v686_v56 = vor.u32 1.1754944e-38, %v685_v11 }
 0x31d   :  { %v4085_v43 = vpop.eup %4084  ;;  %v540_v50 = vadd.f32 %v4083_v0, %v539_v34 }
 0x31e   :  { %v675_v49 = vmul.f32 %v4085_v43, %v673_v46  ;;  %vm680_vm7 = vweird.f32 %v4085_v43 }
 0x31f   :  { %v544_v60 = vsel %vm543_vm5, %v4083_v0, %v540_v50  ;;  %vm681_vm9 = vmor %vm679_vm8, %vm680_vm7 }
 0x320   :  { %v676_v55 = vsub.f32 1.0, %v675_v49  ;;  %v549_v17 = vsel %vm546_vm6, %v548_v52, %v544_v60 }
 0x321   :  { %v579_v61 = vmul.f32 %v577_v53, %v549_v17 }
 0x322   :  { %v677_v35 = vmul.f32 %v4085_v43, %v676_v55 }
 0x323   :  { %581 = vrot.lane.b32.xlu0 %v579_v61, %s4443_s0 }
 0x324   :  { %v678_v44 = vadd.f32 %v4085_v43, %v677_v35 }
 0x326   :  { %v682_v34 = vsel %vm681_vm9, %v4085_v43, %v678_v44 }
 0x327   :  { %v687_v15 = vsel %vm684_vm10, %v686_v56, %v682_v34 }
 0x328   :  { %v717_v0 = vmul.f32 %v715_v42, %v687_v15 }
 0x32a   :  { %719 = vrot.lane.b32.xlu2 %v717_v0, %s4443_s0 }
 0x332   :  { %553 = vrot.lane.b32.xlu2 %v552_v41, %s4444_s1 }
 0x382   :  { %v692_v60 = vpop.permute.xlu1 %691 }
 0x383   :  { %v694_v51 = vadd.f32 %v692_v60, %v4703_v40 }
 0x384   :  { %v720_v48 = vpop.permute.xlu2 %719 }
 0x385   :  { %v722_v49 = vadd.f32 %v720_v48, %v4693_v63  ;;  %v3937_v11 = vmul.f32 -1.442695, %v694_v51 }
 0x387   :  { %4086 = vtanh.f32 %v722_v49 }
 0x38c   :  { %v554_v61 = vpop.permute.xlu2 %553 }
 0x38d   :  { %v4087_v17 = vpop.eup %4086  ;;  %v556_v34 = vadd.f32 %v554_v61, %v4710_v45 }
 0x38e   :  { %v725_v35 = vrot.slane %v4087_v17, 6 }
 0x38f   :  { %v3932_v42 = vmul.f32 -1.442695, %v556_v34 }
 0x390   :  { %v727_v46 = vsub.f32 %v4720_v16, %v725_v35 }
 0x392   :  { %v729_v50 = vrot.slane %v727_v46, 2 }
 0x394   :  { %730 = vrot.lane.b32.xlu0 %v729_v50, %s4445_s3 }
 0x395   :  { %v582_v44 = vpop.permute.xlu0 %581 }
 0x396   :  { %v584_v43 = vadd.f32 %v582_v44, %v4684_v57 }
 0x398   :  { %4088 = vtanh.f32 %v584_v43 }
 0x399   :  { %4090 = vpow2.f32 %v3937_v11 }
 0x39e   :  { %v4089_v52 = vpop.eup %4088 }
 0x39f   :  { %v587_v53 = vrot.slane %v4089_v52, 2  ;;  %v4091_v54 = vpop.eup %4090 }
 0x3a0   :  { %v698_v56 = vadd.f32 1.0, %v4091_v54 }
 0x3a1   :  { %v589_v33 = vsub.f32 %v4716_v3, %v587_v53 }
 0x3a2   :  { %4092 = vrcp.f32 %v698_v56  ;;  %v710_v46 = vand.u32 2147483648, %v698_v56  ;;  %vm704_vm12 = vweird.f32 %v698_v56  ;;  %v708_v44 = vand.u32 2147483647, %v698_v56 }
 0x3a3   :  { %v591_v55 = vrot.slane %v589_v33, 6  ;;  %4094 = vpow2.f32 %v3932_v42 }
 0x3a4   :  { %v711_v53 = vor.u32 1.1754944e-38, %v710_v46  ;;  %vm709_vm14 = vcmp.eq.f32.partialorder %v708_v44, 8.507059e+37 }
 0x3a5   :  { %592 = vrot.lane.b32.xlu1 %v591_v55, %s4445_s3 }
 0x3a8   :  { %v4093_v15 = vpop.eup %4092 }
 0x3a9   :  { %v700_v0 = vmul.f32 %v4093_v15, %v698_v56  ;;  %v4095_v41 = vpop.eup %4094  ;;  %vm705_vm11 = vweird.f32 %v4093_v15 }
 0x3aa   :  { %v560_v3 = vadd.f32 1.0, %v4095_v41  ;;  %vm706_vm13 = vmor %vm704_vm12, %vm705_vm11 }
 0x3ab   :  { %v701_v48 = vsub.f32 1.0, %v700_v0 }
 0x3ac   :  { %4096 = vrcp.f32 %v560_v3  ;;  %v572_v34 = vand.u32 2147483648, %v560_v3  ;;  %vm566_vm0 = vweird.f32 %v560_v3  ;;  %v570_v42 = vand.u32 2147483647, %v560_v3 }
 0x3ad   :  { %v702_v49 = vmul.f32 %v4093_v15, %v701_v48 }
 0x3ae   :  { %v573_v56 = vor.u32 1.1754944e-38, %v572_v34  ;;  %vm571_vm4 = vcmp.eq.f32.partialorder %v570_v42, 8.507059e+37 }
 0x3af   :  { %v703_v35 = vadd.f32 %v4093_v15, %v702_v49 }
 0x3b1   :  { %v707_v43 = vsel %vm706_vm13, %v4093_v15, %v703_v35 }
 0x3b2   :  { %v4097_v50 = vpop.eup %4096  ;;  %v712_v55 = vsel %vm709_vm14, %v711_v53, %v707_v43 }
 0x3b3   :  { %v562_v33 = vmul.f32 %v4097_v50, %v560_v3  ;;  %vm567_vm15 = vweird.f32 %v4097_v50 }
 0x3b4   :  { %vm568_vm3 = vmor %vm566_vm0, %vm567_vm15 }
 0x3b5   :  { %v563_v11 = vsub.f32 1.0, %v562_v33 }
 0x3b7   :  { %v564_v54 = vmul.f32 %v4097_v50, %v563_v11 }
 0x3b9   :  { %v565_v61 = vadd.f32 %v4097_v50, %v564_v54 }
 0x3bb   :  { %v569_v0 = vsel %vm568_vm3, %v4097_v50, %v565_v61 }
 0x3bc   :  { %v574_v15 = vsel %vm571_vm4, %v573_v56, %v569_v0 }
 0x406   :  { %v731_v60 = vpop.permute.xlu0 %730 }
 0x407   :  { %v733_v51 = vmul.f32 %v731_v60, %v712_v55 }
 0x409   :  { %735 = vrot.lane.b32.xlu2 %v733_v51, %s4444_s1 }
 0x417   :  { %v593_v41 = vpop.permute.xlu1 %592 }
 0x418   :  { %v595_v48 = vmul.f32 %v593_v41, %v574_v15 }
 0x41a   :  { %597 = vrot.lane.b32.xlu0 %v595_v48, %s4444_s1 }
 0x463   :  { %v736_v49 = vpop.permute.xlu2 %735 }
 0x464   :  { %v4773_v35 = vadd.f32 %v4087_v17, %v736_v49 }
 0x466   :  { %v889_v46 = vrot.slane %v4773_v35, 4 }
 0x468   :  { %890 = vrot.lane.b32.xlu1 %v889_v46, %s4443_s0 }
 0x48c   :  { %v598_v44 = vpop.permute.xlu0 %597 }
 0x48d   :  { %v4777_v43 = vadd.f32 %v4089_v52, %v598_v44 }
 0x48f   :  { %v751_v3 = vrot.slane %v4777_v43, 2 }
 0x491   :  { %752 = vrot.lane.b32.xlu2 %v751_v3, %s4443_s0 }
 0x4da   :  { %v891_v50 = vpop.permute.xlu1 %890 }
 0x4db   :  { %3943 = vmatmul.msk.f32.vlgmr.msra.gmra.mxu3 %vm196_vm2, %v891_v50 }
 0x4dc   :  { %1232 = vmatpush.msra.mxu3 %v4575_v24 }
 0x4de   :  { %1233 = vmatpush.msra.mxu3 %v4586_v28 }
 0x4e0   :  { %1234 = vmatpush.msra.mxu3 %v4596_v30 }
 0x4e2   :  { %1235 = vmatpush.msra.mxu3 %v4604_v32 }
 0x4eb   :  { %v753_v17 = vpop.permute.xlu2 %752 }
 0x4ec   :  { %3938 = vmatmul.msk.f32.vlgmr.msrb.gmra.mxu0 %vm196_vm2, %v753_v17  ;;  %3939 = vmatmul.msk.f32.vlgmr.msrb.gmra.mxu1 %vm196_vm2, %v753_v17 }
 0x4ed   :  { %3940 = vmatmul.msk.f32.vlgmr.msra.gmra.mxu2 %vm196_vm2, %v753_v17  ;;  %1192 = vmatpush.msrb.mxu1 %v4549_v14 }
 0x4ee   :  { %1094 = vmatpush.msrb.mxu0 %v4569_v22  ;;  %1212 = vmatpush.msra.mxu2 %v4531_v9 }
 0x4ef   :  { %1193 = vmatpush.msrb.mxu1 %v4562_v20 }
 0x4f0   :  { %1095 = vmatpush.msrb.mxu0 %v4580_v26  ;;  %1213 = vmatpush.msra.mxu2 %v4540_v12 }
 0x4f1   :  { %1194 = vmatpush.msrb.mxu1 %v4571_v23 }
 0x4f2   :  { %1096 = vmatpush.msrb.mxu0 %v4591_v29  ;;  %1214 = vmatpush.msra.mxu2 %v4558_v18 }
 0x4f3   :  { %1195 = vmatpush.msrb.mxu1 %v4582_v27 }
 0x4f4   :  { %3944 = vmatmul.msk.f32.vlgmr.msra.gmra.mxu0 %vm196_vm2, %v891_v50  ;;  %3945 = vmatmul.msk.f32.vlgmr.msra.gmra.mxu1 %vm196_vm2, %v891_v50 }
 0x4f5   :  { %1097 = vmatpush.msrb.mxu0 %v4600_v31  ;;  %1215 = vmatpush.msra.mxu2 %v4567_v21 }
 0x4f6   :  { %1353 = vmatpush.msra.mxu1 %v4511_v2 }
 0x4f7   :  { %1333 = vmatpush.msra.mxu0 %v4509_v1 }
 0x4f8   :  { %1354 = vmatpush.msra.mxu1 %v4519_v5 }
 0x4f9   :  { %1334 = vmatpush.msra.mxu0 %v4517_v4 }
 0x4fa   :  { %1355 = vmatpush.msra.mxu1 %v4526_v7 }
 0x4fb   :  { %1335 = vmatpush.msra.mxu0 %v4523_v6 }
 0x4fc   :  { %1356 = vmatpush.msra.mxu1 %v4534_v10 }
 0x4fd   :  { %1336 = vmatpush.msra.mxu0 %v4529_v8 }
 0x55e   :  { %v911_v9 = vpop.f32.mrf.mxu3 }
 0x55f   :  { %v955_v12 = vrot.slane %v911_v9, 6 }
 0x561   :  { %v957_v14 = vadd.f32 %v955_v12, %v4664_v47 }
 0x563   :  { %v3946_v18 = vmul.f32 -1.442695, %v957_v14 }
 0x565   :  { %4098 = vpow2.f32 %v3946_v18 }
 0x569   :  { %v773_v1 = vpop.f32.mrf.mxu0  ;;  %v793_v21 = vpop.f32.mrf.mxu1 }
 0x56a   :  { %v817_v2 = vrot.slane %v773_v1, 4  ;;  %v840_v48 = vrot.slane %v793_v21, 4 }
 0x56b   :  { %v4099_v20 = vpop.eup %4098 }
 0x56c   :  { %v961_v4 = vadd.f32 1.0, %v4099_v20  ;;  %v819_v5 = vadd.f32 %v817_v2, %v4657_v39 }
 0x56e   :  { %4100 = vrcp.f32 %v961_v4  ;;  %v3941_v6 = vmul.f32 -1.442695, %v819_v5  ;;  %v973_v28 = vand.u32 2147483648, %v961_v4  ;;  %v971_v31 = vand.u32 2147483647, %v961_v4 }
 0x56f   :  { %vm967_vm6 = vweird.f32 %v961_v4 }
 0x570   :  { %4102 = vpow2.f32 %v3941_v6  ;;  %v974_v52 = vor.u32 1.1754944e-38, %v973_v28  ;;  %vm972_vm8 = vcmp.eq.f32.partialorder %v971_v31, 8.507059e+37  ;;  %v813_v54 = vpop.f32.mrf.mxu2 }
 0x571   :  { %v931_v7 = vpop.f32.mrf.mxu0  ;;  %v951_v26 = vpop.f32.mrf.mxu1  ;;  %v814_v42 = vadd.f32 %v813_v54, %v4668_v58 }
 0x572   :  { %v978_v8 = vrot.slane %v931_v7, 6  ;;  %v952_v29 = vadd.f32 %v951_v26, %v4672_v19 }
 0x573   :  { %v865_v46 = vrot.slane %v814_v42, 4 }
 0x574   :  { %v4101_v22 = vpop.eup %4100  ;;  %979 = vrot.lane.b32.xlu2 %v978_v8, %s4444_s1  ;;  %v1003_v33 = vrot.slane %v952_v29, 6 }
 0x575   :  { %v963_v10 = vmul.f32 %v4101_v22, %v961_v4  ;;  %vm968_vm5 = vweird.f32 %v4101_v22 }
 0x576   :  { %v4103_v23 = vpop.eup %4102  ;;  %vm969_vm7 = vmor %vm967_vm6, %vm968_vm5 }
 0x577   :  { %v823_v24 = vadd.f32 1.0, %v4103_v23  ;;  %v964_v27 = vsub.f32 1.0, %v963_v10 }
 0x579   :  { %4104 = vrcp.f32 %v823_v24  ;;  %v965_v30 = vmul.f32 %v4101_v22, %v964_v27  ;;  %v835_v34 = vand.u32 2147483648, %v823_v24  ;;  %v833_v56 = vand.u32 2147483647, %v823_v24 }
 0x57a   :  { %vm829_vm10 = vweird.f32 %v823_v24 }
 0x57b   :  { %v966_v32 = vadd.f32 %v4101_v22, %v965_v30  ;;  %v836_v41 = vor.u32 1.1754944e-38, %v835_v34  ;;  %vm834_vm12 = vcmp.eq.f32.partialorder %v833_v56, 8.507059e+37 }
 0x57d   :  { %v970_v53 = vsel %vm969_vm7, %v4101_v22, %v966_v32 }
 0x57e   :  { %v975_v60 = vsel %vm972_vm8, %v974_v52, %v970_v53 }
 0x57f   :  { %v4105_v55 = vpop.eup %4104  ;;  %v1005_v11 = vmul.f32 %v1003_v33, %v975_v60 }
 0x580   :  { %v825_v51 = vmul.f32 %v4105_v55, %v823_v24  ;;  %vm830_vm9 = vweird.f32 %v4105_v55 }
 0x581   :  { %1007 = vrot.lane.b32.xlu0 %v1005_v11, %s4443_s0  ;;  %vm831_vm11 = vmor %vm829_vm10, %vm830_vm9 }
 0x582   :  { %v826_v61 = vsub.f32 1.0, %v825_v51 }
 0x584   :  { %v827_v0 = vmul.f32 %v4105_v55, %v826_v61 }
 0x586   :  { %v828_v15 = vadd.f32 %v4105_v55, %v827_v0 }
 0x588   :  { %v832_v49 = vsel %vm831_vm11, %v4105_v55, %v828_v15 }
 0x589   :  { %v837_v44 = vsel %vm834_vm12, %v836_v41, %v832_v49  ;;  %841 = vrot.lane.b32.xlu0 %v840_v48, %s4444_s1 }
 0x58a   :  { %v867_v3 = vmul.f32 %v865_v46, %v837_v44 }
 0x58c   :  { %869 = vrot.lane.b32.xlu1 %v867_v3, %s4443_s0 }
 0x5ce   :  { %v980_v22 = vpop.permute.xlu2 %979 }
 0x5cf   :  { %v982_v10 = vadd.f32 %v980_v22, %v4703_v40  ;;  %v4866_v22 = vld [vmem:[#allocation3 + $0x50] sm:$0xff] }
 0x5d1   :  { %v3947_v24 = vmul.f32 -1.442695, %v982_v10  ;;  %v4869_v10 = vld [vmem:[#allocation3 + $0x70] sm:$0xff] }
 0x5f3   :  { %v1008_v50 = vpop.permute.xlu0 %1007 }
 0x5f4   :  { %v1010_v17 = vadd.f32 %v1008_v50, %v4693_v63 }
 0x5f6   :  { %4106 = vtanh.f32 %v1010_v17 }
 0x5fb   :  { %v842_v6 = vpop.permute.xlu0 %841 }
 0x5fc   :  { %v4820_v9 = vpop.eup %4106  ;;  %v844_v7 = vadd.f32 %v842_v6, %v4710_v45  ;;  %v4857_v6 = vld [vmem:[#allocation3 + $0x58] sm:$0xff] }
 0x5fd   :  { %v1013_v14 = vrot.slane %v4820_v9, 6 }
 0x5fe   :  { %v870_v12 = vpop.permute.xlu1 %869  ;;  %v3942_v8 = vmul.f32 -1.442695, %v844_v7  ;;  %v4860_v7 = vld [vmem:[#allocation3 + $0x78] sm:$0xff] }
 0x5ff   :  { %v872_v18 = vadd.f32 %v870_v12, %v4684_v57  ;;  %v1015_v1 = vsub.f32 %v4773_v35, %v1013_v14 }
 0x601   :  { %4108 = vtanh.f32 %v872_v18  ;;  %v1017_v2 = vrot.slane %v1015_v1, 2 }
 0x602   :  { %4110 = vpow2.f32 %v3942_v8  ;;  %v4863_v8 = vld [vmem:[#allocation3 + $0x98] sm:$0xff] }
 0x603   :  { %1018 = vrot.lane.b32.xlu1 %v1017_v2, %s4445_s3  ;;  %4112 = vpow2.f32 %v3947_v24  ;;  %v4875_v24 = vld [vmem:[#allocation3 + $0x48] sm:$0xff] }
 0x607   :  { %v4109_v20 = vpop.eup %4108 }
 0x608   :  { %v875_v4 = vrot.slane %v4109_v20, 2  ;;  %v4111_v23 = vpop.eup %4110 }
 0x609   :  { %v848_v26 = vadd.f32 1.0, %v4111_v23  ;;  %v4113_v27 = vpop.eup %4112  ;;  %v4872_v23 = vld [vmem:[#allocation3 + $0x90] sm:$0xff] }
 0x60a   :  { %v877_v5 = vsub.f32 %v4777_v43, %v875_v4  ;;  %v986_v29 = vadd.f32 1.0, %v4113_v27  ;;  %v4842_v4 = vld [vmem:[#allocation3 + $0xb8] sm:$0xff]  ;;  %v4881_v27 = vld [vmem:[#allocation3 + $0x88] sm:$0xff] }
 0x60b   :  { %4114 = vrcp.f32 %v848_v26  ;;  %v860_v33 = vand.u32 2147483648, %v848_v26  ;;  %vm854_vm14 = vweird.f32 %v848_v26  ;;  %v858_v60 = vand.u32 2147483647, %v848_v26 }
 0x60c   :  { %v879_v21 = vrot.slane %v877_v5, 6  ;;  %4116 = vrcp.f32 %v986_v29  ;;  %v998_v15 = vand.u32 2147483648, %v986_v29  ;;  %vm992_vm4 = vweird.f32 %v986_v29  ;;  %v4848_v5 = vld [vmem:[#allocation3 + $0xa8] sm:$0xff] }
 0x60d   :  { %v861_v11 = vor.u32 1.1754944e-38, %v860_v33  ;;  %vm859_vm0 = vcmp.eq.f32.partialorder %v858_v60, 8.507059e+37  ;;  %v996_v41 = vand.u32 2147483647, %v986_v29  ;;  %v4907_v33 = vld [vmem:[#allocation3 + $0x8] sm:$0xff]  ;;  %v4913_v60 = vld [vmem:[#allocation3] sm:$0xff] }
 0x60e   :  { %880 = vrot.lane.b32.xlu2 %v879_v21, %s4445_s3  ;;  %v999_v49 = vor.u32 1.1754944e-38, %v998_v15 }
 0x60f   :  { %vm997_vm6 = vcmp.eq.f32.partialorder %v996_v41, 8.507059e+37 }
 0x611   :  { %v4115_v28 = vpop.eup %4114 }
 0x612   :  { %v850_v30 = vmul.f32 %v4115_v28, %v848_v26  ;;  %v4117_v52 = vpop.eup %4116  ;;  %vm855_vm13 = vweird.f32 %v4115_v28  ;;  %v4878_v26 = vld [vmem:[#allocation3 + $0x68] sm:$0xff] }
 0x613   :  { %v988_v55 = vmul.f32 %v4117_v52, %v986_v29  ;;  %vm856_vm15 = vmor %vm854_vm14, %vm855_vm13  ;;  %vm993_vm3 = vweird.f32 %v4117_v52  ;;  %v4889_v29 = vld [vmem:[#allocation3 + $0x60] sm:$0xff] }
 0x614   :  { %v851_v31 = vsub.f32 1.0, %v850_v30  ;;  %vm994_vm5 = vmor %vm992_vm4, %vm993_vm3  ;;  %v4892_v30 = vld [vmem:[#allocation3 + $0x80] sm:$0xff] }
 0x615   :  { %v989_v54 = vsub.f32 1.0, %v988_v55  ;;  %v4910_v55 = vld [vmem:[#allocation3 + $0x28] sm:$0xff] }
 0x616   :  { %v852_v32 = vmul.f32 %v4115_v28, %v851_v31  ;;  %v4895_v31 = vld [vmem:[#allocation3 + $0x18] sm:$0xff] }
 0x617   :  { %v990_v0 = vmul.f32 %v4117_v52, %v989_v54 }
 0x618   :  { %v853_v53 = vadd.f32 %v4115_v28, %v852_v32  ;;  %v4898_v32 = vld [vmem:[#allocation3 + $0x38] sm:$0xff] }
 0x619   :  { %v991_v56 = vadd.f32 %v4117_v52, %v990_v0 }
 0x61a   :  { %v857_v51 = vsel %vm856_vm15, %v4115_v28, %v853_v53  ;;  %v4884_v28 = vld [vmem:[#allocation3 + $0x40] sm:$0xff]  ;;  %v4904_v53 = vld [vmem:[#allocation3 + $0x30] sm:$0xff] }
 0x61b   :  { %v862_v61 = vsel %vm859_vm0, %v861_v11, %v857_v51  ;;  %v995_v48 = vsel %vm994_vm5, %v4117_v52, %v991_v56  ;;  %v4901_v52 = vld [vmem:[#allocation3 + $0x10] sm:$0xff]  ;;  %v4916_v51 = vld [vmem:[#allocation3 + $0x20] sm:$0xff] }
 0x61c   :  { %v1000_v46 = vsel %vm997_vm6, %v999_v49, %v995_v48 }
 0x668   :  { %v881_v34 = vpop.permute.xlu2 %880 }
 0x669   :  { %v883_v42 = vmul.f32 %v881_v34, %v862_v61 }
 0x66b   :  { %885 = vrot.lane.b32.xlu1 %v883_v42, %s4444_s1 }
 0x675   :  { %v1019_v44 = vpop.permute.xlu1 %1018 }
 0x676   :  { %v1021_v3 = vmul.f32 %v1019_v44, %v1000_v46 }
 0x678   :  { %1023 = vrot.lane.b32.xlu0 %v1021_v3, %s4444_s1 }
 0x6dd   :  { %v886_v50 = vpop.permute.xlu1 %885 }
 0x6de   :  { %v4832_v17 = vadd.f32 %v4109_v20, %v886_v50  ;;  %v4845_v20 = vld [vmem:[#allocation3 + $0xb0] sm:$0xff] }
 0x6e0   :  { %v1037_v12 = vrot.slane %v4832_v17, 4 }
 0x6e2   :  { %1038 = vrot.lane.b32.xlu0 %v1037_v12, %s4443_s0 }
 0x6ea   :  { %v1024_v14 = vpop.permute.xlu0 %1023 }
 0x6eb   :  { %v4837_v18 = vadd.f32 %v4820_v9, %v1024_v14  ;;  %v4851_v9 = vld [vmem:[#allocation3 + $0xa0] sm:$0xff] }
 0x6ed   :  { %v1175_v1 = vrot.slane %v4837_v18, 2 }
 0x6ef   :  { %1176 = vrot.lane.b32.xlu2 %v1175_v1, %s4443_s0 }
 0x749   :  { %v1177_v2 = vpop.permute.xlu2 %1176 }
 0x74a   :  { %3953 = vmatmul.msk.f32.vlgmr.msrb.gmra.mxu1 %vm196_vm2, %v1177_v2 }
 0x74b   :  { %1501 = vmatpush.msrb.mxu1 %v4842_v4 }
 0x74d   :  { %1502 = vmatpush.msrb.mxu1 %v4845_v20 }
 0x74f   :  { %1503 = vmatpush.msrb.mxu1 %v4848_v5 }
 0x751   :  { %1504 = vmatpush.msrb.mxu1 %v4851_v9 }
 0x754   :  { %v1039_v21 = vpop.permute.xlu0 %1038 }
 0x755   :  { %3948 = vmatmul.msk.f32.vlgmr.msrb.gmra.mxu2 %vm196_vm2, %v1039_v21  ;;  %3949 = vmatmul.msk.f32.vlgmr.msrb.gmra.mxu3 %vm196_vm2, %v1039_v21 }
 0x756   :  { %3950 = vmatmul.msk.f32.vlgmr.msrb.gmra.mxu0 %vm196_vm2, %v1039_v21  ;;  %1373 = vmatpush.msrb.mxu2 %v4857_v6 }
 0x757   :  { %1461 = vmatpush.msrb.mxu3 %v4860_v7  ;;  %1481 = vmatpush.msrb.mxu0 %v4863_v8 }
 0x758   :  { %1374 = vmatpush.msrb.mxu2 %v4866_v22 }
 0x759   :  { %1462 = vmatpush.msrb.mxu3 %v4869_v10  ;;  %1482 = vmatpush.msrb.mxu0 %v4872_v23 }
 0x75a   :  { %1375 = vmatpush.msrb.mxu2 %v4875_v24 }
 0x75b   :  { %1463 = vmatpush.msrb.mxu3 %v4878_v26  ;;  %1483 = vmatpush.msrb.mxu0 %v4881_v27 }
 0x75c   :  { %1376 = vmatpush.msrb.mxu2 %v4884_v28 }
 0x75d   :  { %3954 = vmatmul.msk.f32.vlgmr.msra.gmra.mxu2 %vm196_vm2, %v1177_v2  ;;  %3955 = vmatmul.msk.f32.vlgmr.msra.gmra.mxu3 %vm196_vm2, %v1177_v2 }
 0x75e   :  { %1464 = vmatpush.msrb.mxu3 %v4889_v29  ;;  %1484 = vmatpush.msrb.mxu0 %v4892_v30 }
 0x75f   :  { %1606 = vmatpush.msra.mxu2 %v4895_v31 }
 0x760   :  { %1626 = vmatpush.msra.mxu3 %v4898_v32 }
 0x761   :  { %1607 = vmatpush.msra.mxu2 %v4901_v52 }
 0x762   :  { %1627 = vmatpush.msra.mxu3 %v4904_v53 }
 0x763   :  { %1608 = vmatpush.msra.mxu2 %v4907_v33 }
 0x764   :  { %1628 = vmatpush.msra.mxu3 %v4910_v55 }
 0x765   :  { %1609 = vmatpush.msra.mxu2 %v4913_v60 }
 0x766   :  { %1629 = vmatpush.msra.mxu3 %v4916_v51 }
 0x7c7   :  { %v1197_v11 = vpop.f32.mrf.mxu1 }
 0x7c8   :  { %v1240_v54 = vadd.f32 %v1197_v11, %v4664_v47 }
 0x7ca   :  { %v3956_v61 = vmul.f32 -1.442695, %v1240_v54 }
 0x7cc   :  { %4118 = vpow2.f32 %v3956_v61 }
 0x7d2   :  { %v4119_v34 = vpop.eup %4118 }
 0x7d3   :  { %v1244_v42 = vadd.f32 1.0, %v4119_v34 }
 0x7d5   :  { %4120 = vrcp.f32 %v1244_v42  ;;  %v1256_v3 = vand.u32 2147483648, %v1244_v42  ;;  %v1254_v47 = vand.u32 2147483647, %v1244_v42  ;;  %vm1250_vm8 = vweird.f32 %v1244_v42 }
 0x7d7   :  { %v1257_v2 = vor.u32 1.1754944e-38, %v1256_v3  ;;  %vm1255_vm10 = vcmp.eq.f32.partialorder %v1254_v47, 8.507059e+37 }
 0x7d8   :  { %v1059_v0 = vpop.f32.mrf.mxu2  ;;  %v1079_v56 = vpop.f32.mrf.mxu3 }
 0x7d9   :  { %v1103_v15 = vrot.slane %v1059_v0, 2 }
 0x7db   :  { %v4121_v41 = vpop.eup %4120  ;;  %v1105_v48 = vadd.f32 %v1103_v15, %v4657_v39  ;;  %v1126_v15 = vrot.slane %v1079_v56, 2 }
 0x7dc   :  { %v1246_v49 = vmul.f32 %v4121_v41, %v1244_v42  ;;  %vm1251_vm7 = vweird.f32 %v4121_v41 }
 0x7dd   :  { %v3951_v46 = vmul.f32 -1.442695, %v1105_v48  ;;  %vm1252_vm9 = vmor %vm1250_vm8, %vm1251_vm7 }
 0x7de   :  { %v1247_v44 = vsub.f32 1.0, %v1246_v49  ;;  %v1099_v49 = vpop.f32.mrf.mxu0 }
 0x7df   :  { %4122 = vpow2.f32 %v3951_v46 }
 0x7e0   :  { %v1217_v50 = vpop.f32.mrf.mxu2  ;;  %v1248_v12 = vmul.f32 %v4121_v41, %v1247_v44  ;;  %v1237_v14 = vpop.f32.mrf.mxu3  ;;  %v1100_v44 = vadd.f32 %v1099_v49, %v4668_v58 }
 0x7e1   :  { %1261 = vrot.lane.b32.xlu0 %v1217_v50, %s4444_s1  ;;  %v1238_v21 = vadd.f32 %v1237_v14, %v4672_v19 }
 0x7e2   :  { %v1249_v1 = vadd.f32 %v4121_v41, %v1248_v12  ;;  %v1151_v47 = vrot.slane %v1100_v44, 2 }
 0x7e4   :  { %v1253_v11 = vsel %vm1252_vm9, %v4121_v41, %v1249_v1 }
 0x7e5   :  { %v4123_v39 = vpop.eup %4122  ;;  %v1258_v54 = vsel %vm1255_vm10, %v1257_v2, %v1253_v11 }
 0x7e6   :  { %v1109_v61 = vadd.f32 1.0, %v4123_v39  ;;  %v1284_v34 = vmul.f32 %v1258_v54, %v1238_v21 }
 0x7e8   :  { %4124 = vrcp.f32 %v1109_v61  ;;  %1286 = vrot.lane.b32.xlu1 %v1284_v34, %s4443_s0  ;;  %v1121_v46 = vand.u32 2147483648, %v1109_v61  ;;  %v1119_v41 = vand.u32 2147483647, %v1109_v61  ;;  %vm1115_vm12 = vweird.f32 %v1109_v61 }
 0x7ea   :  { %v1122_v12 = vor.u32 1.1754944e-38, %v1121_v46  ;;  %vm1120_vm14 = vcmp.eq.f32.partialorder %v1119_v41, 8.507059e+37 }
 0x7ee   :  { %v4125_v0 = vpop.eup %4124 }
 0x7ef   :  { %v1111_v48 = vmul.f32 %v4125_v0, %v1109_v61  ;;  %vm1116_vm11 = vweird.f32 %v4125_v0 }
 0x7f0   :  { %1127 = vrot.lane.b32.xlu1 %v1126_v15, %s4444_s1  ;;  %vm1117_vm13 = vmor %vm1115_vm12, %vm1116_vm11 }
 0x7f1   :  { %v1112_v42 = vsub.f32 1.0, %v1111_v48 }
 0x7f3   :  { %v1113_v3 = vmul.f32 %v4125_v0, %v1112_v42 }
 0x7f5   :  { %v1114_v50 = vadd.f32 %v4125_v0, %v1113_v3 }
 0x7f7   :  { %v1118_v14 = vsel %vm1117_vm13, %v4125_v0, %v1114_v50 }
 0x7f8   :  { %v1123_v1 = vsel %vm1120_vm14, %v1122_v12, %v1118_v14 }
 0x7f9   :  { %v1153_v56 = vmul.f32 %v1151_v47, %v1123_v1 }
 0x7fb   :  { %1155 = vrot.lane.b32.xlu2 %v1153_v56, %s4443_s0 }
 0x855   :  { %v1156_v2 = vpop.permute.xlu2 %1155 }
 0x856   :  { %v1158_v21 = vadd.f32 %v1156_v2, %v4684_v57  ;;  %v1262_v57 = vpop.permute.xlu0 %1261 }
 0x857   :  { %v1264_v46 = vadd.f32 %v1262_v57, %v4703_v40 }
 0x858   :  { %4126 = vtanh.f32 %v1158_v21 }
 0x859   :  { %v3957_v44 = vmul.f32 -1.442695, %v1264_v46 }
 0x85a   :  { %v1287_v11 = vpop.permute.xlu1 %1286 }
 0x85b   :  { %v1289_v39 = vadd.f32 %v1287_v11, %v4693_v63 }
 0x85d   :  { %4128 = vtanh.f32 %v1289_v39 }
 0x85e   :  { %v4127_v54 = vpop.eup %4126  ;;  %4130 = vpow2.f32 %v3957_v44 }
 0x85f   :  { %v1161_v34 = vrot.slane %v4127_v54, 2 }
 0x861   :  { %v1163_v61 = vsub.f32 %v4832_v17, %v1161_v34 }
 0x862   :  { %v1128_v41 = vpop.permute.xlu1 %1127 }
 0x863   :  { %v4129_v15 = vpop.eup %4128  ;;  %v1165_v48 = vrot.slane %v1163_v61, 6  ;;  %v1130_v50 = vadd.f32 %v1128_v41, %v4710_v45 }
 0x864   :  { %v1292_v0 = vrot.slane %v4129_v15, 6  ;;  %v4131_v63 = vpop.eup %4130 }
 0x865   :  { %1166 = vrot.lane.b32.xlu0 %v1165_v48, %s4445_s3  ;;  %v1268_v3 = vadd.f32 1.0, %v4131_v63  ;;  %v3952_v12 = vmul.f32 -1.442695, %v1130_v50 }
 0x866   :  { %v1294_v49 = vsub.f32 %v4837_v18, %v1292_v0 }
 0x867   :  { %4132 = vrcp.f32 %v1268_v3  ;;  %v1280_v40 = vand.u32 2147483648, %v1268_v3  ;;  %vm1274_vm0 = vweird.f32 %v1268_v3  ;;  %v1278_v39 = vand.u32 2147483647, %v1268_v3 }
 0x868   :  { %v1296_v42 = vrot.slane %v1294_v49, 2  ;;  %4134 = vpow2.f32 %v3952_v12 }
 0x869   :  { %v1281_v48 = vor.u32 1.1754944e-38, %v1280_v40  ;;  %vm1279_vm4 = vcmp.eq.f32.partialorder %v1278_v39, 8.507059e+37 }
 0x86a   :  { %1297 = vrot.lane.b32.xlu2 %v1296_v42, %s4445_s3 }
 0x86d   :  { %v4133_v47 = vpop.eup %4132 }
 0x86e   :  { %v1270_v14 = vmul.f32 %v4133_v47, %v1268_v3  ;;  %v4135_v1 = vpop.eup %4134  ;;  %vm1275_vm15 = vweird.f32 %v4133_v47 }
 0x86f   :  { %v1134_v2 = vadd.f32 1.0, %v4135_v1  ;;  %vm1276_vm3 = vmor %vm1274_vm0, %vm1275_vm15 }
 0x870   :  { %v1271_v56 = vsub.f32 1.0, %v1270_v14 }
 0x871   :  { %4136 = vrcp.f32 %v1134_v2  ;;  %v1146_v63 = vand.u32 2147483648, %v1134_v2  ;;  %vm1140_vm6 = vweird.f32 %v1134_v2  ;;  %v1144_v41 = vand.u32 2147483647, %v1134_v2 }
 0x872   :  { %v1272_v21 = vmul.f32 %v4133_v47, %v1271_v56 }
 0x873   :  { %v1147_v50 = vor.u32 1.1754944e-38, %v1146_v63  ;;  %vm1145_vm8 = vcmp.eq.f32.partialorder %v1144_v41, 8.507059e+37 }
 0x874   :  { %v1273_v11 = vadd.f32 %v4133_v47, %v1272_v21 }
 0x876   :  { %v1277_v34 = vsel %vm1276_vm3, %v4133_v47, %v1273_v11 }
 0x877   :  { %v4137_v61 = vpop.eup %4136  ;;  %v1282_v45 = vsel %vm1279_vm4, %v1281_v48, %v1277_v34 }
 0x878   :  { %v1136_v42 = vmul.f32 %v4137_v61, %v1134_v2  ;;  %vm1141_vm5 = vweird.f32 %v4137_v61 }
 0x879   :  { %vm1142_vm7 = vmor %vm1140_vm6, %vm1141_vm5 }
 0x87a   :  { %v1137_v57 = vsub.f32 1.0, %v1136_v42 }
 0x87c   :  { %v1138_v46 = vmul.f32 %v4137_v61, %v1137_v57 }
 0x87e   :  { %v1139_v44 = vadd.f32 %v4137_v61, %v1138_v46 }
 0x880   :  { %v1143_v3 = vsel %vm1142_vm7, %v4137_v61, %v1139_v44 }
 0x881   :  { %v1148_v12 = vsel %vm1145_vm8, %v1147_v50, %v1143_v3 }
 0x8c4   :  { %v1298_v0 = vpop.permute.xlu2 %1297 }
 0x8c5   :  { %v1300_v49 = vmul.f32 %v1298_v0, %v1282_v45 }
 0x8c7   :  { %1302 = vrot.lane.b32.xlu1 %v1300_v49, %s4444_s1 }
 0x8d7   :  { %v1167_v47 = vpop.permute.xlu0 %1166 }
 0x8d8   :  { %v1169_v14 = vmul.f32 %v1167_v47, %v1148_v12 }
 0x8da   :  { %1171 = vrot.lane.b32.xlu2 %v1169_v14, %s4444_s1 }
 0x934   :  { %v1172_v1 = vpop.permute.xlu2 %1171 }
 0x935   :  { %v4937_v56 = vadd.f32 %v4127_v54, %v1172_v1  ;;  %v5551_v54 = vperm.slane %v4546_v13, 0 }
 0x937   :  { %v1316_v21 = vrot.slane %v4937_v56, 6 }
 0x939   :  { %v1303_v11 = vpop.permute.xlu1 %1302  ;;  %1317 = vrot.lane.b32.xlu1 %v1316_v21, %s4443_s0 }
 0x93a   :  { %v4940_v40 = vadd.f32 %v4129_v15, %v1303_v11  ;;  %v4979_v15 = vadd.f32 %v5551_v54, %v4649_v37 }
 0x93c   :  { %1312 = vrot.lane.b32.xlu0 %v4940_v40, %s4443_s0 }
 0x9ab   :  { %v1318_v2 = vpop.permute.xlu1 %1317 }
 0x9ac   :  { %3958 = vmatmul.msk.f32.vlgmr.msra.gmra.mxu0 %vm196_vm2, %v1318_v2  ;;  %3959 = vmatmul.msk.f32.vlgmr.msra.gmra.mxu1 %vm196_vm2, %v1318_v2 }
 0x9ad   :  { %3960 = vmatmul.msk.f32.vlgmr.msrb.gmra.mxu2 %vm196_vm2, %v1318_v2  ;;  %1744 = vmatpush.msra.mxu1 %v4860_v7 }
 0x9ae   :  { %v1313_v39 = vpop.permute.xlu0 %1312  ;;  %1646 = vmatpush.msra.mxu0 %v4857_v6  ;;  %1764 = vmatpush.msrb.mxu2 %v4863_v8 }
 0x9af   :  { %1315 = vst.msk [vmem:[#allocation2 + $0x18] sm:$0x3] %vm457_vm1, %v1313_v39  ;;  %3963 = vmatmul.msk.f32.vlgmr.msrb.gmra.mxu3 %vm196_vm2, %v1313_v39  ;;  %1745 = vmatpush.msra.mxu1 %v4869_v10 }
 0x9b0   :  { %1647 = vmatpush.msra.mxu0 %v4866_v22  ;;  %1784 = vmatpush.msrb.mxu3 %v4842_v4 }
 0x9b1   :  { %1746 = vmatpush.msra.mxu1 %v4878_v26  ;;  %1765 = vmatpush.msrb.mxu2 %v4872_v23 }
 0x9b2   :  { %1648 = vmatpush.msra.mxu0 %v4875_v24  ;;  %1785 = vmatpush.msrb.mxu3 %v4845_v20 }
 0x9b3   :  { %1747 = vmatpush.msra.mxu1 %v4889_v29  ;;  %1766 = vmatpush.msrb.mxu2 %v4881_v27 }
 0x9b4   :  { %3964 = vmatmul.msk.f32.vlgmr.msrb.gmra.mxu0 %vm196_vm2, %v1313_v39  ;;  %3965 = vmatmul.msk.f32.vlgmr.msrb.gmra.mxu1 %vm196_vm2, %v1313_v39 }
 0x9b5   :  { %1649 = vmatpush.msra.mxu0 %v4884_v28  ;;  %1786 = vmatpush.msrb.mxu3 %v4848_v5 }
 0x9b6   :  { %1767 = vmatpush.msrb.mxu2 %v4892_v30  ;;  %1912 = vmatpush.msrb.mxu1 %v4898_v32 }
 0x9b7   :  { %1892 = vmatpush.msrb.mxu0 %v4895_v31  ;;  %1787 = vmatpush.msrb.mxu3 %v4851_v9 }
 0x9b8   :  { %1913 = vmatpush.msrb.mxu1 %v4904_v53 }
 0x9b9   :  { %1893 = vmatpush.msrb.mxu0 %v4901_v52 }
 0x9ba   :  { %1914 = vmatpush.msrb.mxu1 %v4910_v55 }
 0x9bb   :  { %1894 = vmatpush.msrb.mxu0 %v4907_v33 }
 0x9bc   :  { %1915 = vmatpush.msrb.mxu1 %v4916_v51 }
 0x9bd   :  { %1895 = vmatpush.msrb.mxu0 %v4913_v60 }
 0xa29   :  { %v1338_v34 = vpop.f32.mrf.mxu0  ;;  %v1358_v50 = vpop.f32.mrf.mxu1 }
 0xa2a   :  { %v1381_v61 = vadd.f32 %v1338_v34, %v4979_v15 }
 0xa2c   :  { %v3961_v48 = vmul.f32 -1.442695, %v1381_v61 }
 0xa2e   :  { %4138 = vpow2.f32 %v3961_v48 }
 0xa30   :  { %v1378_v11 = vpop.f32.mrf.mxu2 }
 0xa31   :  { %v1486_v0 = vpop.f32.mrf.mxu0  ;;  %v1379_v54 = vadd.f32 %v1378_v11, %v4668_v58 }
 0xa32   :  { %v1466_v45 = vpop.f32.mrf.mxu3  ;;  %v1533_v42 = vrot.slane %v1486_v0, 2 }
 0xa33   :  { %v1510_v49 = vrot.slane %v1466_v45, 2 }
 0xa34   :  { %v4139_v57 = vpop.eup %4138  ;;  %1534 = vrot.lane.b32.xlu1 %v1533_v42, %s4444_s1 }
 0xa35   :  { %v1512_v46 = vadd.f32 %v1510_v49, %v4652_v38  ;;  %v1385_v44 = vadd.f32 1.0, %v4139_v57  ;;  %v1506_v49 = vpop.f32.mrf.mxu1 }
 0xa37   :  { %v3966_v63 = vmul.f32 -1.442695, %v1512_v46  ;;  %4140 = vrcp.f32 %v1385_v44  ;;  %v1397_v14 = vand.u32 2147483648, %v1385_v44  ;;  %v1395_v21 = vand.u32 2147483647, %v1385_v44 }
 0xa38   :  { %vm1391_vm10 = vweird.f32 %v1385_v44  ;;  %v1507_v46 = vadd.f32 %v1506_v49, %v4672_v19 }
 0xa39   :  { %4142 = vpow2.f32 %v3966_v63  ;;  %v1398_v39 = vor.u32 1.1754944e-38, %v1397_v14  ;;  %vm1396_vm12 = vcmp.eq.f32.partialorder %v1395_v21, 8.507059e+37  ;;  %v4991_v21 = vadd.f32 %v4687_v62, %v4647_v36 }
 0xa3d   :  { %v4141_v13 = vpop.eup %4140 }
 0xa3e   :  { %v1387_v3 = vmul.f32 %v4141_v13, %v1385_v44  ;;  %vm1392_vm9 = vweird.f32 %v4141_v13 }
 0xa3f   :  { %v4143_v41 = vpop.eup %4142  ;;  %vm1393_vm11 = vmor %vm1391_vm10, %vm1392_vm9 }
 0xa40   :  { %v1516_v12 = vadd.f32 1.0, %v4143_v41  ;;  %v1388_v47 = vsub.f32 1.0, %v1387_v3 }
 0xa42   :  { %4144 = vrcp.f32 %v1516_v12  ;;  %v1389_v1 = vmul.f32 %v4141_v13, %v1388_v47  ;;  %v1528_v57 = vand.u32 2147483648, %v1516_v12  ;;  %v1526_v44 = vand.u32 2147483647, %v1516_v12 }
 0xa43   :  { %vm1522_vm14 = vweird.f32 %v1516_v12  ;;  %v1558_v47 = vrot.slane %v1507_v46, 2 }
 0xa44   :  { %v1390_v2 = vadd.f32 %v4141_v13, %v1389_v1  ;;  %v1529_v3 = vor.u32 1.1754944e-38, %v1528_v57  ;;  %vm1527_vm0 = vcmp.eq.f32.partialorder %v1526_v44, 8.507059e+37 }
 0xa46   :  { %v1394_v34 = vsel %vm1393_vm11, %v4141_v13, %v1390_v2 }
 0xa47   :  { %v1399_v48 = vsel %vm1396_vm12, %v1398_v39, %v1394_v34  ;;  %v5000_v34 = vadd.f32 %v4680_v59, %v4649_v37 }
 0xa48   :  { %v4145_v61 = vpop.eup %4144  ;;  %v1425_v45 = vmul.f32 %v1399_v48, %v1379_v54 }
 0xa49   :  { %v1518_v0 = vmul.f32 %v4145_v61, %v1516_v12  ;;  %vm1523_vm13 = vweird.f32 %v4145_v61 }
 0xa4a   :  { %1427 = vrot.lane.b32.xlu0 %v1425_v45, %s4443_s0  ;;  %vm1524_vm15 = vmor %vm1522_vm14, %vm1523_vm13 }
 0xa4b   :  { %v1519_v42 = vsub.f32 1.0, %v1518_v0 }
 0xa4d   :  { %v1520_v63 = vmul.f32 %v4145_v61, %v1519_v42 }
 0xa4f   :  { %v1521_v41 = vadd.f32 %v4145_v61, %v1520_v63  ;;  %v5552_v63 = vld [vmem:[#allocation13_spill] sm:$0xff] }
 0xa50   :  { %v5013_v44 = vadd.f32 %v5552_v63, %v4649_v37 }
 0xa51   :  { %v1525_v13 = vsel %vm1524_vm15, %v4145_v61, %v1521_v41 }
 0xa52   :  { %v1530_v14 = vsel %vm1527_vm0, %v1529_v3, %v1525_v13 }
 0xa53   :  { %v1560_v1 = vmul.f32 %v1558_v47, %v1530_v14 }
 0xa55   :  { %1562 = vrot.lane.b32.xlu2 %v1560_v1, %s4443_s0 }
 0xa5d   :  { %1402 = vrot.lane.b32.xlu2 %v1358_v50, %s4444_s1 }
 0xaa6   :  { %v1535_v42 = vpop.permute.xlu1 %1534 }
 0xaaf   :  { %v1563_v11 = vpop.permute.xlu2 %1562 }
 0xab0   :  { %v1565_v2 = vadd.f32 %v1563_v11, %v4991_v21 }
 0xab2   :  { %4146 = vtanh.f32 %v1565_v2 }
 0xab7   :  { %v1403_v46 = vpop.permute.xlu2 %1402 }
 0xab8   :  { %v4994_v12 = vpop.eup %4146  ;;  %v1405_v3 = vadd.f32 %v1403_v46, %v5013_v44 }
 0xab9   :  { %v1568_v39 = vrot.slane %v4994_v12, 6 }
 0xaba   :  { %v3962_v47 = vmul.f32 -1.442695, %v1405_v3 }
 0xabb   :  { %v1570_v54 = vsub.f32 %v4940_v40, %v1568_v39  ;;  %v5008_v40 = vadd.f32 %v4699_v25, %v4647_v36 }
 0xabc   :  { %v1428_v61 = vpop.permute.xlu0 %1427 }
 0xabd   :  { %v1572_v50 = vrot.slane %v1570_v54, 2  ;;  %v1430_v48 = vadd.f32 %v1428_v61, %v5000_v34  ;;  %v1537_v59 = vadd.f32 %v1535_v42, %v5008_v40 }
 0xabf   :  { %1573 = vrot.lane.b32.xlu0 %v1572_v50, %s4445_s3  ;;  %4148 = vtanh.f32 %v1430_v48  ;;  %v3967_v57 = vmul.f32 -1.442695, %v1537_v59 }
 0xac1   :  { %4150 = vpow2.f32 %v3967_v57 }
 0xac5   :  { %v4149_v62 = vpop.eup %4148 }
 0xac6   :  { %v1433_v45 = vrot.slane %v4149_v62, 2 }
 0xac7   :  { %v4151_v41 = vpop.eup %4150 }
 0xac8   :  { %v1435_v0 = vsub.f32 %v4937_v56, %v1433_v45  ;;  %v1541_v13 = vadd.f32 1.0, %v4151_v41 }
 0xaca   :  { %v1437_v49 = vrot.slane %v1435_v0, 6  ;;  %4152 = vrcp.f32 %v1541_v13  ;;  %v1553_v61 = vand.u32 2147483648, %v1541_v13  ;;  %vm1547_vm4 = vweird.f32 %v1541_v13 }
 0xacb   :  { %4154 = vpow2.f32 %v3962_v47  ;;  %v1551_v37 = vand.u32 2147483647, %v1541_v13 }
 0xacc   :  { %1438 = vrot.lane.b32.xlu1 %v1437_v49, %s4445_s3  ;;  %v1554_v45 = vor.u32 1.1754944e-38, %v1553_v61 }
 0xacd   :  { %vm1552_vm6 = vcmp.eq.f32.partialorder %v1551_v37, 8.507059e+37 }
 0xad0   :  { %v4153_v14 = vpop.eup %4152 }
 0xad1   :  { %v4155_v1 = vpop.eup %4154  ;;  %v1543_v36 = vmul.f32 %v4153_v14, %v1541_v13  ;;  %vm1548_vm3 = vweird.f32 %v4153_v14 }
 0xad2   :  { %v1409_v25 = vadd.f32 1.0, %v4155_v1  ;;  %vm1549_vm5 = vmor %vm1547_vm4, %vm1548_vm3 }
 0xad3   :  { %v1544_v11 = vsub.f32 1.0, %v1543_v36 }
 0xad4   :  { %4156 = vrcp.f32 %v1409_v25  ;;  %v1421_v63 = vand.u32 2147483648, %v1409_v25  ;;  %vm1415_vm8 = vweird.f32 %v1409_v25  ;;  %v1419_v41 = vand.u32 2147483647, %v1409_v25 }
 0xad5   :  { %v1545_v2 = vmul.f32 %v4153_v14, %v1544_v11 }
 0xad6   :  { %v1422_v13 = vor.u32 1.1754944e-38, %v1421_v63  ;;  %vm1420_vm10 = vcmp.eq.f32.partialorder %v1419_v41, 8.507059e+37 }
 0xad7   :  { %v1546_v54 = vadd.f32 %v4153_v14, %v1545_v2 }
 0xad9   :  { %v1550_v48 = vsel %vm1549_vm5, %v4153_v14, %v1546_v54 }
 0xada   :  { %v4157_v39 = vpop.eup %4156  ;;  %v1555_v49 = vsel %vm1552_vm6, %v1554_v45, %v1550_v48 }
 0xadb   :  { %v1411_v50 = vmul.f32 %v4157_v39, %v1409_v25  ;;  %vm1416_vm7 = vweird.f32 %v4157_v39 }
 0xadc   :  { %vm1417_vm9 = vmor %vm1415_vm8, %vm1416_vm7 }
 0xadd   :  { %v1412_v0 = vsub.f32 1.0, %v1411_v50 }
 0xadf   :  { %v1413_v57 = vmul.f32 %v4157_v39, %v1412_v0 }
 0xae1   :  { %v1414_v46 = vadd.f32 %v4157_v39, %v1413_v57 }
 0xae3   :  { %v1418_v3 = vsel %vm1417_vm9, %v4157_v39, %v1414_v46 }
 0xae4   :  { %v1423_v47 = vsel %vm1420_vm10, %v1422_v13, %v1418_v3 }
 0xb31   :  { %v1574_v42 = vpop.permute.xlu0 %1573 }
 0xb32   :  { %v1576_v59 = vmul.f32 %v1574_v42, %v1555_v49 }
 0xb34   :  { %1578 = vrot.lane.b32.xlu2 %v1576_v59, %s4444_s1 }
 0xb3e   :  { %v1439_v14 = vpop.permute.xlu1 %1438 }
 0xb3f   :  { %v1441_v1 = vmul.f32 %v1439_v14, %v1423_v47 }
 0xb41   :  { %1443 = vrot.lane.b32.xlu0 %v1441_v1, %s4444_s1 }
 0xb8e   :  { %v1579_v36 = vpop.permute.xlu2 %1578 }
 0xb8f   :  { %v5019_v11 = vadd.f32 %v4994_v12, %v1579_v36 }
 0xb91   :  { %v1727_v2 = vrot.slane %v5019_v11, 6 }
 0xb93   :  { %1728 = vrot.lane.b32.xlu1 %v1727_v2, %s4443_s0 }
 0xbb3   :  { %v1444_v54 = vpop.permute.xlu0 %1443 }
 0xbb4   :  { %v5023_v61 = vadd.f32 %v4149_v62, %v1444_v54 }
 0xbb6   :  { %1583 = vrot.lane.b32.xlu2 %v5023_v61, %s4443_s0 }
 0xc05   :  { %v1729_v25 = vpop.permute.xlu1 %1728 }
 0xc06   :  { %3973 = vmatmul.msk.f32.vlgmr.msra.gmra.mxu1 %vm196_vm2, %v1729_v25 }
 0xc07   :  { %2070 = vmatpush.msra.mxu1 %v4842_v4 }
 0xc09   :  { %2071 = vmatpush.msra.mxu1 %v4845_v20 }
 0xc0b   :  { %2072 = vmatpush.msra.mxu1 %v4848_v5 }
 0xc0d   :  { %2073 = vmatpush.msra.mxu1 %v4851_v9 }
 0xc10   :  { %v1584_v12 = vpop.permute.xlu2 %1583 }
 0xc11   :  { %1586 = vst.msk [vmem:[#allocation2 + $0x8] sm:$0x3] %vm457_vm1, %v1584_v12  ;;  %3968 = vmatmul.msk.f32.vlgmr.msra.gmra.mxu2 %vm196_vm2, %v1584_v12  ;;  %3969 = vmatmul.msk.f32.vlgmr.msra.gmra.mxu3 %vm196_vm2, %v1584_v12 }
 0xc12   :  { %3970 = vmatmul.msk.f32.vlgmr.msra.gmra.mxu0 %vm196_vm2, %v1584_v12  ;;  %2030 = vmatpush.msra.mxu3 %v4860_v7 }
 0xc13   :  { %1932 = vmatpush.msra.mxu2 %v4857_v6  ;;  %2050 = vmatpush.msra.mxu0 %v4863_v8 }
 0xc14   :  { %2031 = vmatpush.msra.mxu3 %v4869_v10 }
 0xc15   :  { %1933 = vmatpush.msra.mxu2 %v4866_v22  ;;  %2051 = vmatpush.msra.mxu0 %v4872_v23 }
 0xc16   :  { %2032 = vmatpush.msra.mxu3 %v4878_v26 }
 0xc17   :  { %1934 = vmatpush.msra.mxu2 %v4875_v24  ;;  %2052 = vmatpush.msra.mxu0 %v4881_v27 }
 0xc18   :  { %2033 = vmatpush.msra.mxu3 %v4889_v29 }
 0xc19   :  { %3974 = vmatmul.msk.f32.vlgmr.msrb.gmra.mxu2 %vm196_vm2, %v1729_v25  ;;  %3975 = vmatmul.msk.f32.vlgmr.msrb.gmra.mxu3 %vm196_vm2, %v1729_v25 }
 0xc1a   :  { %1935 = vmatpush.msra.mxu2 %v4884_v28  ;;  %2053 = vmatpush.msra.mxu0 %v4892_v30 }
 0xc1b   :  { %2198 = vmatpush.msrb.mxu3 %v4898_v32 }
 0xc1c   :  { %2178 = vmatpush.msrb.mxu2 %v4895_v31 }
 0xc1d   :  { %2199 = vmatpush.msrb.mxu3 %v4904_v53 }
 0xc1e   :  { %2179 = vmatpush.msrb.mxu2 %v4901_v52 }
 0xc1f   :  { %2200 = vmatpush.msrb.mxu3 %v4910_v55 }
 0xc20   :  { %2180 = vmatpush.msrb.mxu2 %v4907_v33 }
 0xc21   :  { %2201 = vmatpush.msrb.mxu3 %v4916_v51 }
 0xc22   :  { %2181 = vmatpush.msrb.mxu2 %v4913_v60 }
 0xc83   :  { %v1749_v62 = vpop.f32.mrf.mxu1 }
 0xc84   :  { %v1793_v39 = vrot.slane %v1749_v62, 4 }
 0xc86   :  { %v1795_v37 = vadd.f32 %v1793_v39, %v4652_v38 }
 0xc88   :  { %v3976_v50 = vmul.f32 -1.442695, %v1795_v37 }
 0xc8a   :  { %4158 = vpow2.f32 %v3976_v50 }
 0xc8f   :  { %v1651_v62 = vpop.f32.mrf.mxu0 }
 0xc90   :  { %v4159_v31 = vpop.eup %4158  ;;  %v1652_v50 = vadd.f32 %v1651_v62, %v4668_v58 }
 0xc91   :  { %v1799_v32 = vadd.f32 1.0, %v4159_v31 }
 0xc93   :  { %4160 = vrcp.f32 %v1799_v32  ;;  %v1809_v42 = vand.u32 2147483647, %v1799_v32  ;;  %v1811_v59 = vand.u32 2147483648, %v1799_v32  ;;  %vm1805_vm12 = vweird.f32 %v1799_v32 }
 0xc94   :  { %v1611_v52 = vpop.f32.mrf.mxu2  ;;  %v1631_v48 = vpop.f32.mrf.mxu3 }
 0xc95   :  { %v1655_v53 = vrot.slane %v1611_v52, 6  ;;  %v1812_v3 = vor.u32 1.1754944e-38, %v1811_v59  ;;  %vm1810_vm14 = vcmp.eq.f32.partialorder %v1809_v42, 8.507059e+37  ;;  %v1678_v25 = vrot.slane %v1631_v48, 6 }
 0xc97   :  { %v1657_v33 = vadd.f32 %v1655_v53, %v4979_v15 }
 0xc99   :  { %v4161_v45 = vpop.eup %4160  ;;  %v3971_v55 = vmul.f32 -1.442695, %v1657_v33  ;;  %v1703_v33 = vrot.slane %v1652_v50, 6 }
 0xc9a   :  { %v1801_v0 = vmul.f32 %v4161_v45, %v1799_v32  ;;  %vm1806_vm11 = vweird.f32 %v4161_v45 }
 0xc9b   :  { %4162 = vpow2.f32 %v3971_v55  ;;  %vm1807_vm13 = vmor %vm1805_vm12, %vm1806_vm11 }
 0xc9c   :  { %v1802_v60 = vsub.f32 1.0, %v1801_v0  ;;  %v1769_v51 = vpop.f32.mrf.mxu2  ;;  %v1789_v49 = vpop.f32.mrf.mxu3 }
 0xc9d   :  { %v1816_v57 = vrot.slane %v1769_v51, 4  ;;  %v1790_v46 = vadd.f32 %v1789_v49, %v4672_v19 }
 0xc9e   :  { %v1803_v63 = vmul.f32 %v4161_v45, %v1802_v60 }
 0xc9f   :  { %1817 = vrot.lane.b32.xlu2 %v1816_v57, %s4444_s1  ;;  %v1841_v14 = vrot.slane %v1790_v46, 4 }
 0xca0   :  { %v1804_v41 = vadd.f32 %v4161_v45, %v1803_v63 }
 0xca1   :  { %v4163_v13 = vpop.eup %4162 }
 0xca2   :  { %v1808_v47 = vsel %vm1807_vm13, %v4161_v45, %v1804_v41  ;;  %v1661_v1 = vadd.f32 1.0, %v4163_v13 }
 0xca3   :  { %v1813_v36 = vsel %vm1810_vm14, %v1812_v3, %v1808_v47 }
 0xca4   :  { %v1843_v2 = vmul.f32 %v1841_v14, %v1813_v36  ;;  %4164 = vrcp.f32 %v1661_v1  ;;  %v1673_v37 = vand.u32 2147483648, %v1661_v1  ;;  %v1671_v32 = vand.u32 2147483647, %v1661_v1 }
 0xca5   :  { %vm1667_vm0 = vweird.f32 %v1661_v1 }
 0xca6   :  { %1845 = vrot.lane.b32.xlu0 %v1843_v2, %s4443_s0  ;;  %v1674_v53 = vor.u32 1.1754944e-38, %v1673_v37  ;;  %vm1672_vm4 = vcmp.eq.f32.partialorder %v1671_v32, 8.507059e+37 }
 0xcaa   :  { %v4165_v54 = vpop.eup %4164 }
 0xcab   :  { %v1663_v12 = vmul.f32 %v4165_v54, %v1661_v1  ;;  %vm1668_vm15 = vweird.f32 %v4165_v54 }
 0xcac   :  { %vm1669_vm3 = vmor %vm1667_vm0, %vm1668_vm15 }
 0xcad   :  { %v1664_v39 = vsub.f32 1.0, %v1663_v12 }
 0xcae   :  { %1679 = vrot.lane.b32.xlu0 %v1678_v25, %s4444_s1 }
 0xcaf   :  { %v1665_v31 = vmul.f32 %v4165_v54, %v1664_v39 }
 0xcb1   :  { %v1666_v52 = vadd.f32 %v4165_v54, %v1665_v31 }
 0xcb3   :  { %v1670_v45 = vsel %vm1669_vm3, %v4165_v54, %v1666_v52 }
 0xcb4   :  { %v1675_v55 = vsel %vm1672_vm4, %v1674_v53, %v1670_v45 }
 0xcb5   :  { %v1705_v48 = vmul.f32 %v1703_v33, %v1675_v55 }
 0xcb7   :  { %1707 = vrot.lane.b32.xlu1 %v1705_v48, %s4443_s0 }
 0xcf9   :  { %v1818_v1 = vpop.permute.xlu2 %1817 }
 0xcfa   :  { %v1820_v2 = vadd.f32 %v1818_v1, %v5008_v40 }
 0xcfc   :  { %v3977_v54 = vmul.f32 -1.442695, %v1820_v2 }
 0xd18   :  { %v1846_v0 = vpop.permute.xlu0 %1845 }
 0xd19   :  { %v1848_v60 = vadd.f32 %v1846_v0, %v4991_v21 }
 0xd1b   :  { %4166 = vtanh.f32 %v1848_v60 }
 0xd20   :  { %v1680_v47 = vpop.permute.xlu0 %1679 }
 0xd21   :  { %v5067_v51 = vpop.eup %4166  ;;  %v1682_v14 = vadd.f32 %v1680_v47, %v5013_v44 }
 0xd22   :  { %v1851_v49 = vrot.slane %v5067_v51, 6 }
 0xd23   :  { %v3972_v36 = vmul.f32 -1.442695, %v1682_v14 }
 0xd24   :  { %v1853_v42 = vsub.f32 %v5019_v11, %v1851_v49 }
 0xd26   :  { %v1855_v59 = vrot.slane %v1853_v42, 2 }
 0xd28   :  { %1856 = vrot.lane.b32.xlu1 %v1855_v59, %s4445_s3 }
 0xd29   :  { %v1708_v57 = vpop.permute.xlu1 %1707 }
 0xd2a   :  { %v1710_v46 = vadd.f32 %v1708_v57, %v5000_v34 }
 0xd2c   :  { %4168 = vtanh.f32 %v1710_v46 }
 0xd2d   :  { %4170 = vpow2.f32 %v3972_v36 }
 0xd2e   :  { %4172 = vpow2.f32 %v3977_v54 }
 0xd32   :  { %v4169_v63 = vpop.eup %4168 }
 0xd33   :  { %v1713_v41 = vrot.slane %v4169_v63, 2  ;;  %v4171_v25 = vpop.eup %4170 }
 0xd34   :  { %v1686_v12 = vadd.f32 1.0, %v4171_v25  ;;  %v4173_v62 = vpop.eup %4172 }
 0xd35   :  { %v1715_v3 = vsub.f32 %v5023_v61, %v1713_v41  ;;  %v1824_v39 = vadd.f32 1.0, %v4173_v62 }
 0xd36   :  { %4174 = vrcp.f32 %v1686_v12  ;;  %v1698_v45 = vand.u32 2147483648, %v1686_v12  ;;  %vm1692_vm6 = vweird.f32 %v1686_v12  ;;  %v1696_v55 = vand.u32 2147483647, %v1686_v12 }
 0xd37   :  { %v1717_v13 = vrot.slane %v1715_v3, 6  ;;  %4176 = vrcp.f32 %v1824_v39  ;;  %v1836_v57 = vand.u32 2147483648, %v1824_v39  ;;  %vm1830_vm10 = vweird.f32 %v1824_v39 }
 0xd38   :  { %v1699_v60 = vor.u32 1.1754944e-38, %v1698_v45  ;;  %vm1697_vm8 = vcmp.eq.f32.partialorder %v1696_v55, 8.507059e+37  ;;  %v1834_v41 = vand.u32 2147483647, %v1824_v39 }
 0xd39   :  { %1718 = vrot.lane.b32.xlu2 %v1717_v13, %s4445_s3  ;;  %v1837_v13 = vor.u32 1.1754944e-38, %v1836_v57 }
 0xd3a   :  { %vm1835_vm12 = vcmp.eq.f32.partialorder %v1834_v41, 8.507059e+37 }
 0xd3c   :  { %v4175_v37 = vpop.eup %4174 }
 0xd3d   :  { %v1688_v61 = vmul.f32 %v4175_v37, %v1686_v12  ;;  %v4177_v50 = vpop.eup %4176  ;;  %vm1693_vm5 = vweird.f32 %v4175_v37 }
 0xd3e   :  { %v1826_v32 = vmul.f32 %v4177_v50, %v1824_v39  ;;  %vm1694_vm7 = vmor %vm1692_vm6, %vm1693_vm5  ;;  %vm1831_vm9 = vweird.f32 %v4177_v50 }
 0xd3f   :  { %v1689_v31 = vsub.f32 1.0, %v1688_v61  ;;  %vm1832_vm11 = vmor %vm1830_vm10, %vm1831_vm9 }
 0xd40   :  { %v1827_v53 = vsub.f32 1.0, %v1826_v32 }
 0xd41   :  { %v1690_v52 = vmul.f32 %v4175_v37, %v1689_v31 }
 0xd42   :  { %v1828_v48 = vmul.f32 %v4177_v50, %v1827_v53 }
 0xd43   :  { %v1691_v33 = vadd.f32 %v4175_v37, %v1690_v52 }
 0xd44   :  { %v1829_v49 = vadd.f32 %v4177_v50, %v1828_v48 }
 0xd45   :  { %v1695_v0 = vsel %vm1694_vm7, %v4175_v37, %v1691_v33 }
 0xd46   :  { %v1700_v42 = vsel %vm1697_vm8, %v1699_v60, %v1695_v0  ;;  %v1833_v3 = vsel %vm1832_vm11, %v4177_v50, %v1829_v49 }
 0xd47   :  { %v1838_v47 = vsel %vm1835_vm12, %v1837_v13, %v1833_v3 }
 0xd93   :  { %v1719_v59 = vpop.permute.xlu2 %1718 }
 0xd94   :  { %v1721_v46 = vmul.f32 %v1719_v59, %v1700_v42 }
 0xd96   :  { %1723 = vrot.lane.b32.xlu1 %v1721_v46, %s4444_s1 }
 0xd9a   :  { %v1857_v14 = vpop.permute.xlu1 %1856 }
 0xd9b   :  { %v1859_v1 = vmul.f32 %v1857_v14, %v1838_v47 }
 0xd9d   :  { %1861 = vrot.lane.b32.xlu0 %v1859_v1, %s4444_s1 }
 0xe08   :  { %v1724_v36 = vpop.permute.xlu1 %1723 }
 0xe09   :  { %v5079_v2 = vadd.f32 %v4169_v63, %v1724_v36 }
 0xe0b   :  { %v1875_v54 = vrot.slane %v5079_v2, 2 }
 0xe0d   :  { %1876 = vrot.lane.b32.xlu0 %v1875_v54, %s4443_s0 }
 0xe0f   :  { %v1862_v25 = vpop.permute.xlu0 %1861 }
 0xe10   :  { %v5084_v12 = vadd.f32 %v5067_v51, %v1862_v25 }
 0xe12   :  { %v2013_v62 = vrot.slane %v5084_v12, 4 }
 0xe14   :  { %2014 = vrot.lane.b32.xlu2 %v2013_v62, %s4443_s0 }
 0xe6e   :  { %v2015_v39 = vpop.permute.xlu2 %2014 }
 0xe6f   :  { %3983 = vmatmul.msk.f32.vlgmr.msra.gmra.mxu3 %vm196_vm2, %v2015_v39 }
 0xe70   :  { %2356 = vmatpush.msra.mxu3 %v4842_v4 }
 0xe72   :  { %2357 = vmatpush.msra.mxu3 %v4845_v20 }
 0xe74   :  { %2358 = vmatpush.msra.mxu3 %v4848_v5 }
 0xe76   :  { %2359 = vmatpush.msra.mxu3 %v4851_v9 }
 0xe7f   :  { %v1877_v63 = vpop.permute.xlu0 %1876 }
 0xe80   :  { %3978 = vmatmul.msk.f32.vlgmr.msrb.gmra.mxu0 %vm196_vm2, %v1877_v63  ;;  %3979 = vmatmul.msk.f32.vlgmr.msrb.gmra.mxu1 %vm196_vm2, %v1877_v63 }
 0xe81   :  { %3980 = vmatmul.msk.f32.vlgmr.msra.gmra.mxu2 %vm196_vm2, %v1877_v63  ;;  %2218 = vmatpush.msrb.mxu0 %v4857_v6 }
 0xe82   :  { %2316 = vmatpush.msrb.mxu1 %v4860_v7  ;;  %2336 = vmatpush.msra.mxu2 %v4863_v8 }
 0xe83   :  { %2219 = vmatpush.msrb.mxu0 %v4866_v22 }
 0xe84   :  { %2317 = vmatpush.msrb.mxu1 %v4869_v10  ;;  %2337 = vmatpush.msra.mxu2 %v4872_v23 }
 0xe85   :  { %2220 = vmatpush.msrb.mxu0 %v4875_v24 }
 0xe86   :  { %2318 = vmatpush.msrb.mxu1 %v4878_v26  ;;  %2338 = vmatpush.msra.mxu2 %v4881_v27 }
 0xe87   :  { %2221 = vmatpush.msrb.mxu0 %v4884_v28 }
 0xe88   :  { %3984 = vmatmul.msk.f32.vlgmr.msra.gmra.mxu0 %vm196_vm2, %v2015_v39  ;;  %3985 = vmatmul.msk.f32.vlgmr.msra.gmra.mxu1 %vm196_vm2, %v2015_v39 }
 0xe89   :  { %2319 = vmatpush.msrb.mxu1 %v4889_v29  ;;  %2339 = vmatpush.msra.mxu2 %v4892_v30 }
 0xef2   :  { %v2035_v4 = vpop.f32.mrf.mxu3 }
 0xef3   :  { %v2079_v20 = vrot.slane %v2035_v4, 6 }
 0xef5   :  { %v2081_v5 = vadd.f32 %v2079_v20, %v4652_v38 }
 0xef7   :  { %v3986_v9 = vmul.f32 -1.442695, %v2081_v5 }
 0xef9   :  { %4178 = vpow2.f32 %v3986_v9 }
 0xefd   :  { %v1897_v6 = vpop.f32.mrf.mxu0  ;;  %v1917_v10 = vpop.f32.mrf.mxu1 }
 0xefe   :  { %v1941_v8 = vrot.slane %v1897_v6, 4  ;;  %v1964_v13 = vrot.slane %v1917_v10, 4 }
 0xeff   :  { %v4179_v7 = vpop.eup %4178 }
 0xf00   :  { %v2085_v22 = vadd.f32 1.0, %v4179_v7  ;;  %v1943_v23 = vadd.f32 %v1941_v8, %v4979_v15 }
 0xf02   :  { %4180 = vrcp.f32 %v2085_v22  ;;  %v3981_v24 = vmul.f32 -1.442695, %v1943_v23  ;;  %v2097_v50 = vand.u32 2147483648, %v2085_v22  ;;  %v2095_v52 = vand.u32 2147483647, %v2085_v22 }
 0xf03   :  { %vm2091_vm14 = vweird.f32 %v2085_v22 }
 0xf04   :  { %4182 = vpow2.f32 %v3981_v24  ;;  %v2098_v33 = vor.u32 1.1754944e-38, %v2097_v50  ;;  %vm2096_vm0 = vcmp.eq.f32.partialorder %v2095_v52, 8.507059e+37  ;;  %v1937_v42 = vpop.f32.mrf.mxu2 }
 0xf05   :  { %v2055_v26 = vpop.f32.mrf.mxu0  ;;  %v2075_v30 = vpop.f32.mrf.mxu1  ;;  %v1938_v46 = vadd.f32 %v1937_v42, %v4668_v58 }
 0xf06   :  { %v2102_v27 = vrot.slane %v2055_v26, 6  ;;  %v2076_v31 = vadd.f32 %v2075_v30, %v4672_v19 }
 0xf07   :  { %v1989_v36 = vrot.slane %v1938_v46, 4 }
 0xf08   :  { %v4181_v28 = vpop.eup %4180  ;;  %2103 = vrot.lane.b32.xlu0 %v2102_v27, %s4444_s1  ;;  %v2127_v55 = vrot.slane %v2076_v31, 6 }
 0xf09   :  { %v2087_v29 = vmul.f32 %v4181_v28, %v2085_v22  ;;  %vm2092_vm13 = vweird.f32 %v4181_v28 }
 0xf0a   :  { %v4183_v51 = vpop.eup %4182  ;;  %vm2093_vm15 = vmor %vm2091_vm14, %vm2092_vm13 }
 0xf0b   :  { %v2088_v37 = vsub.f32 1.0, %v2087_v29  ;;  %v1947_v61 = vadd.f32 1.0, %v4183_v51 }
 0xf0d   :  { %v2089_v32 = vmul.f32 %v4181_v28, %v2088_v37  ;;  %4184 = vrcp.f32 %v1947_v61  ;;  %v1959_v57 = vand.u32 2147483648, %v1947_v61  ;;  %v1957_v3 = vand.u32 2147483647, %v1947_v61 }
 0xf0e   :  { %vm1953_vm4 = vweird.f32 %v1947_v61 }
 0xf0f   :  { %v2090_v53 = vadd.f32 %v4181_v28, %v2089_v32  ;;  %v1960_v14 = vor.u32 1.1754944e-38, %v1959_v57  ;;  %vm1958_vm6 = vcmp.eq.f32.partialorder %v1957_v3, 8.507059e+37 }
 0xf11   :  { %v2094_v45 = vsel %vm2093_vm15, %v4181_v28, %v2090_v53 }
 0xf12   :  { %v2099_v48 = vsel %vm2096_vm0, %v2098_v33, %v2094_v45 }
 0xf13   :  { %v2129_v0 = vmul.f32 %v2127_v55, %v2099_v48  ;;  %v4185_v60 = vpop.eup %4184 }
 0xf14   :  { %v1949_v49 = vmul.f32 %v4185_v60, %v1947_v61  ;;  %vm1954_vm3 = vweird.f32 %v4185_v60 }
 0xf15   :  { %2131 = vrot.lane.b32.xlu1 %v2129_v0, %s4443_s0  ;;  %vm1955_vm5 = vmor %vm1953_vm4, %vm1954_vm3 }
 0xf16   :  { %v1950_v59 = vsub.f32 1.0, %v1949_v49 }
 0xf18   :  { %v1951_v41 = vmul.f32 %v4185_v60, %v1950_v59 }
 0xf1a   :  { %v1952_v47 = vadd.f32 %v4185_v60, %v1951_v41 }
 0xf1c   :  { %v1956_v1 = vsel %vm1955_vm5, %v4185_v60, %v1952_v47 }
 0xf1d   :  { %1965 = vrot.lane.b32.xlu1 %v1964_v13, %s4444_s1  ;;  %v1961_v54 = vsel %vm1958_vm6, %v1960_v14, %v1956_v1 }
 0xf1e   :  { %v1991_v25 = vmul.f32 %v1989_v36, %v1961_v54 }
 0xf20   :  { %1993 = vrot.lane.b32.xlu2 %v1991_v25, %s4443_s0 }
 0xf7a   :  { %v1994_v62 = vpop.permute.xlu2 %1993  ;;  %v2104_v23 = vpop.permute.xlu0 %2103 }
 0xf7b   :  { %v1996_v39 = vadd.f32 %v1994_v62, %v5000_v34  ;;  %v2106_v24 = vadd.f32 %v2104_v23, %v5008_v40 }
 0xf7d   :  { %4186 = vtanh.f32 %v1996_v39  ;;  %v3987_v26 = vmul.f32 -1.442695, %v2106_v24 }
 0xf83   :  { %v4187_v63 = vpop.eup %4186 }
 0xf84   :  { %v1999_v4 = vrot.slane %v4187_v63, 2 }
 0xf86   :  { %v2001_v5 = vsub.f32 %v5079_v2, %v1999_v4 }
 0xf87   :  { %v2132_v20 = vpop.permute.xlu1 %2131 }
 0xf88   :  { %v2134_v9 = vadd.f32 %v2132_v20, %v4991_v21  ;;  %v2003_v6 = vrot.slane %v2001_v5, 6 }
 0xf8a   :  { %4188 = vtanh.f32 %v2134_v9  ;;  %2004 = vrot.lane.b32.xlu0 %v2003_v6, %s4445_s3 }
 0xf8b   :  { %4190 = vpow2.f32 %v3987_v26 }
 0xf8f   :  { %v1966_v27 = vpop.permute.xlu1 %1965 }
 0xf90   :  { %v4189_v7 = vpop.eup %4188  ;;  %v1968_v28 = vadd.f32 %v1966_v27, %v5013_v44 }
 0xf91   :  { %v2137_v8 = vrot.slane %v4189_v7, 6  ;;  %v4191_v29 = vpop.eup %4190 }
 0xf92   :  { %v3982_v30 = vmul.f32 -1.442695, %v1968_v28  ;;  %v2110_v51 = vadd.f32 1.0, %v4191_v29 }
 0xf93   :  { %v2139_v22 = vsub.f32 %v5084_v12, %v2137_v8 }
 0xf94   :  { %4192 = vpow2.f32 %v3982_v30  ;;  %v2122_v55 = vand.u32 2147483648, %v2110_v51  ;;  %vm2116_vm8 = vweird.f32 %v2110_v51  ;;  %v2120_v48 = vand.u32 2147483647, %v2110_v51 }
 0xf95   :  { %v2141_v10 = vrot.slane %v2139_v22, 2  ;;  %4194 = vrcp.f32 %v2110_v51 }
 0xf96   :  { %v2123_v49 = vor.u32 1.1754944e-38, %v2122_v55  ;;  %vm2121_vm10 = vcmp.eq.f32.partialorder %v2120_v48, 8.507059e+37 }
 0xf97   :  { %2142 = vrot.lane.b32.xlu2 %v2141_v10, %s4445_s3 }
 0xf9a   :  { %v4193_v37 = vpop.eup %4192 }
 0xf9b   :  { %v4195_v61 = vpop.eup %4194  ;;  %v1972_v50 = vadd.f32 1.0, %v4193_v37 }
 0xf9c   :  { %v2112_v31 = vmul.f32 %v4195_v61, %v2110_v51  ;;  %vm2117_vm7 = vweird.f32 %v4195_v61 }
 0xf9d   :  { %4196 = vrcp.f32 %v1972_v50  ;;  %vm2118_vm9 = vmor %vm2116_vm8, %vm2117_vm7  ;;  %v1984_v3 = vand.u32 2147483648, %v1972_v50  ;;  %vm1978_vm12 = vweird.f32 %v1972_v50  ;;  %v1982_v13 = vand.u32 2147483647, %v1972_v50 }
 0xf9e   :  { %v2113_v32 = vsub.f32 1.0, %v2112_v31 }
 0xf9f   :  { %v1985_v14 = vor.u32 1.1754944e-38, %v1984_v3  ;;  %vm1983_vm14 = vcmp.eq.f32.partialorder %v1982_v13, 8.507059e+37 }
 0xfa0   :  { %v2114_v52 = vmul.f32 %v4195_v61, %v2113_v32 }
 0xfa2   :  { %v2115_v33 = vadd.f32 %v4195_v61, %v2114_v52 }
 0xfa3   :  { %v4197_v53 = vpop.eup %4196 }
 0xfa4   :  { %v1974_v45 = vmul.f32 %v4197_v53, %v1972_v50  ;;  %v2119_v0 = vsel %vm2118_vm9, %v4195_v61, %v2115_v33  ;;  %vm1979_vm11 = vweird.f32 %v4197_v53  ;;  %vm464_vm9 = vcmask 261126  }
 0xfa5   :  { %v2124_v42 = vsel %vm2121_vm10, %v2123_v49, %v2119_v0  ;;  %vm1980_vm13 = vmor %vm1978_vm12, %vm1979_vm11  ;;  %vm743_vm10 = vcmask 257026  }
 0xfa6   :  { %v1975_v60 = vsub.f32 1.0, %v1974_v45 }
 0xfa8   :  { %v1976_v46 = vmul.f32 %v4197_v53, %v1975_v60 }
 0xfaa   :  { %v1977_v41 = vadd.f32 %v4197_v53, %v1976_v46 }
 0xfac   :  { %v1981_v47 = vsel %vm1980_vm13, %v4197_v53, %v1977_v41 }
 0xfad   :  { %v1986_v1 = vsel %vm1983_vm14, %v1985_v14, %v1981_v47 }
 0xff1   :  { %v2143_v59 = vpop.permute.xlu2 %2142 }
 0xff2   :  { %v2145_v57 = vmul.f32 %v2143_v59, %v2124_v42 }
 0xff4   :  { %2147 = vrot.lane.b32.xlu1 %v2145_v57, %s4444_s1 }
 0xffc   :  { %v2005_v36 = vpop.permute.xlu0 %2004 }
 0xffd   :  { %v2007_v54 = vmul.f32 %v2005_v36, %v1986_v1 }
 0xfff   :  { %2009 = vrot.lane.b32.xlu2 %v2007_v54, %s4444_s1 }
0x1059   :  { %v2010_v25 = vpop.permute.xlu2 %2009 }
0x105a   :  { %v5128_v62 = vadd.f32 %v4187_v63, %v2010_v25 }
0x105c   :  { %v2161_v39 = vrot.slane %v5128_v62, 4 }
0x105e   :  { %2162 = vrot.lane.b32.xlu1 %v2161_v39, %s4443_s0 }
0x1066   :  { %v2148_v4 = vpop.permute.xlu1 %2147 }
0x1067   :  { %v5132_v20 = vadd.f32 %v4189_v7, %v2148_v4 }
0x1069   :  { %v2299_v5 = vrot.slane %v5132_v20, 2 }
0x106b   :  { %2300 = vrot.lane.b32.xlu0 %v2299_v5, %s4443_s0 }
0x10d0   :  { %v2163_v9 = vpop.permute.xlu1 %2162 }
0x10d1   :  { %3988 = vmatmul.msk.f32.vlgmr.msrb.gmra.mxu2 %vm196_vm2, %v2163_v9  ;;  %3989 = vmatmul.msk.f32.vlgmr.msrb.gmra.mxu3 %vm196_vm2, %v2163_v9 }
0x10d2   :  { %3990 = vmatmul.msk.f32.vlgmr.msrb.gmra.mxu0 %vm196_vm2, %v2163_v9 }
0x10dd   :  { %v2301_v63 = vpop.permute.xlu0 %2300 }
0x10de   :  { %3993 = vmatmul.msk.f32.vlgmr.msrb.gmra.mxu1 %vm196_vm2, %v2301_v63  ;;  %3994 = vmatmul.msk.f32.vlgmr.msra.gmra.mxu2 %vm196_vm2, %v2301_v63 }
0x10df   :  { %3995 = vmatmul.msk.f32.vlgmr.msra.gmra.mxu3 %vm196_vm2, %v2301_v63 }
0x114f   :  { %v2223_v59 = vpop.f32.mrf.mxu0 }
0x1150   :  { %v2224_v3 = vadd.f32 %v2223_v59, %v4668_v58 }
0x1152   :  { %v2275_v14 = vrot.slane %v2224_v3, 2 }
0x1154   :  { %v2183_v6 = vpop.f32.mrf.mxu2  ;;  %v2203_v29 = vpop.f32.mrf.mxu3 }
0x1155   :  { %v2227_v7 = vrot.slane %v2183_v6, 2  ;;  %v2250_v37 = vrot.slane %v2203_v29, 2 }
0x1157   :  { %v2229_v8 = vadd.f32 %v2227_v7, %v4979_v15 }
0x1159   :  { %v3991_v22 = vmul.f32 -1.442695, %v2229_v8 }
0x115b   :  { %v2321_v10 = vpop.f32.mrf.mxu1  ;;  %4198 = vpow2.f32 %v3991_v22 }
0x115c   :  { %v2364_v23 = vadd.f32 %v2321_v10, %v4652_v38 }
0x115e   :  { %v3996_v24 = vmul.f32 -1.442695, %v2364_v23 }
0x1160   :  { %4200 = vpow2.f32 %v3996_v24 }
0x1161   :  { %v2341_v26 = vpop.f32.mrf.mxu2  ;;  %v4199_v27 = vpop.eup %4198 }
0x1162   :  { %2385 = vrot.lane.b32.xlu0 %v2341_v26, %s4444_s1  ;;  %v2233_v28 = vadd.f32 1.0, %v4199_v27  ;;  %v2361_v53 = vpop.f32.mrf.mxu3 }
0x1163   :  { %v2362_v0 = vadd.f32 %v2361_v53, %v4672_v19 }
0x1164   :  { %4202 = vrcp.f32 %v2233_v28  ;;  %v2245_v46 = vand.u32 2147483648, %v2233_v28  ;;  %vm2239_vm6 = vweird.f32 %v2233_v28  ;;  %v2243_v41 = vand.u32 2147483647, %v2233_v28 }
0x1166   :  { %v4201_v30 = vpop.eup %4200  ;;  %v2246_v47 = vor.u32 1.1754944e-38, %v2245_v46  ;;  %vm2244_vm8 = vcmp.eq.f32.partialorder %v2243_v41, 8.507059e+37 }
0x1167   :  { %v2368_v51 = vadd.f32 1.0, %v4201_v30 }
0x1169   :  { %4204 = vrcp.f32 %v2368_v51  ;;  %v2380_v52 = vand.u32 2147483648, %v2368_v51  ;;  %v2378_v45 = vand.u32 2147483647, %v2368_v51  ;;  %vm2374_vm0 = vweird.f32 %v2368_v51 }
0x116a   :  { %2251 = vrot.lane.b32.xlu0 %v2250_v37, %s4444_s1  ;;  %v4203_v15 = vpop.eup %4202 }
0x116b   :  { %v2235_v61 = vmul.f32 %v4203_v15, %v2233_v28  ;;  %v2381_v60 = vor.u32 1.1754944e-38, %v2380_v52  ;;  %vm2379_vm4 = vcmp.eq.f32.partialorder %v2378_v45, 8.507059e+37  ;;  %vm2240_vm5 = vweird.f32 %v4203_v15 }
0x116c   :  { %vm2241_vm7 = vmor %vm2239_vm6, %vm2240_vm5 }
0x116d   :  { %v2236_v38 = vsub.f32 1.0, %v2235_v61 }
0x116f   :  { %v4205_v50 = vpop.eup %4204  ;;  %v2237_v55 = vmul.f32 %v4203_v15, %v2236_v38 }
0x1170   :  { %v2370_v31 = vmul.f32 %v4205_v50, %v2368_v51  ;;  %vm2375_vm15 = vweird.f32 %v4205_v50 }
0x1171   :  { %vm2376_vm3 = vmor %vm2374_vm0, %vm2375_vm15  ;;  %v2238_v42 = vadd.f32 %v4203_v15, %v2237_v55  ;;  %vm749_vm15 = vcmask 259076  }
0x1172   :  { %v2371_v32 = vsub.f32 1.0, %v2370_v31  ;;  %1588 = vrot.lane.b32.xlu0 %v5019_v11, %s4443_s0 }
0x1173   :  { %v2242_v13 = vsel %vm2241_vm7, %v4203_v15, %v2238_v42 }
0x1174   :  { %v2372_v33 = vmul.f32 %v4205_v50, %v2371_v32  ;;  %v2247_v19 = vsel %vm2244_vm8, %v2246_v47, %v2242_v13 }
0x1175   :  { %v2277_v1 = vmul.f32 %v2275_v14, %v2247_v19  ;;  %v2447_v19 = vld [vmem:[#allocation6 + $0x38] sm:$0xff] }
0x1176   :  { %v2373_v48 = vadd.f32 %v4205_v50, %v2372_v33  ;;  %v2455_v14 = vld [vmem:[#allocation6 + $0x78] sm:$0xff]  ;;  %2503 = vmatpush.msra.mxu0 %v2447_v19 }
0x1177   :  { %2572 = vmatpush.msrb.mxu2 %v2455_v14 }
0x1178   :  { %v2377_v49 = vsel %vm2376_vm3, %v4205_v50, %v2373_v48 }
0x1179   :  { %v2382_v57 = vsel %vm2379_vm4, %v2381_v60, %v2377_v49 }
0x117a   :  { %v2408_v11 = vmul.f32 %v2382_v57, %v2362_v0 }
0x117c   :  { %2410 = vrot.lane.b32.xlu2 %v2408_v11, %s4443_s0 }
0x1184   :  { %2279 = vrot.lane.b32.xlu2 %v2277_v1, %s4443_s0  ;;  %v2454_v1 = vld [vmem:[#allocation6 + $0x70] sm:$0xff] }
0x1185   :  { %2573 = vmatpush.msrb.mxu2 %v2454_v1 }
0x11d4   :  { %v2386_v36 = vpop.permute.xlu0 %2385 }
0x11d5   :  { %v2388_v10 = vadd.f32 %v2386_v36, %v5008_v40  ;;  %v2445_v36 = vld [vmem:[#allocation6 + $0x28] sm:$0xff] }
0x11d6   :  { %v2411_v54 = vpop.permute.xlu2 %2410 }
0x11d7   :  { %v2413_v25 = vadd.f32 %v2411_v54, %v4991_v21  ;;  %v3997_v23 = vmul.f32 -1.442695, %v2388_v10  ;;  %v2453_v54 = vld [vmem:[#allocation6 + $0x68] sm:$0xff]  ;;  %v5213_v10 = vld [vmem:[#allocation8 + $0x58] sm:$0xff] }
0x11d8   :  { %2574 = vmatpush.msrb.mxu2 %v2453_v54 }
0x11d9   :  { %4206 = vtanh.f32 %v2413_v25  ;;  %v2452_v25 = vld [vmem:[#allocation6 + $0x60] sm:$0xff] }
0x11da   :  { %2575 = vmatpush.msrb.mxu2 %v2452_v25 }
0x11dc   :  { %v2252_v39 = vpop.permute.xlu0 %2251  ;;  %2671 = vmatpush.msra.mxu2 %v5213_v10 }
0x11de   :  { %v2280_v4 = vpop.permute.xlu2 %2279 }
0x11df   :  { %v2282_v5 = vadd.f32 %v2280_v4, %v5000_v34  ;;  %v5154_v58 = vpop.eup %4206  ;;  %v5203_v4 = vld [vmem:[#allocation8 + $0x10] sm:$0xff] }
0x11e0   :  { %v2416_v9 = vrot.slane %v5154_v58, 6 }
0x11e1   :  { %4208 = vtanh.f32 %v2282_v5  ;;  %v2451_v5 = vld [vmem:[#allocation6 + $0x58] sm:$0xff] }
0x11e2   :  { %v2418_v63 = vsub.f32 %v5132_v20, %v2416_v9  ;;  %4210 = vpow2.f32 %v3997_v23  ;;  %v2450_v9 = vld [vmem:[#allocation6 + $0x50] sm:$0xff]  ;;  %2594 = vmatpush.msrb.mxu3 %v2451_v5  ;;  %v5218_v23 = vld [vmem:[%s5542_s6] sm:$0xff] }
0x11e3   :  { %v5300_v25 = vperm.slane %v5218_v23, 3 }
0x11e4   :  { %v1589_v6 = vpop.permute.xlu0 %1588  ;;  %v2420_v7 = vrot.slane %v2418_v63, 2  ;;  %v2441_v63 = vld [vmem:[#allocation6 + $0x8] sm:$0xff]  ;;  %2595 = vmatpush.msrb.mxu3 %v2450_v9 }
0x11e5   :  { %1591 = vst.msk [vmem:[#allocation2 + $0x10] sm:$0xc0] %vm464_vm9, %v1589_v6  ;;  %v5206_v6 = vld [vmem:[#allocation8 + $0x8] sm:$0xff] }
0x11e6   :  { %2421 = vrot.lane.b32.xlu1 %v2420_v7, %s4445_s3  ;;  %v2449_v7 = vld [vmem:[#allocation6 + $0x48] sm:$0xff] }
0x11e7   :  { %v5160_v21 = vpop.eup %4208  ;;  %2596 = vmatpush.msrb.mxu3 %v2449_v7 }
0x11e8   :  { %v2285_v8 = vrot.slane %v5160_v21, 2  ;;  %v4211_v24 = vpop.eup %4210 }
0x11e9   :  { %v2392_v26 = vadd.f32 1.0, %v4211_v24  ;;  %v5220_v24 = vld [vmem:[#allocation8 + $0x50] sm:$0xff] }
0x11ea   :  { %v2287_v34 = vsub.f32 %v5128_v62, %v2285_v8  ;;  %v2448_v8 = vld [vmem:[#allocation6 + $0x40] sm:$0xff]  ;;  %2672 = vmatpush.msra.mxu2 %v5220_v24 }
0x11eb   :  { %4212 = vrcp.f32 %v2392_v26  ;;  %v2404_v40 = vand.u32 2147483648, %v2392_v26  ;;  %vm2398_vm12 = vweird.f32 %v2392_v26  ;;  %2597 = vmatpush.msrb.mxu3 %v2448_v8 }
0x11ec   :  { %v2289_v22 = vrot.slane %v2287_v34, 6  ;;  %v5209_v34 = vld [vmem:[#allocation8] sm:$0xff] }
0x11ed   :  { %v2405_v50 = vor.u32 1.1754944e-38, %v2404_v40  ;;  %v5239_v40 = vld [vmem:[#allocation8 + $0x40] sm:$0xff] }
0x11ee   :  { %2290 = vrot.lane.b32.xlu2 %v2289_v22, %s4445_s3 }
0x11f1   :  { %v4213_v27 = vpop.eup %4212 }
0x11f2   :  { %v2394_v28 = vmul.f32 %v4213_v27, %v2392_v26  ;;  %vm2399_vm11 = vweird.f32 %v4213_v27 }
0x11f3   :  { %vm2400_vm13 = vmor %vm2398_vm12, %vm2399_vm11 }
0x11f4   :  { %v2395_v30 = vsub.f32 1.0, %v2394_v28 }
0x11f6   :  { %2157 = vrot.lane.b32.xlu2 %v5132_v20, %s4443_s0  ;;  %v2254_v20 = vadd.f32 %v2252_v39, %v5013_v44  ;;  %v2396_v51 = vmul.f32 %v4213_v27, %v2395_v30  ;;  %v2443_v39 = vld [vmem:[#allocation6 + $0x18] sm:$0xff]  ;;  %v5231_v30 = vld [vmem:[#allocation8 + $0x48] sm:$0xff] }
0x11f7   :  { %2532 = vmatpush.msra.mxu1 %v2443_v39  ;;  %2673 = vmatpush.msra.mxu2 %v5231_v30 }
0x11f8   :  { %v2397_v37 = vadd.f32 %v4213_v27, %v2396_v51  ;;  %v2470_v51 = vld [vmem:[#allocation8 + $0x70] sm:$0xff] }
0x11f9   :  { %2674 = vmatpush.msra.mxu2 %v5239_v40 }
0x11fa   :  { %v2401_v61 = vsel %vm2400_vm13, %v4213_v27, %v2397_v37  ;;  %v2469_v37 = vld [vmem:[#allocation8 + $0x68] sm:$0xff] }
0x11fe   :  { %746 = vrot.lane.b32.xlu2 %v4773_v35, %s4443_s0  ;;  %v3992_v35 = vmul.f32 -1.442695, %v2254_v20  ;;  %v5229_v20 = vld [vmem:[#allocation8 + $0x38] sm:$0xff] }
0x1200   :  { %4214 = vpow2.f32 %v3992_v35  ;;  %v5234_v35 = vld [vmem:[#allocation8 + $0x30] sm:$0xff] }
0x1206   :  { %1028 = vrot.lane.b32.xlu2 %v4832_v17, %s4443_s0  ;;  %v4215_v15 = vpop.eup %4214 }
0x1207   :  { %v2258_v44 = vadd.f32 1.0, %v4215_v15  ;;  %v2468_v15 = vld [vmem:[#allocation8 + $0x60] sm:$0xff] }
0x1209   :  { %4216 = vrcp.f32 %v2258_v44  ;;  %v2270_v49 = vand.u32 2147483648, %v2258_v44  ;;  %vm2264_vm3 = vweird.f32 %v2258_v44  ;;  %v2268_v42 = vand.u32 2147483647, %v2258_v44 }
0x120b   :  { %vm2269_vm5 = vcmp.eq.f32.partialorder %v2268_v42, 8.507059e+37  ;;  %v2543_v42 = vperm.slane %v5218_v23, 0 }
0x120e   :  { %1866 = vrot.lane.b32.xlu2 %v5079_v2, %s4443_s0  ;;  %v2402_v2 = vand.u32 2147483647, %v2392_v26  ;;  %v2546_v26 = vperm.slane %v5218_v23, 1 }
0x120f   :  { %v4217_v33 = vpop.eup %4216 }
0x1210   :  { %vm2403_vm14 = vcmp.eq.f32.partialorder %v2402_v2, 8.507059e+37  ;;  %v2260_v45 = vmul.f32 %v4217_v33, %v2258_v44  ;;  %vm2265_vm0 = vweird.f32 %v4217_v33  ;;  %v5243_v2 = vld [vmem:[#allocation8 + $0x20] sm:$0xff]  ;;  %v2553_v44 = vperm.slane %v5218_v23, 2 }
0x1211   :  { %v2406_v38 = vsel %vm2403_vm14, %v2405_v50, %v2401_v61  ;;  %vm2266_vm4 = vmor %vm2264_vm3, %vm2265_vm0 }
0x1212   :  { %v2261_v55 = vsub.f32 1.0, %v2260_v45  ;;  %v2476_v45 = vld [vmem:[#allocation8 + $0xa0] sm:$0xff] }
0x1214   :  { %v2262_v0 = vmul.f32 %v4217_v33, %v2261_v55 }
0x1216   :  { %v2263_v60 = vadd.f32 %v4217_v33, %v2262_v0  ;;  %2555 = vrot.lane.b32.xlu2 %v2553_v44, %s4443_s0 }
0x1218   :  { %v2267_v59 = vsel %vm2266_vm4, %v4217_v33, %v2263_v60  ;;  %v2477_v33 = vld [vmem:[#allocation8 + $0xa8] sm:$0xff] }
0x1248   :  { %v2291_v29 = vpop.permute.xlu2 %2290 }
0x1250   :  { %v2158_v17 = vpop.permute.xlu2 %2157 }
0x1251   :  { %2160 = vst.msk [vmem:[#allocation2 + $0x10] sm:$0xc] %vm743_vm10, %v2158_v17  ;;  %v5237_v17 = vld [vmem:[#allocation8 + $0x28] sm:$0xff] }
0x1258   :  { %v2422_v31 = vpop.permute.xlu1 %2421  ;;  %v747_v52 = vpop.permute.xlu2 %746 }
0x1259   :  { %v2424_v32 = vmul.f32 %v2422_v31, %v2406_v38  ;;  %750 = vst.msk [vmem:[#allocation2 + $0x18] sm:$0x30] %vm749_vm15, %v747_v52  ;;  %v5553_v52 = vmov 0.0  }
0x125b   :  { %2426 = vrot.lane.b32.xlu1 %v2424_v32, %s4444_s1  ;;  %v2479_v32 = vld [vmem:[#allocation8 + $0xb8] sm:$0xff] }
0x1260   :  { %v1029_v53 = vpop.permute.xlu2 %1028 }
0x1261   :  { %1031 = vst.msk [vmem:[#allocation2] sm:$0x30] %vm749_vm15, %v1029_v53  ;;  %v2478_v53 = vld [vmem:[#allocation8 + $0xb0] sm:$0xff] }
0x1263   :  { %1871 = vrot.lane.b32.xlu1 %v5084_v12, %s4443_s0  ;;  %v2271_v12 = vor.u32 1.1754944e-38, %v2270_v49 }
0x1265   :  { %v2272_v57 = vsel %vm2269_vm5, %v2271_v12, %v2267_v59 }
0x1266   :  { %v2293_v46 = vmul.f32 %v2291_v29, %v2272_v57  ;;  %v2471_v29 = vld [vmem:[#allocation8 + $0x78] sm:$0xff] }
0x1267   :  { %2753 = vmatpush.msra.mxu3 %v2471_v29 }
0x1268   :  { %v1867_v48 = vpop.permute.xlu2 %1866 }
0x1269   :  { %1869 = vst.msk [vmem:[#allocation2 + $0x8] sm:$0xc] %vm743_vm10, %v1867_v48  ;;  %2754 = vmatpush.msra.mxu3 %v2470_v51 }
0x126b   :  { %460 = vrot.lane.b32.xlu1 %v4720_v16, %s4443_s0  ;;  %2755 = vmatpush.msra.mxu3 %v2469_v37 }
0x126d   :  { %2756 = vmatpush.msra.mxu3 %v2468_v15 }
0x1270   :  { %v5304_v23 = vpop.permute.xlu2 %2555 }
0x1273   :  { %740 = vrot.lane.b32.xlu1 %v4777_v43, %s4443_s0 }
0x127b   :  { %2295 = vrot.lane.b32.xlu1 %v2293_v46, %s4444_s1 }
0x12cd   :  { %v2427_v11 = vpop.permute.xlu1 %2426 }
0x12ce   :  { %v2429_v16 = vadd.f32 %v5154_v58, %v2427_v11  ;;  %v2442_v58 = vld [vmem:[#allocation6 + $0x10] sm:$0xff] }
0x12cf   :  { %2533 = vmatpush.msra.mxu1 %v2442_v58 }
0x12d0   :  { %2436 = vrot.lane.b32.xlu0 %v2429_v16, %s4443_s0 }
0x12d1   :  { %2534 = vmatpush.msra.mxu1 %v2441_v63 }
0x12d5   :  { %v1872_v41 = vpop.permute.xlu1 %1871 }
0x12d6   :  { %1874 = vst.msk [vmem:[#allocation2 + $0x10] sm:$0x30] %vm749_vm15, %v1872_v41 }
0x12d8   :  { %1033 = vrot.lane.b32.xlu0 %v4837_v18, %s4443_s0  ;;  %v2446_v18 = vld [vmem:[#allocation6 + $0x30] sm:$0xff] }
0x12d9   :  { %2504 = vmatpush.msra.mxu0 %v2446_v18 }
0x12db   :  { %2505 = vmatpush.msra.mxu0 %v2445_v36 }
0x12dd   :  { %v461_v43 = vpop.permute.xlu1 %460 }
0x12de   :  { %465 = vst.msk [vmem:[#allocation2 + $0x18] sm:$0xc0] %vm464_vm9, %v461_v43 }
0x12e0   :  { %1307 = vrot.lane.b32.xlu0 %v4937_v56, %s4443_s0  ;;  %v2444_v56 = vld [vmem:[#allocation6 + $0x20] sm:$0xff] }
0x12e1   :  { %2506 = vmatpush.msra.mxu0 %v2444_v56 }
0x12e5   :  { %v741_v3 = vpop.permute.xlu1 %740 }
0x12e6   :  { %744 = vst.msk [vmem:[#allocation2] sm:$0xc] %vm743_vm10, %v741_v3 }
0x12e8   :  { %2152 = vrot.lane.b32.xlu0 %v5128_v62, %s4443_s0  ;;  %v5200_v62 = vld [vmem:[#allocation8 + $0x18] sm:$0xff] }
0x12e9   :  { %2630 = vmatpush.msrb.mxu0 %v5200_v62 }
0x12eb   :  { %2631 = vmatpush.msrb.mxu0 %v5203_v4 }
0x12ed   :  { %v2296_v13 = vpop.permute.xlu1 %2295  ;;  %2632 = vmatpush.msrb.mxu0 %v5206_v6 }
0x12ee   :  { %v2298_v47 = vadd.f32 %v5160_v21, %v2296_v13  ;;  %v2440_v21 = vld [vmem:[#allocation6] sm:$0xff] }
0x12ef   :  { %2535 = vmatpush.msra.mxu1 %v2440_v21  ;;  %2633 = vmatpush.msrb.mxu0 %v5209_v34 }
0x12f0   :  { %2431 = vrot.lane.b32.xlu1 %v2298_v47, %s4443_s0 }
0x12f1   :  { %2650 = vmatpush.msrb.mxu1 %v5229_v20 }
0x12f3   :  { %2651 = vmatpush.msrb.mxu1 %v5234_v35 }
0x12f5   :  { %2652 = vmatpush.msrb.mxu1 %v5237_v17 }
0x12f7   :  { %2653 = vmatpush.msrb.mxu1 %v5243_v2 }
0x12f8   :  { %2548 = vrot.lane.b32.xlu1 %v2546_v26, %s4444_s1 }
0x1342   :  { %v2437_v22 = vpop.permute.xlu0 %2436 }
0x1343   :  { %2439 = vst.msk [vmem:[#allocation2 + $0x10] sm:$0x3] %vm457_vm1, %v2437_v22 }
0x134a   :  { %v1034_v27 = vpop.permute.xlu0 %1033  ;;  %v2483_v28 = vld [vmem:[#allocation2 + $0x10] sm:$0xff] }
0x134b   :  { %1036 = vst.msk [vmem:[#allocation2 + $0x18] sm:$0xc] %vm743_vm10, %v1034_v27  ;;  %3998 = vmatmul.msk.f32.vlgmr.msra.gmra.mxu0 %vm196_vm2, %v2483_v28  ;;  %4002 = vmatmul.msk.f32.vlgmr.msrb.gmra.mxu2 %vm196_vm2, %v2483_v28 }
0x134c   :  { %2888 = vmatpush.msrb.mxu2 %v5200_v62 }
0x134e   :  { %2889 = vmatpush.msrb.mxu2 %v5203_v4 }
0x1350   :  { %2890 = vmatpush.msrb.mxu2 %v5206_v6 }
0x1352   :  { %v1308_v61 = vpop.permute.xlu0 %1307  ;;  %v2484_v50 = vld [vmem:[#allocation2 + $0x18] sm:$0xff]  ;;  %2891 = vmatpush.msrb.mxu2 %v5209_v34 }
0x1353   :  { %1310 = vst.msk [vmem:[#allocation2] sm:$0xc0] %vm464_vm9, %v1308_v61  ;;  %3999 = vmatmul.msk.f32.gmra.mxu0 %vm196_vm2, %v2484_v50  ;;  %4003 = vmatmul.msk.f32.gmra.mxu2 %vm196_vm2, %v2484_v50 }
0x135a   :  { %v2153_v31 = vpop.permute.xlu0 %2152  ;;  %v2481_v38 = vld [vmem:[#allocation2] sm:$0xff] }
0x135b   :  { %2155 = vst.msk [vmem:[#allocation2 + $0x8] sm:$0x30] %vm749_vm15, %v2153_v31  ;;  %4000 = vmatmul.msk.f32.vlgmr.msra.gmra.mxu1 %vm196_vm2, %v2481_v38  ;;  %4004 = vmatmul.msk.f32.vlgmr.msrb.gmra.mxu3 %vm196_vm2, %v2481_v38 }
0x135c   :  { %2634 = vmatmul.f32.vlgmr.msrb.gmra.mxu0 %v5553_v52  ;;  %2675 = vmatmul.f32.vlgmr.msra.gmra.mxu2 %v5553_v52 }
0x135d   :  { %2794 = vmatpush.msra.mxu1 %v2479_v32  ;;  %2908 = vmatpush.msrb.mxu3 %v5229_v20 }
0x135e   :  { %3047 = vmatpush.msra.mxu2 %v5229_v20 }
0x135f   :  { %2795 = vmatpush.msra.mxu1 %v2478_v53  ;;  %2909 = vmatpush.msrb.mxu3 %v5234_v35 }
0x1360   :  { %3048 = vmatpush.msra.mxu2 %v5234_v35 }
0x1361   :  { %2796 = vmatpush.msra.mxu1 %v2477_v33  ;;  %2910 = vmatpush.msrb.mxu3 %v5237_v17 }
0x1362   :  { %v2432_v55 = vpop.permute.xlu1 %2431  ;;  %3049 = vmatpush.msra.mxu2 %v5237_v17 }
0x1363   :  { %2434 = vst.msk [vmem:[#allocation2 + $0x8] sm:$0xc0] %vm464_vm9, %v2432_v55  ;;  %2797 = vmatpush.msra.mxu1 %v2476_v45  ;;  %2911 = vmatpush.msrb.mxu3 %v5243_v2 }
0x1364   :  { %3050 = vmatpush.msra.mxu2 %v5243_v2 }
0x136a   :  { %v2482_v48 = vld [vmem:[#allocation2 + $0x8] sm:$0xff]  ;;  %v5311_v61 = vpop.permute.xlu1 %2548 }
0x136b   :  { %4001 = vmatmul.msk.f32.gmra.mxu1 %vm196_vm2, %v2482_v48  ;;  %4005 = vmatmul.msk.f32.gmra.mxu3 %vm196_vm2, %v2482_v48 }
0x1373   :  { %2654 = vmatmul.f32.vlgmr.msrb.gmra.mxu1 %v5553_v52  ;;  %2757 = vmatmul.f32.vlgmr.msra.gmra.mxu3 %v5553_v52 }
0x1374   :  { %3027 = vmatpush.msrb.mxu1 %v5200_v62  ;;  %3067 = vmatpush.msra.mxu3 %v5213_v10 }
0x1376   :  { %3028 = vmatpush.msrb.mxu1 %v5203_v4  ;;  %3068 = vmatpush.msra.mxu3 %v5220_v24 }
0x1378   :  { %3029 = vmatpush.msrb.mxu1 %v5206_v6  ;;  %3069 = vmatpush.msra.mxu3 %v5231_v30 }
0x137a   :  { %3030 = vmatpush.msrb.mxu1 %v5209_v34  ;;  %3070 = vmatpush.msra.mxu3 %v5239_v40 }
0x137b   :  { %2798 = vmatmul.f32.vlgmr.msra.gmra.mxu1 %v5553_v52 }
0x137c   :  { %3186 = vmatpush.msra.mxu1 %v5229_v20 }
0x137e   :  { %3187 = vmatpush.msra.mxu1 %v5234_v35 }
0x1380   :  { %3188 = vmatpush.msra.mxu1 %v5237_v17 }
0x1382   :  { %3189 = vmatpush.msra.mxu1 %v5243_v2 }
0x13c8   :  { %v2508_v0 = vpop.f32.mrf.mxu0 }
0x13ce   :  { %v2577_v60 = vpop.f32.mrf.mxu2 }
0x13d0   :  { %v2511_v49 = vpop.f32.mrf.mxu0 }
0x13d6   :  { %v2579_v14 = vpop.f32.mrf.mxu2 }
0x13d8   :  { %v2537_v59 = vpop.f32.mrf.mxu1 }
0x13d9   :  { %v2538_v12 = vadd.f32 %v2537_v59, %v2508_v0  ;;  %v2635_v57 = vpop.f32.mrf.mxu0 }
0x13db   :  { %v5288_v46 = vadd.f32 %v2543_v42, %v2538_v12  ;;  %v5307_v28 = vadd.f32 %v5304_v23, %v2538_v12  ;;  %v5314_v44 = vadd.f32 %v5311_v61, %v2538_v12 }
0x13dd   :  { %v2679_v11 = vadd.f32 %v2635_v57, %v5288_v46 }
0x13de   :  { %v2599_v16 = vpop.f32.mrf.mxu3 }
0x13df   :  { %v4006_v41 = vmul.f32 -1.442695, %v2679_v11  ;;  %v2676_v5 = vpop.f32.mrf.mxu2  ;;  %v2475_v16 = vld [vmem:[#allocation8 + $0x98] sm:$0xff] }
0x13e0   :  { %v2677_v7 = vadd.f32 %v2676_v5, %v5300_v25  ;;  %2773 = vmatpush.msra.mxu0 %v2475_v16 }
0x13e1   :  { %4218 = vpow2.f32 %v4006_v41  ;;  %v2474_v41 = vld [vmem:[#allocation8 + $0x90] sm:$0xff] }
0x13e2   :  { %2774 = vmatpush.msra.mxu0 %v2474_v41 }
0x13e7   :  { %v4219_v43 = vpop.eup %4218 }
0x13e8   :  { %v2683_v3 = vadd.f32 1.0, %v4219_v43  ;;  %v2540_v13 = vpop.f32.mrf.mxu1  ;;  %v2473_v43 = vld [vmem:[#allocation8 + $0x88] sm:$0xff] }
0x13e9   :  { %v5291_v47 = vadd.f32 %v2540_v13, %v2511_v49  ;;  %2775 = vmatpush.msra.mxu0 %v2473_v43 }
0x13ea   :  { %4220 = vrcp.f32 %v2683_v3  ;;  %v2695_v58 = vand.u32 2147483648, %v2683_v3  ;;  %v2693_v63 = vand.u32 2147483647, %v2683_v3  ;;  %vm2689_vm6 = vweird.f32 %v2683_v3 }
0x13eb   :  { %v5294_v19 = vadd.f32 %v2543_v42, %v5291_v47 }
0x13ec   :  { %v2696_v8 = vor.u32 1.1754944e-38, %v2695_v58  ;;  %vm2694_vm8 = vcmp.eq.f32.partialorder %v2693_v63, 8.507059e+37 }
0x13ee   :  { %v2601_v18 = vpop.f32.mrf.mxu3 }
0x13ef   :  { %v5296_v1 = vadd.f32 %v2601_v18, %v2579_v14 }
0x13f0   :  { %v4221_v36 = vpop.eup %4220  ;;  %v2655_v54 = vpop.f32.mrf.mxu1 }
0x13f1   :  { %2700 = vrot.lane.b32.xlu2 %v2655_v54, %s4444_s1  ;;  %v2685_v56 = vmul.f32 %v4221_v36, %v2683_v3  ;;  %vm2690_vm1 = vweird.f32 %v4221_v36  ;;  %v2472_v3 = vld [vmem:[#allocation8 + $0x80] sm:$0xff] }
0x13f2   :  { %vm2691_vm7 = vmor %vm2689_vm6, %vm2690_vm1  ;;  %2776 = vmatpush.msra.mxu0 %v2472_v3 }
0x13f3   :  { %v2686_v39 = vsub.f32 1.0, %v2685_v56  ;;  %2777 = vmatmul.f32.vlgmr.msra.gmra.mxu0 %v5553_v52 }
0x13f4   :  { %2928 = vmatpush.msrb.mxu0 %v5213_v10 }
0x13f5   :  { %v2687_v9 = vmul.f32 %v4221_v36, %v2686_v39 }
0x13f6   :  { %2929 = vmatpush.msrb.mxu0 %v5220_v24  ;;  %v5343_v18 = vpop.f32.mrf.mxu3 }
0x13f7   :  { %v2688_v21 = vadd.f32 %v4221_v36, %v2687_v9 }
0x13f8   :  { %2930 = vmatpush.msrb.mxu0 %v5231_v30 }
0x13f9   :  { %v2692_v22 = vsel %vm2691_vm7, %v4221_v36, %v2688_v21 }
0x13fa   :  { %v2697_v26 = vsel %vm2694_vm8, %v2696_v8, %v2692_v22  ;;  %2931 = vmatpush.msrb.mxu0 %v5239_v40 }
0x13fb   :  { %v2723_v27 = vmul.f32 %v2697_v26, %v2677_v7 }
0x13fc   :  { %3166 = vmatpush.msra.mxu0 %v5200_v62 }
0x13fd   :  { %2725 = vrot.lane.b32.xlu0 %v2723_v27, %s4443_s0 }
0x13fe   :  { %3167 = vmatpush.msra.mxu0 %v5203_v4 }
0x1400   :  { %3168 = vmatpush.msra.mxu0 %v5206_v6 }
0x1402   :  { %3169 = vmatpush.msra.mxu0 %v5209_v34 }
0x144b   :  { %v2701_v50 = vpop.permute.xlu2 %2700 }
0x144c   :  { %v2703_v31 = vadd.f32 %v2701_v50, %v5314_v44 }
0x144e   :  { %v4007_v38 = vmul.f32 -1.442695, %v2703_v31 }
0x146f   :  { %v2726_v29 = vpop.permute.xlu0 %2725 }
0x1470   :  { %v2728_v51 = vadd.f32 %v2726_v29, %v5307_v28  ;;  %v5347_v63 = vpop.f32.mrf.mxu0 }
0x1472   :  { %4222 = vtanh.f32 %v2728_v51 }
0x1473   :  { %4224 = vpow2.f32 %v4007_v38 }
0x1478   :  { %v4223_v37 = vpop.eup %4222 }
0x1479   :  { %v2730_v15 = vsub.f32 0.0, %v4223_v37  ;;  %v4225_v32 = vpop.eup %4224 }
0x147a   :  { %v2707_v53 = vadd.f32 1.0, %v4225_v32 }
0x147b   :  { %2732 = vrot.lane.b32.xlu0 %v2730_v15, %s4445_s3 }
0x147c   :  { %4226 = vrcp.f32 %v2707_v53  ;;  %v2719_v60 = vand.u32 2147483648, %v2707_v53  ;;  %vm2713_vm10 = vweird.f32 %v2707_v53  ;;  %v2717_v49 = vand.u32 2147483647, %v2707_v53 }
0x147e   :  { %v2720_v59 = vor.u32 1.1754944e-38, %v2719_v60  ;;  %vm2718_vm12 = vcmp.eq.f32.partialorder %v2717_v49, 8.507059e+37 }
0x1482   :  { %v4227_v33 = vpop.eup %4226 }
0x1483   :  { %v2709_v45 = vmul.f32 %v4227_v33, %v2707_v53  ;;  %vm2714_vm9 = vweird.f32 %v4227_v33 }
0x1484   :  { %vm2715_vm11 = vmor %vm2713_vm10, %vm2714_vm9 }
0x1485   :  { %v2710_v55 = vsub.f32 1.0, %v2709_v45 }
0x1487   :  { %v2711_v48 = vmul.f32 %v4227_v33, %v2710_v55 }
0x1489   :  { %v2712_v0 = vadd.f32 %v4227_v33, %v2711_v48 }
0x148b   :  { %v2716_v42 = vsel %vm2715_vm11, %v4227_v33, %v2712_v0 }
0x148c   :  { %v2721_v57 = vsel %vm2718_vm12, %v2720_v59, %v2716_v42 }
0x14ed   :  { %v2733_v12 = vpop.permute.xlu0 %2732 }
0x14ee   :  { %v2735_v11 = vmul.f32 %v2733_v12, %v2721_v57 }
0x14f0   :  { %2737 = vrot.lane.b32.xlu1 %v2735_v11, %s4444_s1 }
0x1562   :  { %v2738_v13 = vpop.permute.xlu1 %2737 }
0x1563   :  { %v2740_v14 = vadd.f32 %v4223_v37, %v2738_v13 }
0x1565   :  { %2872 = vrot.lane.b32.xlu2 %v2740_v14, %s4443_s0 }
0x15bf   :  { %v2873_v52 = vpop.permute.xlu2 %2872 }
0x15c0   :  { %4010 = vmatmul.msk.f32.vlgmr.msrb.gmra.mxu2 %vm196_vm2, %v2873_v52  ;;  %4011 = vmatmul.msk.f32.vlgmr.msrb.gmra.mxu3 %vm196_vm2, %v2873_v52 }
0x15c1   :  { %4012 = vmatmul.msk.f32.vlgmr.msrb.gmra.mxu0 %vm196_vm2, %v2873_v52  ;;  %3206 = vmatpush.msrb.mxu2 %v5213_v10 }
0x15c2   :  { %3305 = vmatpush.msrb.mxu3 %v5200_v62  ;;  %3325 = vmatpush.msrb.mxu0 %v5229_v20 }
0x15c3   :  { %3207 = vmatpush.msrb.mxu2 %v5220_v24 }
0x15c4   :  { %3306 = vmatpush.msrb.mxu3 %v5203_v4  ;;  %3326 = vmatpush.msrb.mxu0 %v5234_v35 }
0x15c5   :  { %3208 = vmatpush.msrb.mxu2 %v5231_v30 }
0x15c6   :  { %3307 = vmatpush.msrb.mxu3 %v5206_v6  ;;  %3327 = vmatpush.msrb.mxu0 %v5237_v17 }
0x15c7   :  { %3209 = vmatpush.msrb.mxu2 %v5239_v40 }
0x15c8   :  { %3308 = vmatpush.msrb.mxu3 %v5209_v34  ;;  %3328 = vmatpush.msrb.mxu0 %v5243_v2 }
0x163e   :  { %v2933_v22 = vpop.f32.mrf.mxu0 }
0x163f   :  { %v2934_v29 = vadd.f32 %v2933_v22, %v5300_v25 }
0x1641   :  { %v2985_v31 = vrot.slane %v2934_v29, 6 }
0x1643   :  { %v2893_v36 = vpop.f32.mrf.mxu2  ;;  %v2913_v54 = vpop.f32.mrf.mxu3 }
0x1644   :  { %v2937_v56 = vrot.slane %v2893_v36, 6  ;;  %v2960_v39 = vrot.slane %v2913_v54, 6 }
0x1646   :  { %v2939_v5 = vadd.f32 %v2937_v56, %v5288_v46  ;;  %2961 = vrot.lane.b32.xlu1 %v2960_v39, %s4444_s1 }
0x1648   :  { %v4013_v58 = vmul.f32 -1.442695, %v2939_v5 }
0x164a   :  { %4228 = vpow2.f32 %v4013_v58 }
0x1650   :  { %v4229_v9 = vpop.eup %4228 }
0x1651   :  { %v2943_v7 = vadd.f32 1.0, %v4229_v9 }
0x1653   :  { %4230 = vrcp.f32 %v2943_v7  ;;  %v2955_v27 = vand.u32 2147483648, %v2943_v7  ;;  %v2953_v37 = vand.u32 2147483647, %v2943_v7  ;;  %vm2949_vm14 = vweird.f32 %v2943_v7 }
0x1655   :  { %v2956_v50 = vor.u32 1.1754944e-38, %v2955_v27  ;;  %vm2954_vm0 = vcmp.eq.f32.partialorder %v2953_v37, 8.507059e+37 }
0x1659   :  { %v4231_v21 = vpop.eup %4230 }
0x165a   :  { %v2945_v8 = vmul.f32 %v4231_v21, %v2943_v7  ;;  %vm2950_vm13 = vweird.f32 %v4231_v21 }
0x165b   :  { %vm2951_vm15 = vmor %vm2949_vm14, %vm2950_vm13 }
0x165c   :  { %v2946_v26 = vsub.f32 1.0, %v2945_v8 }
0x165e   :  { %v2947_v51 = vmul.f32 %v4231_v21, %v2946_v26 }
0x1660   :  { %v2948_v15 = vadd.f32 %v4231_v21, %v2947_v51 }
0x1662   :  { %v2952_v38 = vsel %vm2951_vm15, %v4231_v21, %v2948_v15  ;;  %v5371_v21 = vpop.f32.mrf.mxu1 }
0x1663   :  { %v2957_v32 = vsel %vm2954_vm0, %v2956_v50, %v2952_v38 }
0x1664   :  { %v2987_v53 = vmul.f32 %v2985_v31, %v2957_v32 }
0x1666   :  { %2989 = vrot.lane.b32.xlu0 %v2987_v53, %s4443_s0 }
0x16b8   :  { %v2962_v49 = vpop.permute.xlu1 %2961 }
0x16b9   :  { %v2964_v42 = vadd.f32 %v2962_v49, %v5314_v44 }
0x16bb   :  { %v4014_v59 = vmul.f32 -1.442695, %v2964_v42 }
0x16d8   :  { %v2990_v33 = vpop.permute.xlu0 %2989 }
0x16d9   :  { %v2992_v45 = vadd.f32 %v2990_v33, %v5307_v28 }
0x16db   :  { %4232 = vtanh.f32 %v2992_v45 }
0x16dc   :  { %4234 = vpow2.f32 %v4014_v59 }
0x16e1   :  { %v4233_v55 = vpop.eup %4232 }
0x16e2   :  { %v2995_v48 = vrot.slane %v4233_v55, 2  ;;  %v4235_v12 = vpop.eup %4234 }
0x16e3   :  { %v2968_v57 = vadd.f32 1.0, %v4235_v12 }
0x16e4   :  { %v2997_v0 = vsub.f32 %v2740_v14, %v2995_v48 }
0x16e5   :  { %4236 = vrcp.f32 %v2968_v57  ;;  %v2980_v13 = vand.u32 2147483648, %v2968_v57  ;;  %vm2974_vm4 = vweird.f32 %v2968_v57  ;;  %v2978_v14 = vand.u32 2147483647, %v2968_v57 }
0x16e6   :  { %v2999_v60 = vrot.slane %v2997_v0, 6 }
0x16e7   :  { %v2981_v36 = vor.u32 1.1754944e-38, %v2980_v13  ;;  %vm2979_vm1 = vcmp.eq.f32.partialorder %v2978_v14, 8.507059e+37 }
0x16e8   :  { %3000 = vrot.lane.b32.xlu2 %v2999_v60, %s4445_s3 }
0x16eb   :  { %v4237_v11 = vpop.eup %4236 }
0x16ec   :  { %v2970_v16 = vmul.f32 %v4237_v11, %v2968_v57  ;;  %vm2975_vm3 = vweird.f32 %v4237_v11 }
0x16ed   :  { %vm2976_vm5 = vmor %vm2974_vm4, %vm2975_vm3 }
0x16ee   :  { %v2971_v41 = vsub.f32 1.0, %v2970_v16 }
0x16f0   :  { %v2972_v43 = vmul.f32 %v4237_v11, %v2971_v41 }
0x16f2   :  { %v2973_v3 = vadd.f32 %v4237_v11, %v2972_v43 }
0x16f4   :  { %v2977_v52 = vsel %vm2976_vm5, %v4237_v11, %v2973_v3 }
0x16f5   :  { %v2982_v54 = vsel %vm2979_vm1, %v2981_v36, %v2977_v52 }
0x1742   :  { %v3001_v56 = vpop.permute.xlu2 %3000 }
0x1743   :  { %v3003_v39 = vmul.f32 %v3001_v56, %v2982_v54 }
0x1745   :  { %3005 = vrot.lane.b32.xlu0 %v3003_v39, %s4444_s1 }
0x17b7   :  { %v3006_v5 = vpop.permute.xlu0 %3005 }
0x17b8   :  { %v3008_v58 = vadd.f32 %v4233_v55, %v3006_v5 }
0x17ba   :  { %v3010_v9 = vrot.slane %v3008_v58, 2 }
0x17bc   :  { %3011 = vrot.lane.b32.xlu1 %v3010_v9, %s4443_s0 }
0x182e   :  { %v3012_v7 = vpop.permute.xlu1 %3011 }
0x182f   :  { %4015 = vmatmul.msk.f32.vlgmr.msrb.gmra.mxu1 %vm196_vm2, %v3012_v7  ;;  %4016 = vmatmul.msk.f32.vlgmr.msra.gmra.mxu2 %vm196_vm2, %v3012_v7 }
0x1830   :  { %4017 = vmatmul.msk.f32.vlgmr.msra.gmra.mxu3 %vm196_vm2, %v3012_v7  ;;  %3345 = vmatpush.msrb.mxu1 %v5213_v10 }
0x1831   :  { %3436 = vmatpush.msra.mxu2 %v5200_v62  ;;  %3456 = vmatpush.msra.mxu3 %v5229_v20 }
0x1832   :  { %3346 = vmatpush.msrb.mxu1 %v5220_v24 }
0x1833   :  { %3437 = vmatpush.msra.mxu2 %v5203_v4  ;;  %3457 = vmatpush.msra.mxu3 %v5234_v35 }
0x1834   :  { %3347 = vmatpush.msrb.mxu1 %v5231_v30 }
0x1835   :  { %3438 = vmatpush.msra.mxu2 %v5206_v6  ;;  %3458 = vmatpush.msra.mxu3 %v5237_v17 }
0x1836   :  { %3348 = vmatpush.msrb.mxu1 %v5239_v40 }
0x1837   :  { %3439 = vmatpush.msra.mxu2 %v5209_v34  ;;  %3459 = vmatpush.msra.mxu3 %v5243_v2 }
0x18ac   :  { %v3032_v8 = vpop.f32.mrf.mxu1 }
0x18ad   :  { %v3076_v22 = vrot.slane %v3032_v8, 4 }
0x18af   :  { %v3078_v26 = vadd.f32 %v3076_v22, %v5288_v46 }
0x18b1   :  { %v4018_v27 = vmul.f32 -1.442695, %v3078_v26 }
0x18b2   :  { %v3052_v29 = vpop.f32.mrf.mxu2 }
0x18b3   :  { %4238 = vpow2.f32 %v4018_v27  ;;  %v3099_v51 = vrot.slane %v3052_v29, 4  ;;  %v3072_v38 = vpop.f32.mrf.mxu3 }
0x18b4   :  { %v3073_v33 = vadd.f32 %v3072_v38, %v5300_v25 }
0x18b5   :  { %3100 = vrot.lane.b32.xlu0 %v3099_v51, %s4444_s1 }
0x18b6   :  { %v3124_v49 = vrot.slane %v3073_v33, 4 }
0x18b9   :  { %v4239_v37 = vpop.eup %4238 }
0x18ba   :  { %v3082_v15 = vadd.f32 1.0, %v4239_v37 }
0x18bc   :  { %4240 = vrcp.f32 %v3082_v15  ;;  %v3094_v53 = vand.u32 2147483648, %v3082_v15  ;;  %v3092_v55 = vand.u32 2147483647, %v3082_v15  ;;  %vm3088_vm7 = vweird.f32 %v3082_v15 }
0x18be   :  { %v3095_v0 = vor.u32 1.1754944e-38, %v3094_v53  ;;  %vm3093_vm9 = vcmp.eq.f32.partialorder %v3092_v55, 8.507059e+37 }
0x18c2   :  { %v4241_v50 = vpop.eup %4240 }
0x18c3   :  { %v3084_v31 = vmul.f32 %v4241_v50, %v3082_v15  ;;  %vm3089_vm6 = vweird.f32 %v4241_v50 }
0x18c4   :  { %vm3090_vm8 = vmor %vm3088_vm7, %vm3089_vm6 }
0x18c5   :  { %v3085_v32 = vsub.f32 1.0, %v3084_v31 }
0x18c7   :  { %v3086_v45 = vmul.f32 %v4241_v50, %v3085_v32 }
0x18c9   :  { %v3087_v48 = vadd.f32 %v4241_v50, %v3086_v45 }
0x18cb   :  { %v3091_v60 = vsel %vm3090_vm8, %v4241_v50, %v3087_v48 }
0x18cc   :  { %v3096_v42 = vsel %vm3093_vm9, %v3095_v0, %v3091_v60 }
0x18cd   :  { %v3126_v59 = vmul.f32 %v3124_v49, %v3096_v42 }
0x18cf   :  { %3128 = vrot.lane.b32.xlu2 %v3126_v59, %s4443_s0 }
0x1927   :  { %v3101_v3 = vpop.permute.xlu0 %3100 }
0x1928   :  { %v3103_v13 = vadd.f32 %v3101_v3, %v5314_v44 }
0x1929   :  { %v3129_v12 = vpop.permute.xlu2 %3128 }
0x192a   :  { %v3131_v57 = vadd.f32 %v3129_v12, %v5307_v28  ;;  %v4019_v14 = vmul.f32 -1.442695, %v3103_v13 }
0x192c   :  { %4242 = vtanh.f32 %v3131_v57 }
0x192d   :  { %4244 = vpow2.f32 %v4019_v14 }
0x1932   :  { %v4243_v11 = vpop.eup %4242 }
0x1933   :  { %v3134_v16 = vrot.slane %v4243_v11, 2  ;;  %v4245_v52 = vpop.eup %4244 }
0x1934   :  { %v3107_v36 = vadd.f32 1.0, %v4245_v52 }
0x1935   :  { %v3136_v41 = vsub.f32 %v3008_v58, %v3134_v16 }
0x1936   :  { %4246 = vrcp.f32 %v3107_v36  ;;  %v3119_v7 = vand.u32 2147483648, %v3107_v36  ;;  %vm3113_vm11 = vweird.f32 %v3107_v36  ;;  %v3117_v58 = vand.u32 2147483647, %v3107_v36 }
0x1937   :  { %v3138_v43 = vrot.slane %v3136_v41, 6 }
0x1938   :  { %v3120_v22 = vor.u32 1.1754944e-38, %v3119_v7  ;;  %vm3118_vm13 = vcmp.eq.f32.partialorder %v3117_v58, 8.507059e+37 }
0x1939   :  { %3139 = vrot.lane.b32.xlu1 %v3138_v43, %s4445_s3 }
0x193c   :  { %v4247_v54 = vpop.eup %4246 }
0x193d   :  { %v3109_v56 = vmul.f32 %v4247_v54, %v3107_v36  ;;  %vm3114_vm10 = vweird.f32 %v4247_v54 }
0x193e   :  { %vm3115_vm12 = vmor %vm3113_vm11, %vm3114_vm10 }
0x193f   :  { %v3110_v39 = vsub.f32 1.0, %v3109_v56 }
0x1941   :  { %v3111_v5 = vmul.f32 %v4247_v54, %v3110_v39 }
0x1943   :  { %v3112_v9 = vadd.f32 %v4247_v54, %v3111_v5 }
0x1945   :  { %v3116_v8 = vsel %vm3115_vm12, %v4247_v54, %v3112_v9 }
0x1946   :  { %v3121_v26 = vsel %vm3118_vm13, %v3120_v22, %v3116_v8 }
0x19ab   :  { %v3140_v27 = vpop.permute.xlu1 %3139 }
0x19ac   :  { %v3142_v29 = vmul.f32 %v3140_v27, %v3121_v26 }
0x19ae   :  { %3144 = vrot.lane.b32.xlu2 %v3142_v29, %s4444_s1 }
0x1a08   :  { %v3145_v51 = vpop.permute.xlu2 %3144 }
0x1a09   :  { %v3147_v37 = vadd.f32 %v4243_v11, %v3145_v51 }
0x1a0b   :  { %v3149_v15 = vrot.slane %v3147_v37, 4 }
0x1a0d   :  { %3150 = vrot.lane.b32.xlu0 %v3149_v15, %s4443_s0 }
0x1a7f   :  { %v3151_v50 = vpop.permute.xlu0 %3150 }
0x1a80   :  { %4020 = vmatmul.msk.f32.vlgmr.msra.gmra.mxu0 %vm196_vm2, %v3151_v50  ;;  %4021 = vmatmul.msk.f32.vlgmr.msra.gmra.mxu1 %vm196_vm2, %v3151_v50 }
0x1a81   :  { %4022 = vmatmul.msk.f32.vlgmr.msrb.gmra.mxu2 %vm196_vm2, %v3151_v50  ;;  %3476 = vmatpush.msra.mxu0 %v5213_v10 }
0x1a82   :  { %3575 = vmatpush.msra.mxu1 %v5200_v62  ;;  %3595 = vmatpush.msrb.mxu2 %v5229_v20 }
0x1a83   :  { %3477 = vmatpush.msra.mxu0 %v5220_v24 }
0x1a84   :  { %3576 = vmatpush.msra.mxu1 %v5203_v4  ;;  %3596 = vmatpush.msrb.mxu2 %v5234_v35 }
0x1a85   :  { %3478 = vmatpush.msra.mxu0 %v5231_v30 }
0x1a86   :  { %3577 = vmatpush.msra.mxu1 %v5206_v6  ;;  %3597 = vmatpush.msrb.mxu2 %v5237_v17 }
0x1a87   :  { %3479 = vmatpush.msra.mxu0 %v5239_v40 }
0x1a88   :  { %3578 = vmatpush.msra.mxu1 %v5209_v34  ;;  %3598 = vmatpush.msrb.mxu2 %v5243_v2 }
0x1afd   :  { %v3171_v31 = vpop.f32.mrf.mxu0  ;;  %v3191_v38 = vpop.f32.mrf.mxu1 }
0x1afe   :  { %v3215_v32 = vrot.slane %v3171_v31, 2  ;;  %v3238_v53 = vrot.slane %v3191_v38, 2 }
0x1b00   :  { %v3217_v33 = vadd.f32 %v3215_v32, %v5288_v46  ;;  %3239 = vrot.lane.b32.xlu2 %v3238_v53, %s4444_s1 }
0x1b02   :  { %v4023_v45 = vmul.f32 -1.442695, %v3217_v33 }
0x1b04   :  { %4248 = vpow2.f32 %v4023_v45  ;;  %v3211_v49 = vpop.f32.mrf.mxu2 }
0x1b05   :  { %v3212_v12 = vadd.f32 %v3211_v49, %v5300_v25 }
0x1b07   :  { %v3263_v43 = vrot.slane %v3212_v12, 2 }
0x1b0a   :  { %v4249_v55 = vpop.eup %4248 }
0x1b0b   :  { %v3221_v48 = vadd.f32 1.0, %v4249_v55 }
0x1b0d   :  { %4250 = vrcp.f32 %v3221_v48  ;;  %v3233_v59 = vand.u32 2147483648, %v3221_v48  ;;  %v3231_v11 = vand.u32 2147483647, %v3221_v48  ;;  %vm3227_vm15 = vweird.f32 %v3221_v48 }
0x1b0f   :  { %v3234_v46 = vor.u32 1.1754944e-38, %v3233_v59  ;;  %vm3232_vm3 = vcmp.eq.f32.partialorder %v3231_v11, 8.507059e+37  ;;  %v5427_v11 = vadd.f32 %v5304_v23, %v5291_v47 }
0x1b13   :  { %v4251_v0 = vpop.eup %4250 }
0x1b14   :  { %v3223_v60 = vmul.f32 %v4251_v0, %v3221_v48  ;;  %vm3228_vm14 = vweird.f32 %v4251_v0 }
0x1b15   :  { %vm3229_vm0 = vmor %vm3227_vm15, %vm3228_vm14 }
0x1b16   :  { %v3224_v42 = vsub.f32 1.0, %v3223_v60 }
0x1b18   :  { %v3225_v57 = vmul.f32 %v4251_v0, %v3224_v42 }
0x1b1a   :  { %v3226_v16 = vadd.f32 %v4251_v0, %v3225_v57 }
0x1b1c   :  { %v3230_v41 = vsel %vm3229_vm0, %v4251_v0, %v3226_v16 }
0x1b1d   :  { %v3235_v3 = vsel %vm3232_vm3, %v3234_v46, %v3230_v41 }
0x1b1e   :  { %v3265_v13 = vmul.f32 %v3263_v43, %v3235_v3 }
0x1b20   :  { %3267 = vrot.lane.b32.xlu1 %v3265_v13, %s4443_s0 }
0x1b5a   :  { %v3240_v5 = vpop.permute.xlu2 %3239 }
0x1b5b   :  { %v3242_v9 = vadd.f32 %v3240_v5, %v5314_v44 }
0x1b5d   :  { %v4024_v7 = vmul.f32 -1.442695, %v3242_v9 }
0x1b92   :  { %v3268_v14 = vpop.permute.xlu1 %3267 }
0x1b93   :  { %v3270_v52 = vadd.f32 %v3268_v14, %v5307_v28 }
0x1b95   :  { %4252 = vtanh.f32 %v3270_v52  ;;  %v5433_v52 = vadd.f32 %v5311_v61, %v5291_v47 }
0x1b96   :  { %4254 = vpow2.f32 %v4024_v7 }
0x1b9b   :  { %v4253_v36 = vpop.eup %4252 }
0x1b9c   :  { %v3273_v54 = vrot.slane %v4253_v36, 2  ;;  %v4255_v58 = vpop.eup %4254 }
0x1b9d   :  { %v3246_v8 = vadd.f32 1.0, %v4255_v58 }
0x1b9e   :  { %v3275_v56 = vsub.f32 %v3147_v37, %v3273_v54 }
0x1b9f   :  { %4256 = vrcp.f32 %v3246_v8  ;;  %v3258_v51 = vand.u32 2147483648, %v3246_v8  ;;  %vm3252_vm5 = vweird.f32 %v3246_v8  ;;  %v3256_v37 = vand.u32 2147483647, %v3246_v8 }
0x1ba0   :  { %v3277_v39 = vrot.slane %v3275_v56, 6 }
0x1ba1   :  { %v3259_v50 = vor.u32 1.1754944e-38, %v3258_v51  ;;  %vm3257_vm6 = vcmp.eq.f32.partialorder %v3256_v37, 8.507059e+37 }
0x1ba2   :  { %3278 = vrot.lane.b32.xlu0 %v3277_v39, %s4445_s3 }
0x1ba5   :  { %v4257_v22 = vpop.eup %4256 }
0x1ba6   :  { %v3248_v26 = vmul.f32 %v4257_v22, %v3246_v8  ;;  %vm3253_vm4 = vweird.f32 %v4257_v22 }
0x1ba7   :  { %vm3254_vm1 = vmor %vm3252_vm5, %vm3253_vm4 }
0x1ba8   :  { %v3249_v27 = vsub.f32 1.0, %v3248_v26 }
0x1baa   :  { %v3250_v29 = vmul.f32 %v4257_v22, %v3249_v27 }
0x1bac   :  { %v3251_v28 = vadd.f32 %v4257_v22, %v3250_v29 }
0x1bae   :  { %v3255_v15 = vsel %vm3254_vm1, %v4257_v22, %v3251_v28 }
0x1baf   :  { %v3260_v31 = vsel %vm3257_vm6, %v3259_v50, %v3255_v15  ;;  %v4332_v15 = vld [vmem:[#allocation8 + $0x58] sm:$0xff]  ;;  %v4333_v50 = vld [vmem:[#allocation8 + $0x50] sm:$0xff] }
0x1c14   :  { %v3279_v44 = vpop.permute.xlu0 %3278 }
0x1c15   :  { %v3281_v38 = vmul.f32 %v3279_v44, %v3260_v31 }
0x1c17   :  { %3283 = vrot.lane.b32.xlu1 %v3281_v38, %s4444_s1 }
0x1c89   :  { %v3284_v32 = vpop.permute.xlu1 %3283 }
0x1c8a   :  { %v3286_v53 = vadd.f32 %v4253_v36, %v3284_v32 }
0x1c8c   :  { %v3288_v33 = vrot.slane %v3286_v53, 6 }
0x1c8e   :  { %3289 = vrot.lane.b32.xlu2 %v3288_v33, %s4443_s0 }
0x1ce8   :  { %v3290_v45 = vpop.permute.xlu2 %3289 }
0x1ce9   :  { %4025 = vmatmul.msk.f32.vlgmr.msrb.gmra.mxu3 %vm196_vm2, %v3290_v45  ;;  %4026 = vmatmul.msk.f32.vlgmr.msrb.gmra.mxu0 %vm196_vm2, %v3290_v45 }
0x1cea   :  { %4027 = vmatmul.msk.f32.vlgmr.msrb.gmra.mxu1 %vm196_vm2, %v3290_v45  ;;  %3615 = vmatpush.msrb.mxu3 %v5213_v10 }
0x1ceb   :  { %3714 = vmatpush.msrb.mxu0 %v5200_v62  ;;  %3734 = vmatpush.msrb.mxu1 %v5229_v20 }
0x1cec   :  { %3616 = vmatpush.msrb.mxu3 %v5220_v24 }
0x1ced   :  { %3715 = vmatpush.msrb.mxu0 %v5203_v4  ;;  %3735 = vmatpush.msrb.mxu1 %v5234_v35 }
0x1cee   :  { %3617 = vmatpush.msrb.mxu3 %v5231_v30 }
0x1cef   :  { %3716 = vmatpush.msrb.mxu0 %v5206_v6  ;;  %3736 = vmatpush.msrb.mxu1 %v5237_v17 }
0x1cf0   :  { %3618 = vmatpush.msrb.mxu3 %v5239_v40 }
0x1cf1   :  { %3717 = vmatpush.msrb.mxu0 %v5209_v34  ;;  %3737 = vmatpush.msrb.mxu1 %v5243_v2 }
0x1d66   :  { %v3330_v62 = vpop.f32.mrf.mxu0 }
0x1d67   :  { %3374 = vrot.lane.b32.xlu1 %v3330_v62, %s4444_s1  ;;  %v3350_v60 = vpop.f32.mrf.mxu1 }
0x1d68   :  { %v3351_v42 = vadd.f32 %v3350_v60, %v5300_v25 }
0x1d6c   :  { %v3310_v10 = vpop.f32.mrf.mxu3 }
0x1d6d   :  { %v3353_v4 = vadd.f32 %v3310_v10, %v5294_v19 }
0x1d6f   :  { %v4028_v24 = vmul.f32 -1.442695, %v3353_v4 }
0x1d71   :  { %4258 = vpow2.f32 %v4028_v24 }
0x1d77   :  { %v4259_v20 = vpop.eup %4258 }
0x1d78   :  { %v3357_v35 = vadd.f32 1.0, %v4259_v20 }
0x1d7a   :  { %4260 = vrcp.f32 %v3357_v35  ;;  %v3369_v48 = vand.u32 2147483648, %v3357_v35  ;;  %v3367_v34 = vand.u32 2147483647, %v3357_v35  ;;  %vm3363_vm8 = vweird.f32 %v3357_v35 }
0x1d7c   :  { %v3370_v49 = vor.u32 1.1754944e-38, %v3369_v48  ;;  %vm3368_vm10 = vcmp.eq.f32.partialorder %v3367_v34, 8.507059e+37 }
0x1d80   :  { %v4261_v6 = vpop.eup %4260 }
0x1d81   :  { %v3359_v55 = vmul.f32 %v4261_v6, %v3357_v35  ;;  %vm3364_vm7 = vweird.f32 %v4261_v6 }
0x1d82   :  { %vm3365_vm9 = vmor %vm3363_vm8, %vm3364_vm7 }
0x1d83   :  { %v3360_v17 = vsub.f32 1.0, %v3359_v55 }
0x1d85   :  { %v3361_v0 = vmul.f32 %v4261_v6, %v3360_v17 }
0x1d87   :  { %v3362_v2 = vadd.f32 %v4261_v6, %v3361_v0 }
0x1d89   :  { %v3366_v59 = vsel %vm3365_vm9, %v4261_v6, %v3362_v2 }
0x1d8a   :  { %v3371_v12 = vsel %vm3368_vm10, %v3370_v49, %v3366_v59 }
0x1d8b   :  { %v3397_v57 = vmul.f32 %v3371_v12, %v3351_v42 }
0x1d8d   :  { %3399 = vrot.lane.b32.xlu0 %v3397_v57, %s4443_s0 }
0x1dd9   :  { %v3375_v14 = vpop.permute.xlu1 %3374 }
0x1dda   :  { %v3377_v36 = vadd.f32 %v3375_v14, %v5433_v52 }
0x1ddc   :  { %v4029_v54 = vmul.f32 -1.442695, %v3377_v36 }
0x1dff   :  { %v3400_v16 = vpop.permute.xlu0 %3399 }
0x1e00   :  { %v3402_v46 = vadd.f32 %v3400_v16, %v5427_v11 }
0x1e02   :  { %4262 = vtanh.f32 %v3402_v46 }
0x1e03   :  { %4264 = vpow2.f32 %v4029_v54 }
0x1e08   :  { %v4263_v41 = vpop.eup %4262 }
0x1e09   :  { %v3405_v43 = vrot.slane %v4263_v41, 2  ;;  %v4265_v23 = vpop.eup %4264 }
0x1e0a   :  { %v3381_v56 = vadd.f32 1.0, %v4265_v23 }
0x1e0b   :  { %v3407_v3 = vsub.f32 %v3286_v53, %v3405_v43 }
0x1e0c   :  { %4266 = vrcp.f32 %v3381_v56  ;;  %v3393_v8 = vand.u32 2147483648, %v3381_v56  ;;  %vm3387_vm12 = vweird.f32 %v3381_v56  ;;  %v3391_v22 = vand.u32 2147483647, %v3381_v56 }
0x1e0d   :  { %v3409_v13 = vrot.slane %v3407_v3, 6 }
0x1e0e   :  { %v3394_v47 = vor.u32 1.1754944e-38, %v3393_v8  ;;  %vm3392_vm14 = vcmp.eq.f32.partialorder %v3391_v22, 8.507059e+37 }
0x1e0f   :  { %3410 = vrot.lane.b32.xlu2 %v3409_v13, %s4445_s3 }
0x1e12   :  { %v4267_v39 = vpop.eup %4266 }
0x1e13   :  { %v3383_v5 = vmul.f32 %v4267_v39, %v3381_v56  ;;  %vm3388_vm11 = vweird.f32 %v4267_v39 }
0x1e14   :  { %vm3389_vm13 = vmor %vm3387_vm12, %vm3388_vm11 }
0x1e15   :  { %v3384_v9 = vsub.f32 1.0, %v3383_v5 }
0x1e17   :  { %v3385_v7 = vmul.f32 %v4267_v39, %v3384_v9 }
0x1e19   :  { %v3386_v58 = vadd.f32 %v4267_v39, %v3385_v7 }
0x1e1b   :  { %v3390_v26 = vsel %vm3389_vm13, %v4267_v39, %v3386_v58 }
0x1e1c   :  { %v3395_v61 = vsel %vm3392_vm14, %v3394_v47, %v3390_v26 }
0x1e69   :  { %v3411_v27 = vpop.permute.xlu2 %3410 }
0x1e6a   :  { %v3413_v29 = vmul.f32 %v3411_v27, %v3395_v61 }
0x1e6c   :  { %3415 = vrot.lane.b32.xlu0 %v3413_v29, %s4444_s1 }
0x1ede   :  { %v3416_v28 = vpop.permute.xlu0 %3415 }
0x1edf   :  { %v3418_v51 = vadd.f32 %v4263_v41, %v3416_v28 }
0x1ee1   :  { %3420 = vrot.lane.b32.xlu1 %v3418_v51, %s4443_s0 }
0x1f53   :  { %v3421_v37 = vpop.permute.xlu1 %3420 }
0x1f54   :  { %4030 = vmatmul.msk.f32.vlgmr.msra.gmra.mxu2 %vm196_vm2, %v3421_v37  ;;  %4031 = vmatmul.msk.f32.vlgmr.msra.gmra.mxu3 %vm196_vm2, %v3421_v37 }
0x1f55   :  { %4032 = vmatmul.msk.f32.vlgmr.msra.gmra.mxu0 %vm196_vm2, %v3421_v37  ;;  %3754 = vmatpush.msra.mxu2 %v4332_v15 }
0x1f57   :  { %3755 = vmatpush.msra.mxu2 %v4333_v50 }
0x1f59   :  { %3756 = vmatpush.msra.mxu2 %v5231_v30 }
0x1f5b   :  { %3757 = vmatpush.msra.mxu2 %v5239_v40 }
0x1fd2   :  { %v3481_v24 = vpop.f32.mrf.mxu0 }
0x1fd3   :  { %v3482_v40 = vadd.f32 %v3481_v24, %v5300_v25 }
0x1fd5   :  { %v3533_v48 = vrot.slane %v3482_v40, 6 }
0x1fd7   :  { %v3441_v31 = vpop.f32.mrf.mxu2  ;;  %v3461_v44 = vpop.f32.mrf.mxu3 }
0x1fd8   :  { %v3485_v38 = vrot.slane %v3441_v31, 6  ;;  %v3508_v32 = vrot.slane %v3461_v44, 6 }
0x1fda   :  { %v3487_v53 = vadd.f32 %v3485_v38, %v5294_v19  ;;  %3509 = vrot.lane.b32.xlu0 %v3508_v32, %s4444_s1 }
0x1fdc   :  { %v4033_v33 = vmul.f32 -1.442695, %v3487_v53 }
0x1fde   :  { %4268 = vpow2.f32 %v4033_v33 }
0x1fe4   :  { %v4269_v45 = vpop.eup %4268 }
0x1fe5   :  { %v3491_v62 = vadd.f32 1.0, %v4269_v45 }
0x1fe7   :  { %4270 = vrcp.f32 %v3491_v62  ;;  %v3503_v30 = vand.u32 2147483648, %v3491_v62  ;;  %v3501_v6 = vand.u32 2147483647, %v3491_v62  ;;  %vm3497_vm0 = vweird.f32 %v3491_v62 }
0x1fe9   :  { %v3504_v17 = vor.u32 1.1754944e-38, %v3503_v30  ;;  %vm3502_vm4 = vcmp.eq.f32.partialorder %v3501_v6, 8.507059e+37 }
0x1fed   :  { %v4271_v10 = vpop.eup %4270 }
0x1fee   :  { %v3493_v4 = vmul.f32 %v4271_v10, %v3491_v62  ;;  %vm3498_vm15 = vweird.f32 %v4271_v10 }
0x1fef   :  { %vm3499_vm3 = vmor %vm3497_vm0, %vm3498_vm15 }
0x1ff0   :  { %v3494_v20 = vsub.f32 1.0, %v3493_v4 }
0x1ff2   :  { %v3495_v35 = vmul.f32 %v4271_v10, %v3494_v20 }
0x1ff4   :  { %v3496_v55 = vadd.f32 %v4271_v10, %v3495_v35 }
0x1ff6   :  { %v3500_v0 = vsel %vm3499_vm3, %v4271_v10, %v3496_v55 }
0x1ff7   :  { %v3505_v34 = vsel %vm3502_vm4, %v3504_v17, %v3500_v0 }
0x1ff8   :  { %v3535_v60 = vmul.f32 %v3533_v48, %v3505_v34 }
0x1ffa   :  { %3537 = vrot.lane.b32.xlu2 %v3535_v60, %s4443_s0  ;;  %v4334_v60 = vld [vmem:[%s5542_s6] sm:$0xff] }
0x204c   :  { %v3510_v16 = vpop.permute.xlu0 %3509 }
0x204d   :  { %v3512_v46 = vadd.f32 %v3510_v16, %v5433_v52 }
0x204f   :  { %v4034_v41 = vmul.f32 -1.442695, %v3512_v46 }
0x2054   :  { %v3538_v2 = vpop.permute.xlu2 %3537 }
0x2055   :  { %v3540_v49 = vadd.f32 %v3538_v2, %v5427_v11  ;;  %v2612_v2 = vperm.slane %v4334_v60, 6 }
0x2057   :  { %4272 = vtanh.f32 %v3540_v49  ;;  %v2606_v49 = vperm.slane %v4334_v60, 5 }
0x2058   :  { %4274 = vpow2.f32 %v4034_v41 }
0x205d   :  { %v4273_v42 = vpop.eup %4272 }
0x205e   :  { %v3543_v59 = vrot.slane %v4273_v42, 2  ;;  %v4275_v43 = vpop.eup %4274 }
0x205f   :  { %v3516_v3 = vadd.f32 1.0, %v4275_v43 }
0x2060   :  { %v3545_v12 = vsub.f32 %v3418_v51, %v3543_v59  ;;  %v2604_v59 = vperm.slane %v4334_v60, 4 }
0x2061   :  { %4276 = vrcp.f32 %v3516_v3  ;;  %v3528_v56 = vand.u32 2147483648, %v3516_v3  ;;  %vm3522_vm1 = vweird.f32 %v3516_v3  ;;  %v3526_v39 = vand.u32 2147483647, %v3516_v3 }
0x2062   :  { %v3547_v57 = vrot.slane %v3545_v12, 6  ;;  %v2605_v16 = vadd.f32 %v2604_v59, %v5296_v1 }
0x2063   :  { %v3529_v9 = vor.u32 1.1754944e-38, %v3528_v56  ;;  %vm3527_vm7 = vcmp.eq.f32.partialorder %v3526_v39, 8.507059e+37 }
0x2064   :  { %3548 = vrot.lane.b32.xlu1 %v3547_v57, %s4445_s3  ;;  %v2803_v57 = vrot.slane %v5343_v18, 2 }
0x2066   :  { %v2805_v41 = vadd.f32 %v2803_v57, %v2605_v16 }
0x2067   :  { %v4277_v13 = vpop.eup %4276 }
0x2068   :  { %v3518_v14 = vmul.f32 %v4277_v13, %v3516_v3  ;;  %vm3523_vm5 = vweird.f32 %v4277_v13  ;;  %v4008_v43 = vmul.f32 -1.442695, %v2805_v41 }
0x2069   :  { %vm3524_vm6 = vmor %vm3522_vm1, %vm3523_vm5 }
0x206a   :  { %v3519_v36 = vsub.f32 1.0, %v3518_v14 }
0x206c   :  { %v3520_v54 = vmul.f32 %v4277_v13, %v3519_v36 }
0x206e   :  { %v3521_v23 = vadd.f32 %v4277_v13, %v3520_v54 }
0x2070   :  { %v3525_v5 = vsel %vm3524_vm6, %v4277_v13, %v3521_v23 }
0x2071   :  { %v3530_v7 = vsel %vm3527_vm7, %v3529_v9, %v3525_v5 }
0x20d6   :  { %v3549_v58 = vpop.permute.xlu1 %3548 }
0x20d7   :  { %v3551_v8 = vmul.f32 %v3549_v58, %v3530_v7 }
0x20d9   :  { %3553 = vrot.lane.b32.xlu2 %v3551_v8, %s4444_s1 }
0x2133   :  { %v3554_v22 = vpop.permute.xlu2 %3553 }
0x2134   :  { %v3556_v26 = vadd.f32 %v4273_v42, %v3554_v22 }
0x2136   :  { %v3558_v47 = vrot.slane %v3556_v26, 2 }
0x2138   :  { %3559 = vrot.lane.b32.xlu0 %v3558_v47, %s4443_s0 }
0x21aa   :  { %v3560_v61 = vpop.permute.xlu0 %3559 }
0x21ab   :  { %4035 = vmatmul.msk.f32.vlgmr.msra.gmra.mxu1 %vm196_vm2, %v3560_v61  ;;  %4036 = vmatmul.msk.f32.vlgmr.msrb.gmra.mxu2 %vm196_vm2, %v3560_v61 }
0x21ac   :  { %4037 = vmatmul.msk.f32.vlgmr.msrb.gmra.mxu3 %vm196_vm2, %v3560_v61 }
0x2228   :  { %v3580_v27 = vpop.f32.mrf.mxu1 }
0x2229   :  { %v3624_v29 = vrot.slane %v3580_v27, 4 }
0x222b   :  { %v3626_v28 = vadd.f32 %v3624_v29, %v5294_v19 }
0x222d   :  { %v4038_v51 = vmul.f32 -1.442695, %v3626_v28 }
0x222e   :  { %v3600_v37 = vpop.f32.mrf.mxu2 }
0x222f   :  { %4278 = vpow2.f32 %v4038_v51  ;;  %v3647_v15 = vrot.slane %v3600_v37, 4  ;;  %v3620_v32 = vpop.f32.mrf.mxu3 }
0x2230   :  { %v3621_v45 = vadd.f32 %v3620_v32, %v5300_v25 }
0x2231   :  { %3648 = vrot.lane.b32.xlu2 %v3647_v15, %s4444_s1 }
0x2232   :  { %v3672_v30 = vrot.slane %v3621_v45, 4 }
0x2235   :  { %v4279_v50 = vpop.eup %4278 }
0x2236   :  { %v3630_v31 = vadd.f32 1.0, %v4279_v50 }
0x2238   :  { %4280 = vrcp.f32 %v3630_v31  ;;  %v3642_v33 = vand.u32 2147483648, %v3630_v31  ;;  %v3640_v10 = vand.u32 2147483647, %v3630_v31  ;;  %vm3636_vm9 = vweird.f32 %v3630_v31 }
0x223a   :  { %v3643_v24 = vor.u32 1.1754944e-38, %v3642_v33  ;;  %vm3641_vm11 = vcmp.eq.f32.partialorder %v3640_v10, 8.507059e+37  ;;  %v2826_v33 = vrot.slane %v5347_v63, 2 }
0x223e   :  { %v4281_v44 = vpop.eup %4280 }
0x223f   :  { %v3632_v38 = vmul.f32 %v4281_v44, %v3630_v31  ;;  %vm3637_vm8 = vweird.f32 %v4281_v44 }
0x2240   :  { %vm3638_vm10 = vmor %vm3636_vm9, %vm3637_vm8 }
0x2241   :  { %v3633_v53 = vsub.f32 1.0, %v3632_v38 }
0x2243   :  { %v3634_v62 = vmul.f32 %v4281_v44, %v3633_v53 }
0x2245   :  { %v3635_v4 = vadd.f32 %v4281_v44, %v3634_v62 }
0x2247   :  { %v3639_v20 = vsel %vm3638_vm10, %v4281_v44, %v3635_v4 }
0x2248   :  { %v3644_v40 = vsel %vm3641_vm11, %v3643_v24, %v3639_v20 }
0x2249   :  { %v3674_v35 = vmul.f32 %v3672_v30, %v3644_v40 }
0x224b   :  { %3676 = vrot.lane.b32.xlu1 %v3674_v35, %s4443_s0 }
0x228b   :  { %v3649_v42 = vpop.permute.xlu2 %3648 }
0x228c   :  { %v3651_v12 = vadd.f32 %v3649_v42, %v5433_v52 }
0x228e   :  { %v4039_v46 = vmul.f32 -1.442695, %v3651_v12 }
0x22bd   :  { %v3677_v6 = vpop.permute.xlu1 %3676 }
0x22be   :  { %v3679_v55 = vadd.f32 %v3677_v6, %v5427_v11 }
0x22c0   :  { %4282 = vtanh.f32 %v3679_v55 }
0x22c1   :  { %4284 = vpow2.f32 %v4039_v46 }
0x22c2   :  { %4286 = vpow2.f32 %v4008_v43 }
0x22c6   :  { %v5460_v17 = vpop.eup %4282 }
0x22c7   :  { %v3682_v48 = vrot.slane %v5460_v17, 2  ;;  %v4285_v3 = vpop.eup %4284 }
0x22c8   :  { %v3655_v13 = vadd.f32 1.0, %v4285_v3  ;;  %v4287_v14 = vpop.eup %4286 }
0x22c9   :  { %v3684_v0 = vsub.f32 %v3556_v26, %v3682_v48  ;;  %v2809_v36 = vadd.f32 1.0, %v4287_v14  ;;  %v2781_v26 = vperm.slane %v4334_v60, 7 }
0x22ca   :  { %4288 = vrcp.f32 %v3655_v13  ;;  %v3667_v58 = vand.u32 2147483648, %v3655_v13  ;;  %vm3661_vm13 = vweird.f32 %v3655_v13  ;;  %v3665_v22 = vand.u32 2147483647, %v3655_v13 }
0x22cb   :  { %v3686_v34 = vrot.slane %v3684_v0, 6  ;;  %4290 = vrcp.f32 %v2809_v36  ;;  %v2821_v29 = vand.u32 2147483648, %v2809_v36  ;;  %v2800_v37 = vadd.f32 %v5371_v21, %v2781_v26 }
0x22cc   :  { %v3668_v61 = vor.u32 1.1754944e-38, %v3667_v58  ;;  %vm3666_vm0 = vcmp.eq.f32.partialorder %v3665_v22, 8.507059e+37  ;;  %vm2815_vm3 = vweird.f32 %v2809_v36  ;;  %v2819_v15 = vand.u32 2147483647, %v2809_v36 }
0x22cd   :  { %3687 = vrot.lane.b32.xlu0 %v3686_v34, %s4445_s3  ;;  %v2822_v44 = vor.u32 1.1754944e-38, %v2821_v29  ;;  %v2851_v38 = vrot.slane %v2800_v37, 2 }
0x22ce   :  { %vm2820_vm5 = vcmp.eq.f32.partialorder %v2819_v15, 8.507059e+37 }
0x22d0   :  { %v4289_v54 = vpop.eup %4288 }
0x22d1   :  { %v3657_v23 = vmul.f32 %v4289_v54, %v3655_v13  ;;  %v4291_v56 = vpop.eup %4290  ;;  %vm3662_vm12 = vweird.f32 %v4289_v54 }
0x22d2   :  { %v2811_v5 = vmul.f32 %v4291_v56, %v2809_v36  ;;  %vm3663_vm14 = vmor %vm3661_vm13, %vm3662_vm12  ;;  %vm2816_vm15 = vweird.f32 %v4291_v56 }
0x22d3   :  { %v3658_v39 = vsub.f32 1.0, %v3657_v23  ;;  %vm2817_vm4 = vmor %vm2815_vm3, %vm2816_vm15  ;;  %vm3900_vm3 = vcmask 25600  }
0x22d4   :  { %v2812_v18 = vsub.f32 1.0, %v2811_v5 }
0x22d5   :  { %2614 = vrot.lane.b32.xlu0 %v2612_v2, %s4443_s0  ;;  %v3659_v9 = vmul.f32 %v4289_v54, %v3658_v39 }
0x22d6   :  { %v2813_v8 = vmul.f32 %v4291_v56, %v2812_v18 }
0x22d7   :  { %v3660_v7 = vadd.f32 %v4289_v54, %v3659_v9 }
0x22d8   :  { %v2814_v27 = vadd.f32 %v4291_v56, %v2813_v8 }
0x22d9   :  { %v3664_v47 = vsel %vm3663_vm14, %v4289_v54, %v3660_v7 }
0x22da   :  { %v3669_v28 = vsel %vm3666_vm0, %v3668_v61, %v3664_v47  ;;  %v2818_v31 = vsel %vm2817_vm4, %v4291_v56, %v2814_v27 }
0x22db   :  { %v2823_v32 = vsel %vm2820_vm5, %v2822_v44, %v2818_v31 }
0x22dc   :  { %v2853_v53 = vmul.f32 %v2851_v38, %v2823_v32 }
0x22dd   :  { %2608 = vrot.lane.b32.xlu0 %v2606_v49, %s4444_s1 }
0x233f   :  { %v3688_v51 = vpop.permute.xlu0 %3687 }
0x2340   :  { %v3690_v50 = vmul.f32 %v3688_v51, %v3669_v28 }
0x2342   :  { %3692 = vrot.lane.b32.xlu1 %v3690_v50, %s4444_s1 }
0x2347   :  { %v2615_v10 = vpop.permute.xlu0 %2614 }
0x2348   :  { %v2617_v4 = vadd.f32 %v2615_v10, %v5296_v1  ;;  %v3842_v10 = vld [vmem:[%s5543_s7 + $0x38] sm:$0xff] }
0x2349   :  { %3861 = vmatpush.msra.mxu3 %v3842_v10 }
0x234a   :  { %2855 = vrot.lane.b32.xlu1 %v2853_v53, %s4443_s0 }
0x234f   :  { %v2609_v35 = vpop.permute.xlu0 %2608 }
0x2350   :  { %v2611_v55 = vadd.f32 %v2609_v35, %v5296_v1 }
0x2352   :  { %2827 = vrot.lane.b32.xlu1 %v2826_v33, %s4444_s1 }
0x23b4   :  { %v3693_v45 = vpop.permute.xlu1 %3692 }
0x23b5   :  { %v5478_v21 = vadd.f32 %v5460_v17, %v3693_v45 }
0x23b7   :  { %v3697_v62 = vrot.slane %v5478_v21, 4 }
0x23b9   :  { %3698 = vrot.lane.b32.xlu2 %v3697_v62, %s4443_s0 }
0x23bc   :  { %v2856_v24 = vpop.permute.xlu1 %2855 }
0x23bd   :  { %v2858_v20 = vadd.f32 %v2856_v24, %v2617_v4  ;;  %v3840_v4 = vld [vmem:[%s5543_s7 + $0x28] sm:$0xff] }
0x23bf   :  { %4292 = vtanh.f32 %v2858_v20 }
0x23c4   :  { %v2828_v6 = vpop.permute.xlu1 %2827 }
0x23c5   :  { %v5483_v30 = vpop.eup %4292  ;;  %v2830_v17 = vadd.f32 %v2828_v6, %v2611_v55 }
0x23c6   :  { %v2860_v63 = vsub.f32 0.0, %v5483_v30 }
0x23c7   :  { %v4009_v34 = vmul.f32 -1.442695, %v2830_v17 }
0x23c8   :  { %2862 = vrot.lane.b32.xlu0 %v2860_v63, %s4445_s3 }
0x23c9   :  { %4294 = vpow2.f32 %v4009_v34 }
0x23cf   :  { %v4295_v49 = vpop.eup %4294 }
0x23d0   :  { %v2834_v12 = vadd.f32 1.0, %v4295_v49  ;;  %v3837_v49 = vld [vmem:[%s5543_s7 + $0x10] sm:$0xff] }
0x23d2   :  { %v2846_v8 = vand.u32 2147483648, %v2834_v12  ;;  %vm2840_vm10 = vweird.f32 %v2834_v12  ;;  %v2844_v22 = vand.u32 2147483647, %v2834_v12 }
0x23d4   :  { %v2847_v47 = vor.u32 1.1754944e-38, %v2846_v8  ;;  %vm2845_vm12 = vcmp.eq.f32.partialorder %v2844_v22, 8.507059e+37 }
0x2413   :  { %v3699_v40 = vpop.permute.xlu2 %3698 }
0x2414   :  { %4040 = vmatmul.msk.f32.vlgmr.msrb.gmra.mxu0 %vm196_vm2, %v3699_v40  ;;  %4041 = vmatmul.msk.f32.vlgmr.msrb.gmra.mxu1 %vm196_vm2, %v3699_v40 }
0x2415   :  { %4042 = vmatmul.msk.f32.vlgmr.msra.gmra.mxu2 %vm196_vm2, %v3699_v40 }
0x243a   :  { %v2863_v61 = vpop.permute.xlu0 %2862 }
0x2491   :  { %v3719_v48 = vpop.f32.mrf.mxu0  ;;  %v3739_v7 = vpop.f32.mrf.mxu1 }
0x2492   :  { %v3763_v0 = vrot.slane %v3719_v48, 2 }
0x2494   :  { %v3765_v60 = vadd.f32 %v3763_v0, %v5294_v19 }
0x2496   :  { %v4043_v2 = vmul.f32 -1.442695, %v3765_v60 }
0x2498   :  { %4296 = vpow2.f32 %v4043_v2  ;;  %v3759_v46 = vpop.f32.mrf.mxu2  ;;  %v3838_v2 = vld [vmem:[%s5543_s7 + $0x18] sm:$0xff] }
0x2499   :  { %v3760_v3 = vadd.f32 %v3759_v46, %v5300_v25  ;;  %v3786_v25 = vrot.slane %v3739_v7, 2  ;;  %3887 = vmatpush.msra.mxu0 %v3838_v2 }
0x249b   :  { %v3811_v56 = vrot.slane %v3760_v3, 2  ;;  %3888 = vmatpush.msra.mxu0 %v3837_v49 }
0x249e   :  { %v4297_v42 = vpop.eup %4296 }
0x249f   :  { %v3769_v59 = vadd.f32 1.0, %v4297_v42  ;;  %v3836_v42 = vld [vmem:[%s5543_s7 + $0x8] sm:$0xff] }
0x24a0   :  { %3889 = vmatpush.msra.mxu0 %v3836_v42 }
0x24a1   :  { %4298 = vrcp.f32 %v3769_v59  ;;  %v3781_v43 = vand.u32 2147483648, %v3769_v59  ;;  %v3779_v19 = vand.u32 2147483647, %v3769_v59  ;;  %vm3775_vm6 = vweird.f32 %v3769_v59 }
0x24a2   :  { %4300 = vrcp.f32 %v2834_v12 }
0x24a3   :  { %v3782_v54 = vor.u32 1.1754944e-38, %v3781_v43  ;;  %vm3780_vm8 = vcmp.eq.f32.partialorder %v3779_v19, 8.507059e+37 }
0x24a7   :  { %v4299_v57 = vpop.eup %4298 }
0x24a8   :  { %v3771_v16 = vmul.f32 %v4299_v57, %v3769_v59  ;;  %v4301_v1 = vpop.eup %4300  ;;  %vm3776_vm1 = vweird.f32 %v4299_v57  ;;  %v3835_v59 = vld [vmem:[%s5543_s7] sm:$0xff] }
0x24a9   :  { %v2836_v14 = vmul.f32 %v4301_v1, %v2834_v12  ;;  %vm3777_vm7 = vmor %vm3775_vm6, %vm3776_vm1  ;;  %vm2841_vm9 = vweird.f32 %v4301_v1  ;;  %3890 = vmatpush.msra.mxu0 %v3835_v59 }
0x24aa   :  { %v3772_v41 = vsub.f32 1.0, %v3771_v16  ;;  %vm2842_vm11 = vmor %vm2840_vm10, %vm2841_vm9 }
0x24ab   :  { %v2837_v5 = vsub.f32 1.0, %v2836_v14 }
0x24ac   :  { %v3773_v13 = vmul.f32 %v4299_v57, %v3772_v41  ;;  %v4057_v41 = vld [vmem:[%s5544_s8] ss:$0 sm:$0xff] }
0x24ad   :  { %v2838_v18 = vmul.f32 %v4301_v1, %v2837_v5 }
0x24ae   :  { %v3774_v36 = vadd.f32 %v4299_v57, %v3773_v13 }
0x24af   :  { %v2839_v58 = vadd.f32 %v4301_v1, %v2838_v18 }
0x24b0   :  { %v3778_v23 = vsel %vm3777_vm7, %v4299_v57, %v3774_v36 }
0x24b1   :  { %v3783_v39 = vsel %vm3780_vm8, %v3782_v54, %v3778_v23  ;;  %v2843_v26 = vsel %vm2842_vm11, %v4301_v1, %v2839_v58 }
0x24b2   :  { %v3813_v9 = vmul.f32 %v3811_v56, %v3783_v39  ;;  %v2848_v27 = vsel %vm2845_vm12, %v2847_v47, %v2843_v26 }
0x24b3   :  { %v2865_v29 = vmul.f32 %v2863_v61, %v2848_v27 }
0x24b4   :  { %3815 = vrot.lane.b32.xlu2 %v3813_v9, %s4443_s0 }
0x24bc   :  { %3787 = vrot.lane.b32.xlu2 %v3786_v25, %s4444_s1 }
0x24c4   :  { %2867 = vrot.lane.b32.xlu2 %v2865_v29, %s4444_s1 }
0x250e   :  { %v3816_v28 = vpop.permute.xlu2 %3815 }
0x250f   :  { %v3818_v51 = vadd.f32 %v3816_v28, %v5427_v11 }
0x2511   :  { %4302 = vtanh.f32 %v3818_v51 }
0x2516   :  { %v3788_v37 = vpop.permute.xlu2 %3787 }
0x2517   :  { %v4303_v15 = vpop.eup %4302  ;;  %v3790_v33 = vadd.f32 %v3788_v37, %v5433_v52  ;;  %v3839_v52 = vld [vmem:[%s5543_s7 + $0x20] sm:$0xff] }
0x2518   :  { %v3821_v50 = vrot.slane %v4303_v15, 2 }
0x2519   :  { %v4044_v45 = vmul.f32 -1.442695, %v3790_v33 }
0x251a   :  { %v3823_v31 = vsub.f32 %v5478_v21, %v3821_v50  ;;  %v3841_v21 = vld [vmem:[%s5543_s7 + $0x30] sm:$0xff] }
0x251b   :  { %4304 = vpow2.f32 %v4044_v45  ;;  %3862 = vmatpush.msra.mxu3 %v3841_v21 }
0x251c   :  { %v3825_v44 = vrot.slane %v3823_v31, 6 }
0x251d   :  { %3863 = vmatpush.msra.mxu3 %v3840_v4 }
0x251e   :  { %3826 = vrot.lane.b32.xlu1 %v3825_v44, %s4445_s3  ;;  %v2868_v38 = vpop.permute.xlu2 %2867 }
0x251f   :  { %v2870_v32 = vadd.f32 %v5483_v30, %v2868_v38  ;;  %3864 = vmatpush.msra.mxu3 %v3839_v52 }
0x2521   :  { %v3844_v53 = vrot.slane %v2870_v32, 6  ;;  %v4305_v11 = vpop.eup %4304 }
0x2522   :  { %v3794_v62 = vadd.f32 1.0, %v4305_v11 }
0x2524   :  { %4306 = vrcp.f32 %v3794_v62  ;;  %v3806_v35 = vand.u32 2147483648, %v3794_v62  ;;  %vm3800_vm14 = vweird.f32 %v3794_v62  ;;  %v3804_v6 = vand.u32 2147483647, %v3794_v62 }
0x2526   :  { %3845 = vrot.lane.b32.xlu1 %v3844_v53, %s4443_s0  ;;  %v3807_v17 = vor.u32 1.1754944e-38, %v3806_v35  ;;  %vm3805_vm0 = vcmp.eq.f32.partialorder %v3804_v6, 8.507059e+37 }
0x252a   :  { %v4307_v24 = vpop.eup %4306 }
0x252b   :  { %v3796_v20 = vmul.f32 %v4307_v24, %v3794_v62  ;;  %vm3801_vm13 = vweird.f32 %v4307_v24 }
0x252c   :  { %vm3802_vm15 = vmor %vm3800_vm14, %vm3801_vm13 }
0x252d   :  { %v3797_v30 = vsub.f32 1.0, %v3796_v20 }
0x252f   :  { %v3798_v63 = vmul.f32 %v4307_v24, %v3797_v30 }
0x2531   :  { %v3799_v40 = vadd.f32 %v4307_v24, %v3798_v63 }
0x2533   :  { %v3803_v55 = vsel %vm3802_vm15, %v4307_v24, %v3799_v40 }
0x2534   :  { %v3808_v48 = vsel %vm3805_vm0, %v3807_v17, %v3803_v55 }
0x2590   :  { %v3827_v0 = vpop.permute.xlu1 %3826 }
0x2591   :  { %v3829_v34 = vmul.f32 %v3827_v0, %v3808_v48 }
0x2593   :  { %3831 = vrot.lane.b32.xlu0 %v3829_v34, %s4444_s1  ;;  %s3909_s1 = sshll.u32 %s5545_s9, 4  ;;  %s3910_s1 = int_to_ptr.hbm [resolvable:$true] %s3909_s1 }
0x2598   :  { %v3846_v60 = vpop.permute.xlu1 %3845 }
0x2599   :  { %4045 = vmatmul.msk.f32.vlgmr.msra.gmra.mxu3 %vm196_vm2, %v3846_v60 }
0x2605   :  { %v3832_v12 = vpop.permute.xlu0 %3831 }
0x2606   :  { %v3834_v57 = vadd.f32 %v4303_v15, %v3832_v12 }
0x2608   :  { %v3870_v16 = vrot.slane %v3834_v57, 6 }
0x260a   :  { %3871 = vrot.lane.b32.xlu2 %v3870_v16, %s4443_s0 }
0x261c   :  { %v3866_v1 = vpop.f32.mrf.mxu3 }
0x2664   :  { %v3872_v46 = vpop.permute.xlu2 %3871 }
0x2665   :  { %4046 = vmatmul.msk.f32.vlgmr.msra.gmra.mxu0 %vm196_vm2, %v3872_v46 }
0x26e2   :  { %v3892_v43 = vpop.f32.mrf.mxu0 }
0x26e3   :  { %v3893_v3 = vadd.f32 %v3892_v43, %v3866_v1 }
0x26e5   :  { %v3899_v13 = vadd.f32 %v4057_v41, %v3893_v3 }
0x26e7   :  { %3901 = vst.msk [vmem:[#allocation9] sm:$0x3] %vm3900_vm3, %v3899_v13 }
0x26e8   :  { %3912 = dma.vmem_to_hbm [thread:$0]  %s3908_s10, 32, %s3910_s1, [#allocation5]  }
0x26e9   :  { %4435 = dma.done.wait [#allocation5], 32  }
0x26ea   :  { %4436 = vsyncadd [#allocation5], 4294967264 }
0x26eb   :  { %3917 = vsyncpa [#allocation4], 1 }
0x26ec   :  { %3918 = vsyncpa [#allocation7], 1 }
0x26ed   :  { %3919 = vsyncpa [#allocation5], 1 }

</bundles_post_ra>
